<compile_context>
chip_gen: v7x
topology: tpu7x:2x2x1
jax: 0.10.0
libtpu: 0.0.40
codegen_flags: <defaults>
</compile_context>

<pallas_src>
import jax
import jax.numpy as jnp
from jax.experimental import pallas as pl
from jax.experimental.pallas import tpu as pltpu


def _round_up(x, m):
    return ((x + m - 1) // m) * m


def _round_down(x, m):
    return (x // m) * m


def _vmem_capacity_bytes():
    try:
        info = pltpu.get_tpu_info()
        cap = getattr(info, "vmem_capacity_bytes", None)
        if cap:
            return int(cap)
    except Exception:
        pass
    return 64 * 1024 * 1024  # conservative: v7x per-TensorCore VMEM


def _lstm_cls_kernel(emb_ref, w_ih_f_ref, w_ih_r_ref, w_hh_f_ref, w_hh_r_ref,
                     b_f_ref, b_r_ref, w_out_f_ref, w_out_r_ref, b_out_ref,
                     out_ref, xf_ref, xr_ref, mf_ref, mr_ref):
    T, tb, Ep = emb_ref.shape
    G = w_hh_f_ref.shape[1]          # 4 * Hp  (per-gate width padded to 128 lanes)
    Hp = G // 4
    rec_dtype = w_hh_f_ref.dtype     # bf16 by default; f32 on the verification path

    # --- Bulk input projection for BOTH directions, chunked over T, written straight
    # into low-precision VMEM scratch with the combined biases folded in (no big
    # (T*tb, 2G) f32 intermediate).
    w_ih_f = w_ih_f_ref[...]
    w_ih_r = w_ih_r_ref[...]
    b_f = b_f_ref[...]
    b_r = b_r_ref[...]
    t_chunk = T if T <= 16 else 16
    for t0 in range(0, T, t_chunk):
        tc = min(t_chunk, T - t0)
        e2d = emb_ref[t0:t0 + tc].reshape(tc * tb, Ep)
        pf = jnp.dot(e2d, w_ih_f, preferred_element_type=jnp.float32) + b_f
        xf_ref[t0:t0 + tc] = pf.astype(xf_ref.dtype).reshape(tc, tb, G)
        pr = jnp.dot(e2d, w_ih_r, preferred_element_type=jnp.float32) + b_r
        xr_ref[t0:t0 + tc] = pr.astype(xr_ref.dtype).reshape(tc, tb, G)

    w_hh_f = w_hh_f_ref[...]
    w_hh_r = w_hh_r_ref[...]

    # Running per-direction max-over-time in VMEM scratch (out of the loop carry:
    # the vst slot is idle in the latency-bound recurrence, and this frees ~16 vregs).
    mf_ref[...] = jnp.full((tb, Hp), -jnp.inf, jnp.float32)
    mr_ref[...] = jnp.full((tb, Hp), -jnp.inf, jnp.float32)

    def cell(pre, h, c, w_hh):
        # Gate order packed as [i, f, o, g]: one sigmoid over 3*Hp lanes, one tanh.
        # h / w_hh are rec_dtype (bf16) -> fast MXU pass on the serial chain;
        # gates, c and the elementwise math stay f32.
        g = pre.astype(jnp.float32) + jnp.dot(h, w_hh, preferred_element_type=jnp.float32)
        sg = jax.nn.sigmoid(g[:, :3 * Hp])
        i = sg[:, :Hp]
        f = sg[:, Hp:2 * Hp]
        o = sg[:, 2 * Hp:3 * Hp]
        gg = jnp.tanh(g[:, 3 * Hp:])
        c_new = f * c + i * gg
        h_new = o * jnp.tanh(c_new)
        return h_new, c_new

    h0 = jnp.zeros((tb, Hp), rec_dtype)
    c0 = jnp.zeros((tb, Hp), jnp.float32)

    def body(t, carry):
        h_f, c_f, h_r, c_r = carry
        # Interleave fwd / rev directions so the two serial h->h chains overlap.
        hf_new, c_f = cell(xf_ref[t], h_f, c_f, w_hh_f)
        hr_new, c_r = cell(xr_ref[T - 1 - t], h_r, c_r, w_hh_r)
        mf_ref[...] = jnp.maximum(mf_ref[...], hf_new)
        mr_ref[...] = jnp.maximum(mr_ref[...], hr_new)
        return (hf_new.astype(rec_dtype), c_f, hr_new.astype(rec_dtype), c_r)

    # Full unroll for short sequences; partial unroll otherwise so the LLO scheduler
    # can overlap step t's elementwise/EUP tail with step t+1's other-direction matmul.
    unroll = True if T <= 16 else 4
    jax.lax.fori_loop(0, T, body, (h0, c0, h0, c0), unroll=unroll)

    # Final Linear on the pooled (max-over-time) features; weights split per direction.
    logits = (jnp.dot(mf_ref[...], w_out_f_ref[...], preferred_element_type=jnp.float32)
              + jnp.dot(mr_ref[...], w_out_r_ref[...], preferred_element_type=jnp.float32)
              + b_out_ref[...])
    out_ref[...] = logits.astype(out_ref.dtype)


def lstm_for_classification(token_ids, params, *, proj_dtype=jnp.bfloat16,
                            max_tile_b=128, vmem_budget_frac=0.7):
    """token_ids: (batch, seq) int32. Returns logits (batch, num_labels) f32."""
    emb_table = params["embedding"]
    B, T = token_ids.shape
    E = emb_table.shape[1]
    H = params["w_hh_f"].shape[1]          # per-direction hidden (hidden_size // 2)
    L = params["w_out"].shape[0]           # num_labels

    Hp = _round_up(H, 128)                 # lane-aligned per-gate width
    G = 4 * Hp
    Ep = _round_up(E, 128)                 # lane-aligned projection contraction dim
    Lp = _round_up(L, 128)                 # lane-dense logits store
    proj_dtype = jnp.dtype(proj_dtype)
    itemsize = proj_dtype.itemsize

    def repack_gates(x, axis):
        # torch gate order [i, f, g, o] -> kernel order [i, f, o, g], each padded H -> Hp.
        sl = lambda a, b: jax.lax.slice_in_dim(x, a, b, axis=axis)
        i_, f_, g_, o_ = sl(0, H), sl(H, 2 * H), sl(2 * H, 3 * H), sl(3 * H, 4 * H)
        def pad(blk):
            pads = [(0, 0)] * x.ndim
            pads[axis] = (0, Hp - H)
            return jnp.pad(blk, pads)
        return jnp.concatenate([pad(i_), pad(f_), pad(o_), pad(g_)], axis=axis)

    # Pre-transposed, lane/K-padded weights (no in-kernel per-step transposes).
    def pack_ih(w):                                    # (4H, E) -> (Ep, G)
        wt = repack_gates(w, 0).T
        return jnp.pad(wt, ((0, Ep - E), (0, 0))).astype(proj_dtype)

    def pack_hh(w):                                    # (4H, H) -> (Hp, G), low precision
        wt = repack_gates(w, 0).T
        return jnp.pad(wt, ((0, Hp - H), (0, 0))).astype(proj_dtype)

    w_ih_f = pack_ih(params["w_ih_f"])
    w_ih_r = pack_ih(params["w_ih_r"])
    w_hh_f = pack_hh(params["w_hh_f"])
    w_hh_r = pack_hh(params["w_hh_r"])
    b_f = repack_gates(params["b_f"], 1).astype(jnp.float32)            # (1, G)
    b_r = repack_gates(params["b_r"], 1).astype(jnp.float32)
    w_out = params["w_out"]                                             # (L, 2H)
    w_out_f = jnp.pad(w_out[:, :H].T, ((0, Hp - H), (0, Lp - L))).astype(jnp.float32)
    w_out_r = jnp.pad(w_out[:, H:].T, ((0, Hp - H), (0, Lp - L))).astype(jnp.float32)
    b_out = jnp.pad(params["b_out"], ((0, 0), (0, Lp - L))).astype(jnp.float32)

    # --- VMEM-aware batch tile. Sublane-align the tile to the dtype packing (8 rows
    # f32, 16 rows bf16) so in-kernel reshapes are pure tile relabels.
    sub = 8 * (4 // itemsize)
    B0 = _round_up(B, sub)

    t_chunk = T if T <= 16 else 16
    # Per-batch-row VMEM bytes: xf/xr scratch + double-buffered emb block + mf/mr
    # scratch + double-buffered output block + one projection chunk of f32 temporaries.
    per_row = (2 * T * G * itemsize          # xf + xr scratch (low precision)
               + 2 * T * Ep * itemsize       # emb input block, double-buffered
               + 2 * Hp * 4                  # mf + mr scratch (f32)
               + 2 * Lp * 4                  # output block, double-buffered
               + 2 * t_chunk * G * 4)        # per-chunk projection temporaries
    # Constant-index weight blocks (double-buffered by the pipeline).
    # TODO(synk): pipeline_mode=pl.Buffered(1) on the weight BlockSpecs would drop the
    # duplicate weight buffers (~1 MiB headroom on tight-VMEM parts).
    fixed = 2 * (2 * Ep * G * itemsize + 2 * Hp * G * itemsize
                 + 2 * G * 4 + 2 * Hp * Lp * 4 + Lp * 4)

    capacity = _vmem_capacity_bytes()
    budget = int(capacity * vmem_budget_frac)
    tile_b = _round_down(max(budget - fixed, per_row * sub) // per_row, sub)
    tile_b = max(sub, min(tile_b, _round_up(max_tile_b, sub), B0))

    # Keep >= 2 parallel grid steps when the batch allows it so megacore (2 TCs on v7x)
    # has work for both cores.
    # TODO(synk): when B0 < 2*sub, a fwd/rev direction split across cores would still
    # occupy the second TensorCore; not implemented here.
    if -(-B0 // tile_b) < 2 and B0 >= 2 * sub:
        tile_b = _round_up(-(-B0 // 2), sub)

    B_pad = _round_up(B0, tile_b)
    nb = B_pad // tile_b

    # Embedding gather (glue) -> time-major (T, B, E), padded to (T, B_pad, Ep).
    # TODO(synk): gather stays in the wrapper (jnp.take); an in-kernel scalar-prefetch
    # DMA gather would avoid re-reading the (T,B,E) slab through HBM.
    emb = jnp.take(emb_table, token_ids.T, axis=0)
    emb = jnp.pad(emb, ((0, 0), (0, B_pad - B), (0, Ep - E))).astype(proj_dtype)

    weights = (w_ih_f, w_ih_r, w_hh_f, w_hh_r, b_f, b_r, w_out_f, w_out_r, b_out)
    full = lambda a: pl.BlockSpec(a.shape, lambda i: (0,) * a.ndim)
    in_specs = [pl.BlockSpec((T, tile_b, Ep), lambda i: (0, i, 0))] + [full(a) for a in weights]

    # Advisory cost estimate so XLA schedules the surrounding gather/pad sensibly
    # around a kernel dominated by a serial loop it can't see.
    flops = (2 * T * B_pad * Ep * 2 * G          # input projection, both directions
             + 2 * T * B_pad * Hp * 2 * G        # recurrence, both directions
             + 2 * B_pad * 2 * Hp * Lp)          # output head
    transcendentals = 10 * T * B_pad * Hp        # 3 sigmoid + 2 tanh lanes per dir per step
    bytes_accessed = (int(emb.size) * emb.dtype.itemsize
                      + sum(int(w.size) * w.dtype.itemsize for w in weights)
                      + B_pad * Lp * 4)
    cost = pl.CostEstimate(flops=int(flops), transcendentals=int(transcendentals),
                           bytes_accessed=int(bytes_accessed))

    est_total = fixed + per_row * tile_b
    vmem_limit = int(min(0.9 * capacity, max(est_total * 1.25, 32 * 1024 * 1024)))

    out = pl.pallas_call(
        _lstm_cls_kernel,
        out_shape=jax.ShapeDtypeStruct((B_pad, Lp), jnp.float32),
        grid=(nb,),
        in_specs=in_specs,
        out_specs=pl.BlockSpec((tile_b, Lp), lambda i: (i, 0)),
        scratch_shapes=[pltpu.VMEM((T, tile_b, G), proj_dtype),    # xf
                        pltpu.VMEM((T, tile_b, G), proj_dtype),    # xr
                        pltpu.VMEM((tile_b, Hp), jnp.float32),     # running max fwd
                        pltpu.VMEM((tile_b, Hp), jnp.float32)],    # running max rev
        compiler_params=pltpu.CompilerParams(
            dimension_semantics=("parallel",),
            vmem_limit_bytes=vmem_limit),
        cost_estimate=cost,
    )(emb, *weights)
    return out[:B, :L]


def _reference(token_ids, params):
    """Pure-JAX f32 reference mirroring the PyTorch forward (eval mode)."""
    emb = jnp.take(params["embedding"], token_ids.T, axis=0).astype(jnp.float32)
    T, B, E = emb.shape
    H = params["w_hh_f"].shape[1]

    def run(wih, whh, b, xs):
        def step(carry, x):
            h, c = carry
            gates = x @ wih.T + h @ whh.T + b
            i = jax.nn.sigmoid(gates[:, :H])
            f = jax.nn.sigmoid(gates[:, H:2 * H])
            g = jnp.tanh(gates[:, 2 * H:3 * H])
            o = jax.nn.sigmoid(gates[:, 3 * H:])
            c = f * c + i * g
            h = o * jnp.tanh(c)
            return (h, c), h
        init = (jnp.zeros((B, H), jnp.float32), jnp.zeros((B, H), jnp.float32))
        _, hs = jax.lax.scan(step, init, xs)
        return hs

    hf = run(params["w_ih_f"], params["w_hh_f"], params["b_f"][0], emb)
    hr = run(params["w_ih_r"], params["w_hh_r"], params["b_r"][0], emb[::-1])[::-1]
    out = jnp.concatenate([hf, hr], axis=-1)          # (T, B, hidden_size)
    pooled = jnp.max(out, axis=0)                     # (B, hidden_size)
    return pooled @ params["w_out"].T + params["b_out"][0]


if __name__ == "__main__":
    key = jax.random.PRNGKey(0)

    # Small synthetic config (module defaults: hidden=150, glove emb=200, vocab huge).
    vocab, emb_dim = 100, 32
    hidden_size = 32          # bi-LSTM: hidden_size // 2 = 16 per direction
    H = hidden_size // 2
    num_labels = 2
    B, T = 2, 8

    ks = jax.random.split(key, 12)

    def u(k, shape, scale=0.25):
        return jax.random.uniform(k, shape, jnp.float32, -1.0, 1.0) * scale

    params = {
        "embedding": jax.random.normal(ks[0], (vocab, emb_dim), jnp.float32) * 0.1,
        "w_ih_f": u(ks[1], (4 * H, emb_dim)),
        "w_hh_f": u(ks[2], (4 * H, H)),
        # combined bias b_ih + b_hh, kept 2-D
        "b_f": (u(ks[3], (4 * H,)) + u(ks[4], (4 * H,))).reshape(1, 4 * H),
        "w_ih_r": u(ks[5], (4 * H, emb_dim)),
        "w_hh_r": u(ks[6], (4 * H, H)),
        "b_r": (u(ks[7], (4 * H,)) + u(ks[8], (4 * H,))).reshape(1, 4 * H),
        "w_out": u(ks[9], (num_labels, hidden_size)),
        "b_out": u(ks[10], (num_labels,)).reshape(1, num_labels),
    }
    token_ids = jax.random.randint(ks[11], (B, T), 0, vocab, dtype=jnp.int32)

    ref = _reference(token_ids, params)

    # Default path: bf16 projection + bf16 recurrent matmul (f32 gates/cell) -> loose tol.
    logits = jax.block_until_ready(lstm_for_classification(token_ids, params))
    assert logits.shape == (B, num_labels)
    assert jnp.allclose(logits, ref, atol=3e-2, rtol=3e-2), (logits, ref)

    # Full-f32 path -> tight tolerance (validates the algorithm exactly).
    logits_f32 = jax.block_until_ready(
        lstm_for_classification(token_ids, params, proj_dtype=jnp.float32))
    assert jnp.allclose(logits_f32, ref, atol=1e-3, rtol=1e-3), (logits_f32, ref)

    print("KERNEL_OK")
</pallas_src>

<mosaic_0001>
module attributes {stable_mosaic.version = 11 : i64} {
  func.func @_lstm_cls_kernel(%arg0: i32, %arg1: memref<8x16x128xbf16, #tpu.memory_space<vmem>>, %arg2: memref<128x512xbf16, #tpu.memory_space<vmem>>, %arg3: memref<128x512xbf16, #tpu.memory_space<vmem>>, %arg4: memref<128x512xbf16, #tpu.memory_space<vmem>>, %arg5: memref<128x512xbf16, #tpu.memory_space<vmem>>, %arg6: memref<1x512xf32, #tpu.memory_space<vmem>>, %arg7: memref<1x512xf32, #tpu.memory_space<vmem>>, %arg8: memref<128x128xf32, #tpu.memory_space<vmem>>, %arg9: memref<128x128xf32, #tpu.memory_space<vmem>>, %arg10: memref<1x128xf32, #tpu.memory_space<vmem>>, %arg11: memref<16x128xf32, #tpu.memory_space<vmem>>, %arg12: memref<8x16x512xbf16, #tpu.memory_space<vmem>>, %arg13: memref<8x16x512xbf16, #tpu.memory_space<vmem>>, %arg14: memref<16x128xf32, #tpu.memory_space<vmem>>, %arg15: memref<16x128xf32, #tpu.memory_space<vmem>>) attributes {dimension_semantics = [#tpu.dimension_semantics<parallel>], iteration_bounds = array<i64: 1>, scalar_prefetch = 0 : i64, scratch_operands = 4 : i64, tpu.core_type = #tpu.core_type<tc>, window_params = [{transform_indices = @transform_0, window_bounds = array<i64: 8, 16, 128>}, {pipeline_mode = #tpu.pipeline_mode<synchronous>, transform_indices = @transform_1, window_bounds = array<i64: 128, 512>}, {pipeline_mode = #tpu.pipeline_mode<synchronous>, transform_indices = @transform_2, window_bounds = array<i64: 128, 512>}, {pipeline_mode = #tpu.pipeline_mode<synchronous>, transform_indices = @transform_3, window_bounds = array<i64: 128, 512>}, {pipeline_mode = #tpu.pipeline_mode<synchronous>, transform_indices = @transform_4, window_bounds = array<i64: 128, 512>}, {pipeline_mode = #tpu.pipeline_mode<synchronous>, transform_indices = @transform_5, window_bounds = array<i64: 1, 512>}, {pipeline_mode = #tpu.pipeline_mode<synchronous>, transform_indices = @transform_6, window_bounds = array<i64: 1, 512>}, {pipeline_mode = #tpu.pipeline_mode<synchronous>, transform_indices = @transform_7, window_bounds = array<i64: 128, 128>}, {pipeline_mode = #tpu.pipeline_mode<synchronous>, transform_indices = @transform_8, window_bounds = array<i64: 128, 128>}, {pipeline_mode = #tpu.pipeline_mode<synchronous>, transform_indices = @transform_9, window_bounds = array<i64: 1, 128>}, {transform_indices = @transform_10, window_bounds = array<i64: 16, 128>}]} {
    %c0 = arith.constant 0 : index
    %c0_0 = arith.constant 0 : index
    %0 = vector.load %arg2[%c0, %c0_0] : memref<128x512xbf16, #tpu.memory_space<vmem>>, vector<128x512xbf16>
    %c0_1 = arith.constant 0 : index
    %c0_2 = arith.constant 0 : index
    %1 = vector.load %arg3[%c0_1, %c0_2] : memref<128x512xbf16, #tpu.memory_space<vmem>>, vector<128x512xbf16>
    %c0_3 = arith.constant 0 : index
    %c0_4 = arith.constant 0 : index
    %2 = vector.load %arg6[%c0_3, %c0_4] : memref<1x512xf32, #tpu.memory_space<vmem>>, vector<1x512xf32>
    %c0_5 = arith.constant 0 : index
    %c0_6 = arith.constant 0 : index
    %3 = vector.load %arg7[%c0_5, %c0_6] : memref<1x512xf32, #tpu.memory_space<vmem>>, vector<1x512xf32>
    %c0_7 = arith.constant 0 : index
    %c0_8 = arith.constant 0 : index
    %c0_9 = arith.constant 0 : index
    %4 = vector.load %arg1[%c0_7, %c0_8, %c0_9] : memref<8x16x128xbf16, #tpu.memory_space<vmem>>, vector<8x16x128xbf16>
    %5 = vector.shape_cast %4 : vector<8x16x128xbf16> to vector<128x128xbf16>
    %cst = arith.constant dense<0.000000e+00> : vector<128x512xf32>
    %6 = tpu.matmul %5, %0, %cst {dimension_numbers = #tpu.dot_dimension_numbers<[1], [0], [0], [1], [0, 0, 1, 1], [], []>} : vector<128x128xbf16>, vector<128x512xbf16>, vector<128x512xf32> -> vector<128x512xf32>
    %7 = vector.broadcast %2 : vector<1x512xf32> to vector<128x512xf32>
    %8 = arith.addf %6, %7 : vector<128x512xf32>
    %9 = arith.truncf %8 : vector<128x512xf32> to vector<128x512xbf16>
    %10 = vector.shape_cast %9 : vector<128x512xbf16> to vector<8x16x512xbf16>
    %c0_10 = arith.constant 0 : index
    %c0_11 = arith.constant 0 : index
    %c0_12 = arith.constant 0 : index
    %11 = vector.load %arg12[%c0_10, %c0_11, %c0_12] : memref<8x16x512xbf16, #tpu.memory_space<vmem>>, vector<8x16x512xbf16>
    tpu.vector_store %arg12[%c0_10, %c0_11, %c0_12], %10 {strides = array<i32>} : memref<8x16x512xbf16, #tpu.memory_space<vmem>>, vector<8x16x512xbf16>,
    %cst_13 = arith.constant dense<0.000000e+00> : vector<128x512xf32>
    %12 = tpu.matmul %5, %1, %cst_13 {dimension_numbers = #tpu.dot_dimension_numbers<[1], [0], [0], [1], [0, 0, 1, 1], [], []>} : vector<128x128xbf16>, vector<128x512xbf16>, vector<128x512xf32> -> vector<128x512xf32>
    %13 = vector.broadcast %3 : vector<1x512xf32> to vector<128x512xf32>
    %14 = arith.addf %12, %13 : vector<128x512xf32>
    %15 = arith.truncf %14 : vector<128x512xf32> to vector<128x512xbf16>
    %16 = vector.shape_cast %15 : vector<128x512xbf16> to vector<8x16x512xbf16>
    %c0_14 = arith.constant 0 : index
    %c0_15 = arith.constant 0 : index
    %c0_16 = arith.constant 0 : index
    %17 = vector.load %arg13[%c0_14, %c0_15, %c0_16] : memref<8x16x512xbf16, #tpu.memory_space<vmem>>, vector<8x16x512xbf16>
    tpu.vector_store %arg13[%c0_14, %c0_15, %c0_16], %16 {strides = array<i32>} : memref<8x16x512xbf16, #tpu.memory_space<vmem>>, vector<8x16x512xbf16>,
    %c0_17 = arith.constant 0 : index
    %c0_18 = arith.constant 0 : index
    %18 = vector.load %arg4[%c0_17, %c0_18] : memref<128x512xbf16, #tpu.memory_space<vmem>>, vector<128x512xbf16>
    %c0_19 = arith.constant 0 : index
    %c0_20 = arith.constant 0 : index
    %19 = vector.load %arg5[%c0_19, %c0_20] : memref<128x512xbf16, #tpu.memory_space<vmem>>, vector<128x512xbf16>
    %cst_21 = arith.constant 0xFF800000 : f32
    %20 = vector.broadcast %cst_21 : f32 to vector<16x128xf32>
    %c0_22 = arith.constant 0 : index
    %c0_23 = arith.constant 0 : index
    %21 = vector.load %arg14[%c0_22, %c0_23] : memref<16x128xf32, #tpu.memory_space<vmem>>, vector<16x128xf32>
    tpu.vector_store %arg14[%c0_22, %c0_23], %20 {strides = array<i32>} : memref<16x128xf32, #tpu.memory_space<vmem>>, vector<16x128xf32>,
    %cst_24 = arith.constant 0xFF800000 : f32
    %22 = vector.broadcast %cst_24 : f32 to vector<16x128xf32>
    %c0_25 = arith.constant 0 : index
    %c0_26 = arith.constant 0 : index
    %23 = vector.load %arg15[%c0_25, %c0_26] : memref<16x128xf32, #tpu.memory_space<vmem>>, vector<16x128xf32>
    tpu.vector_store %arg15[%c0_25, %c0_26], %22 {strides = array<i32>} : memref<16x128xf32, #tpu.memory_space<vmem>>, vector<16x128xf32>,
    %cst_27 = arith.constant 0.000000e+00 : bf16
    %24 = vector.broadcast %cst_27 : bf16 to vector<16x128xbf16>
    %cst_28 = arith.constant 0.000000e+00 : f32
    %25 = vector.broadcast %cst_28 : f32 to vector<16x128xf32>
    %c0_i32 = arith.constant 0 : i32
    %26 = arith.index_cast %c0_i32 : i32 to index
    %c0_29 = arith.constant 0 : index
    %c0_30 = arith.constant 0 : index
    %27 = vector.load %arg12[%26, %c0_29, %c0_30] : memref<8x16x512xbf16, #tpu.memory_space<vmem>>, vector<1x16x512xbf16>
    %28 = vector.shape_cast %27 : vector<1x16x512xbf16> to vector<16x512xbf16>
    %29 = arith.extf %28 : vector<16x512xbf16> to vector<16x512xf32>
    %cst_31 = arith.constant dense<0.000000e+00> : vector<16x512xf32>
    %30 = tpu.matmul %24, %18, %cst_31 {dimension_numbers = #tpu.dot_dimension_numbers<[1], [0], [0], [1], [0, 0, 1, 1], [], []>} : vector<16x128xbf16>, vector<128x512xbf16>, vector<16x512xf32> -> vector<16x512xf32>
    %31 = arith.addf %29, %30 : vector<16x512xf32>
    %32 = vector.extract_strided_slice %31 {offsets = [0, 0], sizes = [16, 384], strides = [1, 1]} : vector<16x512xf32> to vector<16x384xf32>
    %33 = arith.negf %32 : vector<16x384xf32>
    %34 = math.exp %33 : vector<16x384xf32>
    %cst_32 = arith.constant 1.000000e+00 : f32
    %35 = vector.broadcast %cst_32 : f32 to vector<16x384xf32>
    %36 = arith.addf %35, %34 : vector<16x384xf32>
    %37 = arith.divf %35, %36 : vector<16x384xf32>
    %38 = vector.extract_strided_slice %37 {offsets = [0, 0], sizes = [16, 128], strides = [1, 1]} : vector<16x384xf32> to vector<16x128xf32>
    %39 = vector.extract_strided_slice %37 {offsets = [0, 128], sizes = [16, 128], strides = [1, 1]} : vector<16x384xf32> to vector<16x128xf32>
    %40 = vector.extract_strided_slice %37 {offsets = [0, 256], sizes = [16, 128], strides = [1, 1]} : vector<16x384xf32> to vector<16x128xf32>
    %41 = vector.extract_strided_slice %31 {offsets = [0, 384], sizes = [16, 128], strides = [1, 1]} : vector<16x512xf32> to vector<16x128xf32>
    %42 = math.tanh %41 : vector<16x128xf32>
    %43 = arith.mulf %39, %25 : vector<16x128xf32>
    %44 = arith.mulf %38, %42 : vector<16x128xf32>
    %45 = arith.addf %43, %44 : vector<16x128xf32>
    %46 = math.tanh %45 : vector<16x128xf32>
    %47 = arith.mulf %40, %46 : vector<16x128xf32>
    %c7_i32 = arith.constant 7 : i32
    %48 = arith.subi %c7_i32, %c0_i32 : i32
    %49 = arith.index_cast %48 : i32 to index
    %c0_33 = arith.constant 0 : index
    %c0_34 = arith.constant 0 : index
    %50 = vector.load %arg13[%49, %c0_33, %c0_34] : memref<8x16x512xbf16, #tpu.memory_space<vmem>>, vector<1x16x512xbf16>
    %51 = vector.shape_cast %50 : vector<1x16x512xbf16> to vector<16x512xbf16>
    %52 = arith.extf %51 : vector<16x512xbf16> to vector<16x512xf32>
    %cst_35 = arith.constant dense<0.000000e+00> : vector<16x512xf32>
    %53 = tpu.matmul %24, %19, %cst_35 {dimension_numbers = #tpu.dot_dimension_numbers<[1], [0], [0], [1], [0, 0, 1, 1], [], []>} : vector<16x128xbf16>, vector<128x512xbf16>, vector<16x512xf32> -> vector<16x512xf32>
    %54 = arith.addf %52, %53 : vector<16x512xf32>
    %55 = vector.extract_strided_slice %54 {offsets = [0, 0], sizes = [16, 384], strides = [1, 1]} : vector<16x512xf32> to vector<16x384xf32>
    %56 = arith.negf %55 : vector<16x384xf32>
    %57 = math.exp %56 : vector<16x384xf32>
    %cst_36 = arith.constant 1.000000e+00 : f32
    %58 = vector.broadcast %cst_36 : f32 to vector<16x384xf32>
    %59 = arith.addf %58, %57 : vector<16x384xf32>
    %60 = arith.divf %58, %59 : vector<16x384xf32>
    %61 = vector.extract_strided_slice %60 {offsets = [0, 0], sizes = [16, 128], strides = [1, 1]} : vector<16x384xf32> to vector<16x128xf32>
    %62 = vector.extract_strided_slice %60 {offsets = [0, 128], sizes = [16, 128], strides = [1, 1]} : vector<16x384xf32> to vector<16x128xf32>
    %63 = vector.extract_strided_slice %60 {offsets = [0, 256], sizes = [16, 128], strides = [1, 1]} : vector<16x384xf32> to vector<16x128xf32>
    %64 = vector.extract_strided_slice %54 {offsets = [0, 384], sizes = [16, 128], strides = [1, 1]} : vector<16x512xf32> to vector<16x128xf32>
    %65 = math.tanh %64 : vector<16x128xf32>
    %66 = arith.mulf %62, %25 : vector<16x128xf32>
    %67 = arith.mulf %61, %65 : vector<16x128xf32>
    %68 = arith.addf %66, %67 : vector<16x128xf32>
    %69 = math.tanh %68 : vector<16x128xf32>
    %70 = arith.mulf %63, %69 : vector<16x128xf32>
    %c0_37 = arith.constant 0 : index
    %c0_38 = arith.constant 0 : index
    %71 = vector.load %arg14[%c0_37, %c0_38] : memref<16x128xf32, #tpu.memory_space<vmem>>, vector<16x128xf32>
    %72 = arith.maximumf %71, %47 : vector<16x128xf32>
    %c0_39 = arith.constant 0 : index
    %c0_40 = arith.constant 0 : index
    %73 = vector.load %arg14[%c0_39, %c0_40] : memref<16x128xf32, #tpu.memory_space<vmem>>, vector<16x128xf32>
    tpu.vector_store %arg14[%c0_39, %c0_40], %72 {strides = array<i32>} : memref<16x128xf32, #tpu.memory_space<vmem>>, vector<16x128xf32>,
    %c0_41 = arith.constant 0 : index
    %c0_42 = arith.constant 0 : index
    %74 = vector.load %arg15[%c0_41, %c0_42] : memref<16x128xf32, #tpu.memory_space<vmem>>, vector<16x128xf32>
    %75 = arith.maximumf %74, %70 : vector<16x128xf32>
    %c0_43 = arith.constant 0 : index
    %c0_44 = arith.constant 0 : index
    %76 = vector.load %arg15[%c0_43, %c0_44] : memref<16x128xf32, #tpu.memory_space<vmem>>, vector<16x128xf32>
    tpu.vector_store %arg15[%c0_43, %c0_44], %75 {strides = array<i32>} : memref<16x128xf32, #tpu.memory_space<vmem>>, vector<16x128xf32>,
    %77 = arith.truncf %47 : vector<16x128xf32> to vector<16x128xbf16>
    %78 = arith.truncf %70 : vector<16x128xf32> to vector<16x128xbf16>
    %c1_i32 = arith.constant 1 : i32
    %79 = arith.index_cast %c1_i32 : i32 to index
    %c0_45 = arith.constant 0 : index
    %c0_46 = arith.constant 0 : index
    %80 = vector.load %arg12[%79, %c0_45, %c0_46] : memref<8x16x512xbf16, #tpu.memory_space<vmem>>, vector<1x16x512xbf16>
    %81 = vector.shape_cast %80 : vector<1x16x512xbf16> to vector<16x512xbf16>
    %82 = arith.extf %81 : vector<16x512xbf16> to vector<16x512xf32>
    %cst_47 = arith.constant dense<0.000000e+00> : vector<16x512xf32>
    %83 = tpu.matmul %77, %18, %cst_47 {dimension_numbers = #tpu.dot_dimension_numbers<[1], [0], [0], [1], [0, 0, 1, 1], [], []>} : vector<16x128xbf16>, vector<128x512xbf16>, vector<16x512xf32> -> vector<16x512xf32>
    %84 = arith.addf %82, %83 : vector<16x512xf32>
    %85 = vector.extract_strided_slice %84 {offsets = [0, 0], sizes = [16, 384], strides = [1, 1]} : vector<16x512xf32> to vector<16x384xf32>
    %86 = arith.negf %85 : vector<16x384xf32>
    %87 = math.exp %86 : vector<16x384xf32>
    %cst_48 = arith.constant 1.000000e+00 : f32
    %88 = vector.broadcast %cst_48 : f32 to vector<16x384xf32>
    %89 = arith.addf %88, %87 : vector<16x384xf32>
    %90 = arith.divf %88, %89 : vector<16x384xf32>
    %91 = vector.extract_strided_slice %90 {offsets = [0, 0], sizes = [16, 128], strides = [1, 1]} : vector<16x384xf32> to vector<16x128xf32>
    %92 = vector.extract_strided_slice %90 {offsets = [0, 128], sizes = [16, 128], strides = [1, 1]} : vector<16x384xf32> to vector<16x128xf32>
    %93 = vector.extract_strided_slice %90 {offsets = [0, 256], sizes = [16, 128], strides = [1, 1]} : vector<16x384xf32> to vector<16x128xf32>
    %94 = vector.extract_strided_slice %84 {offsets = [0, 384], sizes = [16, 128], strides = [1, 1]} : vector<16x512xf32> to vector<16x128xf32>
    %95 = math.tanh %94 : vector<16x128xf32>
    %96 = arith.mulf %92, %45 : vector<16x128xf32>
    %97 = arith.mulf %91, %95 : vector<16x128xf32>
    %98 = arith.addf %96, %97 : vector<16x128xf32>
    %99 = math.tanh %98 : vector<16x128xf32>
    %100 = arith.mulf %93, %99 : vector<16x128xf32>
    %c7_i32_49 = arith.constant 7 : i32
    %101 = arith.subi %c7_i32_49, %c1_i32 : i32
    %102 = arith.index_cast %101 : i32 to index
    %c0_50 = arith.constant 0 : index
    %c0_51 = arith.constant 0 : index
    %103 = vector.load %arg13[%102, %c0_50, %c0_51] : memref<8x16x512xbf16, #tpu.memory_space<vmem>>, vector<1x16x512xbf16>
    %104 = vector.shape_cast %103 : vector<1x16x512xbf16> to vector<16x512xbf16>
    %105 = arith.extf %104 : vector<16x512xbf16> to vector<16x512xf32>
    %cst_52 = arith.constant dense<0.000000e+00> : vector<16x512xf32>
    %106 = tpu.matmul %78, %19, %cst_52 {dimension_numbers = #tpu.dot_dimension_numbers<[1], [0], [0], [1], [0, 0, 1, 1], [], []>} : vector<16x128xbf16>, vector<128x512xbf16>, vector<16x512xf32> -> vector<16x512xf32>
    %107 = arith.addf %105, %106 : vector<16x512xf32>
    %108 = vector.extract_strided_slice %107 {offsets = [0, 0], sizes = [16, 384], strides = [1, 1]} : vector<16x512xf32> to vector<16x384xf32>
    %109 = arith.negf %108 : vector<16x384xf32>
    %110 = math.exp %109 : vector<16x384xf32>
    %cst_53 = arith.constant 1.000000e+00 : f32
    %111 = vector.broadcast %cst_53 : f32 to vector<16x384xf32>
    %112 = arith.addf %111, %110 : vector<16x384xf32>
    %113 = arith.divf %111, %112 : vector<16x384xf32>
    %114 = vector.extract_strided_slice %113 {offsets = [0, 0], sizes = [16, 128], strides = [1, 1]} : vector<16x384xf32> to vector<16x128xf32>
    %115 = vector.extract_strided_slice %113 {offsets = [0, 128], sizes = [16, 128], strides = [1, 1]} : vector<16x384xf32> to vector<16x128xf32>
    %116 = vector.extract_strided_slice %113 {offsets = [0, 256], sizes = [16, 128], strides = [1, 1]} : vector<16x384xf32> to vector<16x128xf32>
    %117 = vector.extract_strided_slice %107 {offsets = [0, 384], sizes = [16, 128], strides = [1, 1]} : vector<16x512xf32> to vector<16x128xf32>
    %118 = math.tanh %117 : vector<16x128xf32>
    %119 = arith.mulf %115, %68 : vector<16x128xf32>
    %120 = arith.mulf %114, %118 : vector<16x128xf32>
    %121 = arith.addf %119, %120 : vector<16x128xf32>
    %122 = math.tanh %121 : vector<16x128xf32>
    %123 = arith.mulf %116, %122 : vector<16x128xf32>
    %c0_54 = arith.constant 0 : index
    %c0_55 = arith.constant 0 : index
    %124 = vector.load %arg14[%c0_54, %c0_55] : memref<16x128xf32, #tpu.memory_space<vmem>>, vector<16x128xf32>
    %125 = arith.maximumf %124, %100 : vector<16x128xf32>
    %c0_56 = arith.constant 0 : index
    %c0_57 = arith.constant 0 : index
    %126 = vector.load %arg14[%c0_56, %c0_57] : memref<16x128xf32, #tpu.memory_space<vmem>>, vector<16x128xf32>
    tpu.vector_store %arg14[%c0_56, %c0_57], %125 {strides = array<i32>} : memref<16x128xf32, #tpu.memory_space<vmem>>, vector<16x128xf32>,
    %c0_58 = arith.constant 0 : index
    %c0_59 = arith.constant 0 : index
    %127 = vector.load %arg15[%c0_58, %c0_59] : memref<16x128xf32, #tpu.memory_space<vmem>>, vector<16x128xf32>
    %128 = arith.maximumf %127, %123 : vector<16x128xf32>
    %c0_60 = arith.constant 0 : index
    %c0_61 = arith.constant 0 : index
    %129 = vector.load %arg15[%c0_60, %c0_61] : memref<16x128xf32, #tpu.memory_space<vmem>>, vector<16x128xf32>
    tpu.vector_store %arg15[%c0_60, %c0_61], %128 {strides = array<i32>} : memref<16x128xf32, #tpu.memory_space<vmem>>, vector<16x128xf32>,
    %130 = arith.truncf %100 : vector<16x128xf32> to vector<16x128xbf16>
    %131 = arith.truncf %123 : vector<16x128xf32> to vector<16x128xbf16>
    %c2_i32 = arith.constant 2 : i32
    %132 = arith.index_cast %c2_i32 : i32 to index
    %c0_62 = arith.constant 0 : index
    %c0_63 = arith.constant 0 : index
    %133 = vector.load %arg12[%132, %c0_62, %c0_63] : memref<8x16x512xbf16, #tpu.memory_space<vmem>>, vector<1x16x512xbf16>
    %134 = vector.shape_cast %133 : vector<1x16x512xbf16> to vector<16x512xbf16>
    %135 = arith.extf %134 : vector<16x512xbf16> to vector<16x512xf32>
    %cst_64 = arith.constant dense<0.000000e+00> : vector<16x512xf32>
    %136 = tpu.matmul %130, %18, %cst_64 {dimension_numbers = #tpu.dot_dimension_numbers<[1], [0], [0], [1], [0, 0, 1, 1], [], []>} : vector<16x128xbf16>, vector<128x512xbf16>, vector<16x512xf32> -> vector<16x512xf32>
    %137 = arith.addf %135, %136 : vector<16x512xf32>
    %138 = vector.extract_strided_slice %137 {offsets = [0, 0], sizes = [16, 384], strides = [1, 1]} : vector<16x512xf32> to vector<16x384xf32>
    %139 = arith.negf %138 : vector<16x384xf32>
    %140 = math.exp %139 : vector<16x384xf32>
    %cst_65 = arith.constant 1.000000e+00 : f32
    %141 = vector.broadcast %cst_65 : f32 to vector<16x384xf32>
    %142 = arith.addf %141, %140 : vector<16x384xf32>
    %143 = arith.divf %141, %142 : vector<16x384xf32>
    %144 = vector.extract_strided_slice %143 {offsets = [0, 0], sizes = [16, 128], strides = [1, 1]} : vector<16x384xf32> to vector<16x128xf32>
    %145 = vector.extract_strided_slice %143 {offsets = [0, 128], sizes = [16, 128], strides = [1, 1]} : vector<16x384xf32> to vector<16x128xf32>
    %146 = vector.extract_strided_slice %143 {offsets = [0, 256], sizes = [16, 128], strides = [1, 1]} : vector<16x384xf32> to vector<16x128xf32>
    %147 = vector.extract_strided_slice %137 {offsets = [0, 384], sizes = [16, 128], strides = [1, 1]} : vector<16x512xf32> to vector<16x128xf32>
    %148 = math.tanh %147 : vector<16x128xf32>
    %149 = arith.mulf %145, %98 : vector<16x128xf32>
    %150 = arith.mulf %144, %148 : vector<16x128xf32>
    %151 = arith.addf %149, %150 : vector<16x128xf32>
    %152 = math.tanh %151 : vector<16x128xf32>
    %153 = arith.mulf %146, %152 : vector<16x128xf32>
    %c7_i32_66 = arith.constant 7 : i32
    %154 = arith.subi %c7_i32_66, %c2_i32 : i32
    %155 = arith.index_cast %154 : i32 to index
    %c0_67 = arith.constant 0 : index
    %c0_68 = arith.constant 0 : index
    %156 = vector.load %arg13[%155, %c0_67, %c0_68] : memref<8x16x512xbf16, #tpu.memory_space<vmem>>, vector<1x16x512xbf16>
    %157 = vector.shape_cast %156 : vector<1x16x512xbf16> to vector<16x512xbf16>
    %158 = arith.extf %157 : vector<16x512xbf16> to vector<16x512xf32>
    %cst_69 = arith.constant dense<0.000000e+00> : vector<16x512xf32>
    %159 = tpu.matmul %131, %19, %cst_69 {dimension_numbers = #tpu.dot_dimension_numbers<[1], [0], [0], [1], [0, 0, 1, 1], [], []>} : vector<16x128xbf16>, vector<128x512xbf16>, vector<16x512xf32> -> vector<16x512xf32>
    %160 = arith.addf %158, %159 : vector<16x512xf32>
    %161 = vector.extract_strided_slice %160 {offsets = [0, 0], sizes = [16, 384], strides = [1, 1]} : vector<16x512xf32> to vector<16x384xf32>
    %162 = arith.negf %161 : vector<16x384xf32>
    %163 = math.exp %162 : vector<16x384xf32>
    %cst_70 = arith.constant 1.000000e+00 : f32
    %164 = vector.broadcast %cst_70 : f32 to vector<16x384xf32>
    %165 = arith.addf %164, %163 : vector<16x384xf32>
    %166 = arith.divf %164, %165 : vector<16x384xf32>
    %167 = vector.extract_strided_slice %166 {offsets = [0, 0], sizes = [16, 128], strides = [1, 1]} : vector<16x384xf32> to vector<16x128xf32>
    %168 = vector.extract_strided_slice %166 {offsets = [0, 128], sizes = [16, 128], strides = [1, 1]} : vector<16x384xf32> to vector<16x128xf32>
    %169 = vector.extract_strided_slice %166 {offsets = [0, 256], sizes = [16, 128], strides = [1, 1]} : vector<16x384xf32> to vector<16x128xf32>
    %170 = vector.extract_strided_slice %160 {offsets = [0, 384], sizes = [16, 128], strides = [1, 1]} : vector<16x512xf32> to vector<16x128xf32>
    %171 = math.tanh %170 : vector<16x128xf32>
    %172 = arith.mulf %168, %121 : vector<16x128xf32>
    %173 = arith.mulf %167, %171 : vector<16x128xf32>
    %174 = arith.addf %172, %173 : vector<16x128xf32>
    %175 = math.tanh %174 : vector<16x128xf32>
    %176 = arith.mulf %169, %175 : vector<16x128xf32>
    %c0_71 = arith.constant 0 : index
    %c0_72 = arith.constant 0 : index
    %177 = vector.load %arg14[%c0_71, %c0_72] : memref<16x128xf32, #tpu.memory_space<vmem>>, vector<16x128xf32>
    %178 = arith.maximumf %177, %153 : vector<16x128xf32>
    %c0_73 = arith.constant 0 : index
    %c0_74 = arith.constant 0 : index
    %179 = vector.load %arg14[%c0_73, %c0_74] : memref<16x128xf32, #tpu.memory_space<vmem>>, vector<16x128xf32>
    tpu.vector_store %arg14[%c0_73, %c0_74], %178 {strides = array<i32>} : memref<16x128xf32, #tpu.memory_space<vmem>>, vector<16x128xf32>,
    %c0_75 = arith.constant 0 : index
    %c0_76 = arith.constant 0 : index
    %180 = vector.load %arg15[%c0_75, %c0_76] : memref<16x128xf32, #tpu.memory_space<vmem>>, vector<16x128xf32>
    %181 = arith.maximumf %180, %176 : vector<16x128xf32>
    %c0_77 = arith.constant 0 : index
    %c0_78 = arith.constant 0 : index
    %182 = vector.load %arg15[%c0_77, %c0_78] : memref<16x128xf32, #tpu.memory_space<vmem>>, vector<16x128xf32>
    tpu.vector_store %arg15[%c0_77, %c0_78], %181 {strides = array<i32>} : memref<16x128xf32, #tpu.memory_space<vmem>>, vector<16x128xf32>,
    %183 = arith.truncf %153 : vector<16x128xf32> to vector<16x128xbf16>
    %184 = arith.truncf %176 : vector<16x128xf32> to vector<16x128xbf16>
    %c3_i32 = arith.constant 3 : i32
    %185 = arith.index_cast %c3_i32 : i32 to index
    %c0_79 = arith.constant 0 : index
    %c0_80 = arith.constant 0 : index
    %186 = vector.load %arg12[%185, %c0_79, %c0_80] : memref<8x16x512xbf16, #tpu.memory_space<vmem>>, vector<1x16x512xbf16>
    %187 = vector.shape_cast %186 : vector<1x16x512xbf16> to vector<16x512xbf16>
    %188 = arith.extf %187 : vector<16x512xbf16> to vector<16x512xf32>
    %cst_81 = arith.constant dense<0.000000e+00> : vector<16x512xf32>
    %189 = tpu.matmul %183, %18, %cst_81 {dimension_numbers = #tpu.dot_dimension_numbers<[1], [0], [0], [1], [0, 0, 1, 1], [], []>} : vector<16x128xbf16>, vector<128x512xbf16>, vector<16x512xf32> -> vector<16x512xf32>
    %190 = arith.addf %188, %189 : vector<16x512xf32>
    %191 = vector.extract_strided_slice %190 {offsets = [0, 0], sizes = [16, 384], strides = [1, 1]} : vector<16x512xf32> to vector<16x384xf32>
    %192 = arith.negf %191 : vector<16x384xf32>
    %193 = math.exp %192 : vector<16x384xf32>
    %cst_82 = arith.constant 1.000000e+00 : f32
    %194 = vector.broadcast %cst_82 : f32 to vector<16x384xf32>
    %195 = arith.addf %194, %193 : vector<16x384xf32>
    %196 = arith.divf %194, %195 : vector<16x384xf32>
    %197 = vector.extract_strided_slice %196 {offsets = [0, 0], sizes = [16, 128], strides = [1, 1]} : vector<16x384xf32> to vector<16x128xf32>
    %198 = vector.extract_strided_slice %196 {offsets = [0, 128], sizes = [16, 128], strides = [1, 1]} : vector<16x384xf32> to vector<16x128xf32>
    %199 = vector.extract_strided_slice %196 {offsets = [0, 256], sizes = [16, 128], strides = [1, 1]} : vector<16x384xf32> to vector<16x128xf32>
    %200 = vector.extract_strided_slice %190 {offsets = [0, 384], sizes = [16, 128], strides = [1, 1]} : vector<16x512xf32> to vector<16x128xf32>
    %201 = math.tanh %200 : vector<16x128xf32>
    %202 = arith.mulf %198, %151 : vector<16x128xf32>
    %203 = arith.mulf %197, %201 : vector<16x128xf32>
    %204 = arith.addf %202, %203 : vector<16x128xf32>
    %205 = math.tanh %204 : vector<16x128xf32>
    %206 = arith.mulf %199, %205 : vector<16x128xf32>
    %c7_i32_83 = arith.constant 7 : i32
    %207 = arith.subi %c7_i32_83, %c3_i32 : i32
    %208 = arith.index_cast %207 : i32 to index
    %c0_84 = arith.constant 0 : index
    %c0_85 = arith.constant 0 : index
    %209 = vector.load %arg13[%208, %c0_84, %c0_85] : memref<8x16x512xbf16, #tpu.memory_space<vmem>>, vector<1x16x512xbf16>
    %210 = vector.shape_cast %209 : vector<1x16x512xbf16> to vector<16x512xbf16>
    %211 = arith.extf %210 : vector<16x512xbf16> to vector<16x512xf32>
    %cst_86 = arith.constant dense<0.000000e+00> : vector<16x512xf32>
    %212 = tpu.matmul %184, %19, %cst_86 {dimension_numbers = #tpu.dot_dimension_numbers<[1], [0], [0], [1], [0, 0, 1, 1], [], []>} : vector<16x128xbf16>, vector<128x512xbf16>, vector<16x512xf32> -> vector<16x512xf32>
    %213 = arith.addf %211, %212 : vector<16x512xf32>
    %214 = vector.extract_strided_slice %213 {offsets = [0, 0], sizes = [16, 384], strides = [1, 1]} : vector<16x512xf32> to vector<16x384xf32>
    %215 = arith.negf %214 : vector<16x384xf32>
    %216 = math.exp %215 : vector<16x384xf32>
    %cst_87 = arith.constant 1.000000e+00 : f32
    %217 = vector.broadcast %cst_87 : f32 to vector<16x384xf32>
    %218 = arith.addf %217, %216 : vector<16x384xf32>
    %219 = arith.divf %217, %218 : vector<16x384xf32>
    %220 = vector.extract_strided_slice %219 {offsets = [0, 0], sizes = [16, 128], strides = [1, 1]} : vector<16x384xf32> to vector<16x128xf32>
    %221 = vector.extract_strided_slice %219 {offsets = [0, 128], sizes = [16, 128], strides = [1, 1]} : vector<16x384xf32> to vector<16x128xf32>
    %222 = vector.extract_strided_slice %219 {offsets = [0, 256], sizes = [16, 128], strides = [1, 1]} : vector<16x384xf32> to vector<16x128xf32>
    %223 = vector.extract_strided_slice %213 {offsets = [0, 384], sizes = [16, 128], strides = [1, 1]} : vector<16x512xf32> to vector<16x128xf32>
    %224 = math.tanh %223 : vector<16x128xf32>
    %225 = arith.mulf %221, %174 : vector<16x128xf32>
    %226 = arith.mulf %220, %224 : vector<16x128xf32>
    %227 = arith.addf %225, %226 : vector<16x128xf32>
    %228 = math.tanh %227 : vector<16x128xf32>
    %229 = arith.mulf %222, %228 : vector<16x128xf32>
    %c0_88 = arith.constant 0 : index
    %c0_89 = arith.constant 0 : index
    %230 = vector.load %arg14[%c0_88, %c0_89] : memref<16x128xf32, #tpu.memory_space<vmem>>, vector<16x128xf32>
    %231 = arith.maximumf %230, %206 : vector<16x128xf32>
    %c0_90 = arith.constant 0 : index
    %c0_91 = arith.constant 0 : index
    %232 = vector.load %arg14[%c0_90, %c0_91] : memref<16x128xf32, #tpu.memory_space<vmem>>, vector<16x128xf32>
    tpu.vector_store %arg14[%c0_90, %c0_91], %231 {strides = array<i32>} : memref<16x128xf32, #tpu.memory_space<vmem>>, vector<16x128xf32>,
    %c0_92 = arith.constant 0 : index
    %c0_93 = arith.constant 0 : index
    %233 = vector.load %arg15[%c0_92, %c0_93] : memref<16x128xf32, #tpu.memory_space<vmem>>, vector<16x128xf32>
    %234 = arith.maximumf %233, %229 : vector<16x128xf32>
    %c0_94 = arith.constant 0 : index
    %c0_95 = arith.constant 0 : index
    %235 = vector.load %arg15[%c0_94, %c0_95] : memref<16x128xf32, #tpu.memory_space<vmem>>, vector<16x128xf32>
    tpu.vector_store %arg15[%c0_94, %c0_95], %234 {strides = array<i32>} : memref<16x128xf32, #tpu.memory_space<vmem>>, vector<16x128xf32>,
    %236 = arith.truncf %206 : vector<16x128xf32> to vector<16x128xbf16>
    %237 = arith.truncf %229 : vector<16x128xf32> to vector<16x128xbf16>
    %c4_i32 = arith.constant 4 : i32
    %238 = arith.index_cast %c4_i32 : i32 to index
    %c0_96 = arith.constant 0 : index
    %c0_97 = arith.constant 0 : index
    %239 = vector.load %arg12[%238, %c0_96, %c0_97] : memref<8x16x512xbf16, #tpu.memory_space<vmem>>, vector<1x16x512xbf16>
    %240 = vector.shape_cast %239 : vector<1x16x512xbf16> to vector<16x512xbf16>
    %241 = arith.extf %240 : vector<16x512xbf16> to vector<16x512xf32>
    %cst_98 = arith.constant dense<0.000000e+00> : vector<16x512xf32>
    %242 = tpu.matmul %236, %18, %cst_98 {dimension_numbers = #tpu.dot_dimension_numbers<[1], [0], [0], [1], [0, 0, 1, 1], [], []>} : vector<16x128xbf16>, vector<128x512xbf16>, vector<16x512xf32> -> vector<16x512xf32>
    %243 = arith.addf %241, %242 : vector<16x512xf32>
    %244 = vector.extract_strided_slice %243 {offsets = [0, 0], sizes = [16, 384], strides = [1, 1]} : vector<16x512xf32> to vector<16x384xf32>
    %245 = arith.negf %244 : vector<16x384xf32>
    %246 = math.exp %245 : vector<16x384xf32>
    %cst_99 = arith.constant 1.000000e+00 : f32
    %247 = vector.broadcast %cst_99 : f32 to vector<16x384xf32>
    %248 = arith.addf %247, %246 : vector<16x384xf32>
    %249 = arith.divf %247, %248 : vector<16x384xf32>
    %250 = vector.extract_strided_slice %249 {offsets = [0, 0], sizes = [16, 128], strides = [1, 1]} : vector<16x384xf32> to vector<16x128xf32>
    %251 = vector.extract_strided_slice %249 {offsets = [0, 128], sizes = [16, 128], strides = [1, 1]} : vector<16x384xf32> to vector<16x128xf32>
    %252 = vector.extract_strided_slice %249 {offsets = [0, 256], sizes = [16, 128], strides = [1, 1]} : vector<16x384xf32> to vector<16x128xf32>
    %253 = vector.extract_strided_slice %243 {offsets = [0, 384], sizes = [16, 128], strides = [1, 1]} : vector<16x512xf32> to vector<16x128xf32>
    %254 = math.tanh %253 : vector<16x128xf32>
    %255 = arith.mulf %251, %204 : vector<16x128xf32>
    %256 = arith.mulf %250, %254 : vector<16x128xf32>
    %257 = arith.addf %255, %256 : vector<16x128xf32>
    %258 = math.tanh %257 : vector<16x128xf32>
    %259 = arith.mulf %252, %258 : vector<16x128xf32>
    %c7_i32_100 = arith.constant 7 : i32
    %260 = arith.subi %c7_i32_100, %c4_i32 : i32
    %261 = arith.index_cast %260 : i32 to index
    %c0_101 = arith.constant 0 : index
    %c0_102 = arith.constant 0 : index
    %262 = vector.load %arg13[%261, %c0_101, %c0_102] : memref<8x16x512xbf16, #tpu.memory_space<vmem>>, vector<1x16x512xbf16>
    %263 = vector.shape_cast %262 : vector<1x16x512xbf16> to vector<16x512xbf16>
    %264 = arith.extf %263 : vector<16x512xbf16> to vector<16x512xf32>
    %cst_103 = arith.constant dense<0.000000e+00> : vector<16x512xf32>
    %265 = tpu.matmul %237, %19, %cst_103 {dimension_numbers = #tpu.dot_dimension_numbers<[1], [0], [0], [1], [0, 0, 1, 1], [], []>} : vector<16x128xbf16>, vector<128x512xbf16>, vector<16x512xf32> -> vector<16x512xf32>
    %266 = arith.addf %264, %265 : vector<16x512xf32>
    %267 = vector.extract_strided_slice %266 {offsets = [0, 0], sizes = [16, 384], strides = [1, 1]} : vector<16x512xf32> to vector<16x384xf32>
    %268 = arith.negf %267 : vector<16x384xf32>
    %269 = math.exp %268 : vector<16x384xf32>
    %cst_104 = arith.constant 1.000000e+00 : f32
    %270 = vector.broadcast %cst_104 : f32 to vector<16x384xf32>
    %271 = arith.addf %270, %269 : vector<16x384xf32>
    %272 = arith.divf %270, %271 : vector<16x384xf32>
    %273 = vector.extract_strided_slice %272 {offsets = [0, 0], sizes = [16, 128], strides = [1, 1]} : vector<16x384xf32> to vector<16x128xf32>
    %274 = vector.extract_strided_slice %272 {offsets = [0, 128], sizes = [16, 128], strides = [1, 1]} : vector<16x384xf32> to vector<16x128xf32>
    %275 = vector.extract_strided_slice %272 {offsets = [0, 256], sizes = [16, 128], strides = [1, 1]} : vector<16x384xf32> to vector<16x128xf32>
    %276 = vector.extract_strided_slice %266 {offsets = [0, 384], sizes = [16, 128], strides = [1, 1]} : vector<16x512xf32> to vector<16x128xf32>
    %277 = math.tanh %276 : vector<16x128xf32>
    %278 = arith.mulf %274, %227 : vector<16x128xf32>
    %279 = arith.mulf %273, %277 : vector<16x128xf32>
    %280 = arith.addf %278, %279 : vector<16x128xf32>
    %281 = math.tanh %280 : vector<16x128xf32>
    %282 = arith.mulf %275, %281 : vector<16x128xf32>
    %c0_105 = arith.constant 0 : index
    %c0_106 = arith.constant 0 : index
    %283 = vector.load %arg14[%c0_105, %c0_106] : memref<16x128xf32, #tpu.memory_space<vmem>>, vector<16x128xf32>
    %284 = arith.maximumf %283, %259 : vector<16x128xf32>
    %c0_107 = arith.constant 0 : index
    %c0_108 = arith.constant 0 : index
    %285 = vector.load %arg14[%c0_107, %c0_108] : memref<16x128xf32, #tpu.memory_space<vmem>>, vector<16x128xf32>
    tpu.vector_store %arg14[%c0_107, %c0_108], %284 {strides = array<i32>} : memref<16x128xf32, #tpu.memory_space<vmem>>, vector<16x128xf32>,
    %c0_109 = arith.constant 0 : index
    %c0_110 = arith.constant 0 : index
    %286 = vector.load %arg15[%c0_109, %c0_110] : memref<16x128xf32, #tpu.memory_space<vmem>>, vector<16x128xf32>
    %287 = arith.maximumf %286, %282 : vector<16x128xf32>
    %c0_111 = arith.constant 0 : index
    %c0_112 = arith.constant 0 : index
    %288 = vector.load %arg15[%c0_111, %c0_112] : memref<16x128xf32, #tpu.memory_space<vmem>>, vector<16x128xf32>
    tpu.vector_store %arg15[%c0_111, %c0_112], %287 {strides = array<i32>} : memref<16x128xf32, #tpu.memory_space<vmem>>, vector<16x128xf32>,
    %289 = arith.truncf %259 : vector<16x128xf32> to vector<16x128xbf16>
    %290 = arith.truncf %282 : vector<16x128xf32> to vector<16x128xbf16>
    %c5_i32 = arith.constant 5 : i32
    %291 = arith.index_cast %c5_i32 : i32 to index
    %c0_113 = arith.constant 0 : index
    %c0_114 = arith.constant 0 : index
    %292 = vector.load %arg12[%291, %c0_113, %c0_114] : memref<8x16x512xbf16, #tpu.memory_space<vmem>>, vector<1x16x512xbf16>
    %293 = vector.shape_cast %292 : vector<1x16x512xbf16> to vector<16x512xbf16>
    %294 = arith.extf %293 : vector<16x512xbf16> to vector<16x512xf32>
    %cst_115 = arith.constant dense<0.000000e+00> : vector<16x512xf32>
    %295 = tpu.matmul %289, %18, %cst_115 {dimension_numbers = #tpu.dot_dimension_numbers<[1], [0], [0], [1], [0, 0, 1, 1], [], []>} : vector<16x128xbf16>, vector<128x512xbf16>, vector<16x512xf32> -> vector<16x512xf32>
    %296 = arith.addf %294, %295 : vector<16x512xf32>
    %297 = vector.extract_strided_slice %296 {offsets = [0, 0], sizes = [16, 384], strides = [1, 1]} : vector<16x512xf32> to vector<16x384xf32>
    %298 = arith.negf %297 : vector<16x384xf32>
    %299 = math.exp %298 : vector<16x384xf32>
    %cst_116 = arith.constant 1.000000e+00 : f32
    %300 = vector.broadcast %cst_116 : f32 to vector<16x384xf32>
    %301 = arith.addf %300, %299 : vector<16x384xf32>
    %302 = arith.divf %300, %301 : vector<16x384xf32>
    %303 = vector.extract_strided_slice %302 {offsets = [0, 0], sizes = [16, 128], strides = [1, 1]} : vector<16x384xf32> to vector<16x128xf32>
    %304 = vector.extract_strided_slice %302 {offsets = [0, 128], sizes = [16, 128], strides = [1, 1]} : vector<16x384xf32> to vector<16x128xf32>
    %305 = vector.extract_strided_slice %302 {offsets = [0, 256], sizes = [16, 128], strides = [1, 1]} : vector<16x384xf32> to vector<16x128xf32>
    %306 = vector.extract_strided_slice %296 {offsets = [0, 384], sizes = [16, 128], strides = [1, 1]} : vector<16x512xf32> to vector<16x128xf32>
    %307 = math.tanh %306 : vector<16x128xf32>
    %308 = arith.mulf %304, %257 : vector<16x128xf32>
    %309 = arith.mulf %303, %307 : vector<16x128xf32>
    %310 = arith.addf %308, %309 : vector<16x128xf32>
    %311 = math.tanh %310 : vector<16x128xf32>
    %312 = arith.mulf %305, %311 : vector<16x128xf32>
    %c7_i32_117 = arith.constant 7 : i32
    %313 = arith.subi %c7_i32_117, %c5_i32 : i32
    %314 = arith.index_cast %313 : i32 to index
    %c0_118 = arith.constant 0 : index
    %c0_119 = arith.constant 0 : index
    %315 = vector.load %arg13[%314, %c0_118, %c0_119] : memref<8x16x512xbf16, #tpu.memory_space<vmem>>, vector<1x16x512xbf16>
    %316 = vector.shape_cast %315 : vector<1x16x512xbf16> to vector<16x512xbf16>
    %317 = arith.extf %316 : vector<16x512xbf16> to vector<16x512xf32>
    %cst_120 = arith.constant dense<0.000000e+00> : vector<16x512xf32>
    %318 = tpu.matmul %290, %19, %cst_120 {dimension_numbers = #tpu.dot_dimension_numbers<[1], [0], [0], [1], [0, 0, 1, 1], [], []>} : vector<16x128xbf16>, vector<128x512xbf16>, vector<16x512xf32> -> vector<16x512xf32>
    %319 = arith.addf %317, %318 : vector<16x512xf32>
    %320 = vector.extract_strided_slice %319 {offsets = [0, 0], sizes = [16, 384], strides = [1, 1]} : vector<16x512xf32> to vector<16x384xf32>
    %321 = arith.negf %320 : vector<16x384xf32>
    %322 = math.exp %321 : vector<16x384xf32>
    %cst_121 = arith.constant 1.000000e+00 : f32
    %323 = vector.broadcast %cst_121 : f32 to vector<16x384xf32>
    %324 = arith.addf %323, %322 : vector<16x384xf32>
    %325 = arith.divf %323, %324 : vector<16x384xf32>
    %326 = vector.extract_strided_slice %325 {offsets = [0, 0], sizes = [16, 128], strides = [1, 1]} : vector<16x384xf32> to vector<16x128xf32>
    %327 = vector.extract_strided_slice %325 {offsets = [0, 128], sizes = [16, 128], strides = [1, 1]} : vector<16x384xf32> to vector<16x128xf32>
    %328 = vector.extract_strided_slice %325 {offsets = [0, 256], sizes = [16, 128], strides = [1, 1]} : vector<16x384xf32> to vector<16x128xf32>
    %329 = vector.extract_strided_slice %319 {offsets = [0, 384], sizes = [16, 128], strides = [1, 1]} : vector<16x512xf32> to vector<16x128xf32>
    %330 = math.tanh %329 : vector<16x128xf32>
    %331 = arith.mulf %327, %280 : vector<16x128xf32>
    %332 = arith.mulf %326, %330 : vector<16x128xf32>
    %333 = arith.addf %331, %332 : vector<16x128xf32>
    %334 = math.tanh %333 : vector<16x128xf32>
    %335 = arith.mulf %328, %334 : vector<16x128xf32>
    %c0_122 = arith.constant 0 : index
    %c0_123 = arith.constant 0 : index
    %336 = vector.load %arg14[%c0_122, %c0_123] : memref<16x128xf32, #tpu.memory_space<vmem>>, vector<16x128xf32>
    %337 = arith.maximumf %336, %312 : vector<16x128xf32>
    %c0_124 = arith.constant 0 : index
    %c0_125 = arith.constant 0 : index
    %338 = vector.load %arg14[%c0_124, %c0_125] : memref<16x128xf32, #tpu.memory_space<vmem>>, vector<16x128xf32>
    tpu.vector_store %arg14[%c0_124, %c0_125], %337 {strides = array<i32>} : memref<16x128xf32, #tpu.memory_space<vmem>>, vector<16x128xf32>,
    %c0_126 = arith.constant 0 : index
    %c0_127 = arith.constant 0 : index
    %339 = vector.load %arg15[%c0_126, %c0_127] : memref<16x128xf32, #tpu.memory_space<vmem>>, vector<16x128xf32>
    %340 = arith.maximumf %339, %335 : vector<16x128xf32>
    %c0_128 = arith.constant 0 : index
    %c0_129 = arith.constant 0 : index
    %341 = vector.load %arg15[%c0_128, %c0_129] : memref<16x128xf32, #tpu.memory_space<vmem>>, vector<16x128xf32>
    tpu.vector_store %arg15[%c0_128, %c0_129], %340 {strides = array<i32>} : memref<16x128xf32, #tpu.memory_space<vmem>>, vector<16x128xf32>,
    %342 = arith.truncf %312 : vector<16x128xf32> to vector<16x128xbf16>
    %343 = arith.truncf %335 : vector<16x128xf32> to vector<16x128xbf16>
    %c6_i32 = arith.constant 6 : i32
    %344 = arith.index_cast %c6_i32 : i32 to index
    %c0_130 = arith.constant 0 : index
    %c0_131 = arith.constant 0 : index
    %345 = vector.load %arg12[%344, %c0_130, %c0_131] : memref<8x16x512xbf16, #tpu.memory_space<vmem>>, vector<1x16x512xbf16>
    %346 = vector.shape_cast %345 : vector<1x16x512xbf16> to vector<16x512xbf16>
    %347 = arith.extf %346 : vector<16x512xbf16> to vector<16x512xf32>
    %cst_132 = arith.constant dense<0.000000e+00> : vector<16x512xf32>
    %348 = tpu.matmul %342, %18, %cst_132 {dimension_numbers = #tpu.dot_dimension_numbers<[1], [0], [0], [1], [0, 0, 1, 1], [], []>} : vector<16x128xbf16>, vector<128x512xbf16>, vector<16x512xf32> -> vector<16x512xf32>
    %349 = arith.addf %347, %348 : vector<16x512xf32>
    %350 = vector.extract_strided_slice %349 {offsets = [0, 0], sizes = [16, 384], strides = [1, 1]} : vector<16x512xf32> to vector<16x384xf32>
    %351 = arith.negf %350 : vector<16x384xf32>
    %352 = math.exp %351 : vector<16x384xf32>
    %cst_133 = arith.constant 1.000000e+00 : f32
    %353 = vector.broadcast %cst_133 : f32 to vector<16x384xf32>
    %354 = arith.addf %353, %352 : vector<16x384xf32>
    %355 = arith.divf %353, %354 : vector<16x384xf32>
    %356 = vector.extract_strided_slice %355 {offsets = [0, 0], sizes = [16, 128], strides = [1, 1]} : vector<16x384xf32> to vector<16x128xf32>
    %357 = vector.extract_strided_slice %355 {offsets = [0, 128], sizes = [16, 128], strides = [1, 1]} : vector<16x384xf32> to vector<16x128xf32>
    %358 = vector.extract_strided_slice %355 {offsets = [0, 256], sizes = [16, 128], strides = [1, 1]} : vector<16x384xf32> to vector<16x128xf32>
    %359 = vector.extract_strided_slice %349 {offsets = [0, 384], sizes = [16, 128], strides = [1, 1]} : vector<16x512xf32> to vector<16x128xf32>
    %360 = math.tanh %359 : vector<16x128xf32>
    %361 = arith.mulf %357, %310 : vector<16x128xf32>
    %362 = arith.mulf %356, %360 : vector<16x128xf32>
    %363 = arith.addf %361, %362 : vector<16x128xf32>
    %364 = math.tanh %363 : vector<16x128xf32>
    %365 = arith.mulf %358, %364 : vector<16x128xf32>
    %c7_i32_134 = arith.constant 7 : i32
    %366 = arith.subi %c7_i32_134, %c6_i32 : i32
    %367 = arith.index_cast %366 : i32 to index
    %c0_135 = arith.constant 0 : index
    %c0_136 = arith.constant 0 : index
    %368 = vector.load %arg13[%367, %c0_135, %c0_136] : memref<8x16x512xbf16, #tpu.memory_space<vmem>>, vector<1x16x512xbf16>
    %369 = vector.shape_cast %368 : vector<1x16x512xbf16> to vector<16x512xbf16>
    %370 = arith.extf %369 : vector<16x512xbf16> to vector<16x512xf32>
    %cst_137 = arith.constant dense<0.000000e+00> : vector<16x512xf32>
    %371 = tpu.matmul %343, %19, %cst_137 {dimension_numbers = #tpu.dot_dimension_numbers<[1], [0], [0], [1], [0, 0, 1, 1], [], []>} : vector<16x128xbf16>, vector<128x512xbf16>, vector<16x512xf32> -> vector<16x512xf32>
    %372 = arith.addf %370, %371 : vector<16x512xf32>
    %373 = vector.extract_strided_slice %372 {offsets = [0, 0], sizes = [16, 384], strides = [1, 1]} : vector<16x512xf32> to vector<16x384xf32>
    %374 = arith.negf %373 : vector<16x384xf32>
    %375 = math.exp %374 : vector<16x384xf32>
    %cst_138 = arith.constant 1.000000e+00 : f32
    %376 = vector.broadcast %cst_138 : f32 to vector<16x384xf32>
    %377 = arith.addf %376, %375 : vector<16x384xf32>
    %378 = arith.divf %376, %377 : vector<16x384xf32>
    %379 = vector.extract_strided_slice %378 {offsets = [0, 0], sizes = [16, 128], strides = [1, 1]} : vector<16x384xf32> to vector<16x128xf32>
    %380 = vector.extract_strided_slice %378 {offsets = [0, 128], sizes = [16, 128], strides = [1, 1]} : vector<16x384xf32> to vector<16x128xf32>
    %381 = vector.extract_strided_slice %378 {offsets = [0, 256], sizes = [16, 128], strides = [1, 1]} : vector<16x384xf32> to vector<16x128xf32>
    %382 = vector.extract_strided_slice %372 {offsets = [0, 384], sizes = [16, 128], strides = [1, 1]} : vector<16x512xf32> to vector<16x128xf32>
    %383 = math.tanh %382 : vector<16x128xf32>
    %384 = arith.mulf %380, %333 : vector<16x128xf32>
    %385 = arith.mulf %379, %383 : vector<16x128xf32>
    %386 = arith.addf %384, %385 : vector<16x128xf32>
    %387 = math.tanh %386 : vector<16x128xf32>
    %388 = arith.mulf %381, %387 : vector<16x128xf32>
    %c0_139 = arith.constant 0 : index
    %c0_140 = arith.constant 0 : index
    %389 = vector.load %arg14[%c0_139, %c0_140] : memref<16x128xf32, #tpu.memory_space<vmem>>, vector<16x128xf32>
    %390 = arith.maximumf %389, %365 : vector<16x128xf32>
    %c0_141 = arith.constant 0 : index
    %c0_142 = arith.constant 0 : index
    %391 = vector.load %arg14[%c0_141, %c0_142] : memref<16x128xf32, #tpu.memory_space<vmem>>, vector<16x128xf32>
    tpu.vector_store %arg14[%c0_141, %c0_142], %390 {strides = array<i32>} : memref<16x128xf32, #tpu.memory_space<vmem>>, vector<16x128xf32>,
    %c0_143 = arith.constant 0 : index
    %c0_144 = arith.constant 0 : index
    %392 = vector.load %arg15[%c0_143, %c0_144] : memref<16x128xf32, #tpu.memory_space<vmem>>, vector<16x128xf32>
    %393 = arith.maximumf %392, %388 : vector<16x128xf32>
    %c0_145 = arith.constant 0 : index
    %c0_146 = arith.constant 0 : index
    %394 = vector.load %arg15[%c0_145, %c0_146] : memref<16x128xf32, #tpu.memory_space<vmem>>, vector<16x128xf32>
    tpu.vector_store %arg15[%c0_145, %c0_146], %393 {strides = array<i32>} : memref<16x128xf32, #tpu.memory_space<vmem>>, vector<16x128xf32>,
    %395 = arith.truncf %365 : vector<16x128xf32> to vector<16x128xbf16>
    %396 = arith.truncf %388 : vector<16x128xf32> to vector<16x128xbf16>
    %c7_i32_147 = arith.constant 7 : i32
    %397 = arith.index_cast %c7_i32_147 : i32 to index
    %c0_148 = arith.constant 0 : index
    %c0_149 = arith.constant 0 : index
    %398 = vector.load %arg12[%397, %c0_148, %c0_149] : memref<8x16x512xbf16, #tpu.memory_space<vmem>>, vector<1x16x512xbf16>
    %399 = vector.shape_cast %398 : vector<1x16x512xbf16> to vector<16x512xbf16>
    %400 = arith.extf %399 : vector<16x512xbf16> to vector<16x512xf32>
    %cst_150 = arith.constant dense<0.000000e+00> : vector<16x512xf32>
    %401 = tpu.matmul %395, %18, %cst_150 {dimension_numbers = #tpu.dot_dimension_numbers<[1], [0], [0], [1], [0, 0, 1, 1], [], []>} : vector<16x128xbf16>, vector<128x512xbf16>, vector<16x512xf32> -> vector<16x512xf32>
    %402 = arith.addf %400, %401 : vector<16x512xf32>
    %403 = vector.extract_strided_slice %402 {offsets = [0, 0], sizes = [16, 384], strides = [1, 1]} : vector<16x512xf32> to vector<16x384xf32>
    %404 = arith.negf %403 : vector<16x384xf32>
    %405 = math.exp %404 : vector<16x384xf32>
    %cst_151 = arith.constant 1.000000e+00 : f32
    %406 = vector.broadcast %cst_151 : f32 to vector<16x384xf32>
    %407 = arith.addf %406, %405 : vector<16x384xf32>
    %408 = arith.divf %406, %407 : vector<16x384xf32>
    %409 = vector.extract_strided_slice %408 {offsets = [0, 0], sizes = [16, 128], strides = [1, 1]} : vector<16x384xf32> to vector<16x128xf32>
    %410 = vector.extract_strided_slice %408 {offsets = [0, 128], sizes = [16, 128], strides = [1, 1]} : vector<16x384xf32> to vector<16x128xf32>
    %411 = vector.extract_strided_slice %408 {offsets = [0, 256], sizes = [16, 128], strides = [1, 1]} : vector<16x384xf32> to vector<16x128xf32>
    %412 = vector.extract_strided_slice %402 {offsets = [0, 384], sizes = [16, 128], strides = [1, 1]} : vector<16x512xf32> to vector<16x128xf32>
    %413 = math.tanh %412 : vector<16x128xf32>
    %414 = arith.mulf %410, %363 : vector<16x128xf32>
    %415 = arith.mulf %409, %413 : vector<16x128xf32>
    %416 = arith.addf %414, %415 : vector<16x128xf32>
    %417 = math.tanh %416 : vector<16x128xf32>
    %418 = arith.mulf %411, %417 : vector<16x128xf32>
    %c7_i32_152 = arith.constant 7 : i32
    %419 = arith.subi %c7_i32_152, %c7_i32_147 : i32
    %420 = arith.index_cast %419 : i32 to index
    %c0_153 = arith.constant 0 : index
    %c0_154 = arith.constant 0 : index
    %421 = vector.load %arg13[%420, %c0_153, %c0_154] : memref<8x16x512xbf16, #tpu.memory_space<vmem>>, vector<1x16x512xbf16>
    %422 = vector.shape_cast %421 : vector<1x16x512xbf16> to vector<16x512xbf16>
    %423 = arith.extf %422 : vector<16x512xbf16> to vector<16x512xf32>
    %cst_155 = arith.constant dense<0.000000e+00> : vector<16x512xf32>
    %424 = tpu.matmul %396, %19, %cst_155 {dimension_numbers = #tpu.dot_dimension_numbers<[1], [0], [0], [1], [0, 0, 1, 1], [], []>} : vector<16x128xbf16>, vector<128x512xbf16>, vector<16x512xf32> -> vector<16x512xf32>
    %425 = arith.addf %423, %424 : vector<16x512xf32>
    %426 = vector.extract_strided_slice %425 {offsets = [0, 0], sizes = [16, 384], strides = [1, 1]} : vector<16x512xf32> to vector<16x384xf32>
    %427 = arith.negf %426 : vector<16x384xf32>
    %428 = math.exp %427 : vector<16x384xf32>
    %cst_156 = arith.constant 1.000000e+00 : f32
    %429 = vector.broadcast %cst_156 : f32 to vector<16x384xf32>
    %430 = arith.addf %429, %428 : vector<16x384xf32>
    %431 = arith.divf %429, %430 : vector<16x384xf32>
    %432 = vector.extract_strided_slice %431 {offsets = [0, 0], sizes = [16, 128], strides = [1, 1]} : vector<16x384xf32> to vector<16x128xf32>
    %433 = vector.extract_strided_slice %431 {offsets = [0, 128], sizes = [16, 128], strides = [1, 1]} : vector<16x384xf32> to vector<16x128xf32>
    %434 = vector.extract_strided_slice %431 {offsets = [0, 256], sizes = [16, 128], strides = [1, 1]} : vector<16x384xf32> to vector<16x128xf32>
    %435 = vector.extract_strided_slice %425 {offsets = [0, 384], sizes = [16, 128], strides = [1, 1]} : vector<16x512xf32> to vector<16x128xf32>
    %436 = math.tanh %435 : vector<16x128xf32>
    %437 = arith.mulf %433, %386 : vector<16x128xf32>
    %438 = arith.mulf %432, %436 : vector<16x128xf32>
    %439 = arith.addf %437, %438 : vector<16x128xf32>
    %440 = math.tanh %439 : vector<16x128xf32>
    %441 = arith.mulf %434, %440 : vector<16x128xf32>
    %c0_157 = arith.constant 0 : index
    %c0_158 = arith.constant 0 : index
    %442 = vector.load %arg14[%c0_157, %c0_158] : memref<16x128xf32, #tpu.memory_space<vmem>>, vector<16x128xf32>
    %443 = arith.maximumf %442, %418 : vector<16x128xf32>
    %c0_159 = arith.constant 0 : index
    %c0_160 = arith.constant 0 : index
    %444 = vector.load %arg14[%c0_159, %c0_160] : memref<16x128xf32, #tpu.memory_space<vmem>>, vector<16x128xf32>
    tpu.vector_store %arg14[%c0_159, %c0_160], %443 {strides = array<i32>} : memref<16x128xf32, #tpu.memory_space<vmem>>, vector<16x128xf32>,
    %c0_161 = arith.constant 0 : index
    %c0_162 = arith.constant 0 : index
    %445 = vector.load %arg15[%c0_161, %c0_162] : memref<16x128xf32, #tpu.memory_space<vmem>>, vector<16x128xf32>
    %446 = arith.maximumf %445, %441 : vector<16x128xf32>
    %c0_163 = arith.constant 0 : index
    %c0_164 = arith.constant 0 : index
    %447 = vector.load %arg15[%c0_163, %c0_164] : memref<16x128xf32, #tpu.memory_space<vmem>>, vector<16x128xf32>
    tpu.vector_store %arg15[%c0_163, %c0_164], %446 {strides = array<i32>} : memref<16x128xf32, #tpu.memory_space<vmem>>, vector<16x128xf32>,
    %448 = arith.truncf %418 : vector<16x128xf32> to vector<16x128xbf16>
    %449 = arith.truncf %441 : vector<16x128xf32> to vector<16x128xbf16>
    %c8_i32 = arith.constant 8 : i32
    %c0_165 = arith.constant 0 : index
    %c0_166 = arith.constant 0 : index
    %450 = vector.load %arg14[%c0_165, %c0_166] : memref<16x128xf32, #tpu.memory_space<vmem>>, vector<16x128xf32>
    %c0_167 = arith.constant 0 : index
    %c0_168 = arith.constant 0 : index
    %451 = vector.load %arg8[%c0_167, %c0_168] : memref<128x128xf32, #tpu.memory_space<vmem>>, vector<128x128xf32>
    %cst_169 = arith.constant dense<0.000000e+00> : vector<16x128xf32>
    %452 = tpu.matmul %450, %451, %cst_169 {dimension_numbers = #tpu.dot_dimension_numbers<[1], [0], [0], [1], [0, 0, 1, 1], [], []>} : vector<16x128xf32>, vector<128x128xf32>, vector<16x128xf32> -> vector<16x128xf32>
    %c0_170 = arith.constant 0 : index
    %c0_171 = arith.constant 0 : index
    %453 = vector.load %arg15[%c0_170, %c0_171] : memref<16x128xf32, #tpu.memory_space<vmem>>, vector<16x128xf32>
    %c0_172 = arith.constant 0 : index
    %c0_173 = arith.constant 0 : index
    %454 = vector.load %arg9[%c0_172, %c0_173] : memref<128x128xf32, #tpu.memory_space<vmem>>, vector<128x128xf32>
    %cst_174 = arith.constant dense<0.000000e+00> : vector<16x128xf32>
    %455 = tpu.matmul %453, %454, %cst_174 {dimension_numbers = #tpu.dot_dimension_numbers<[1], [0], [0], [1], [0, 0, 1, 1], [], []>} : vector<16x128xf32>, vector<128x128xf32>, vector<16x128xf32> -> vector<16x128xf32>
    %456 = arith.addf %452, %455 : vector<16x128xf32>
    %c0_175 = arith.constant 0 : index
    %c0_176 = arith.constant 0 : index
    %457 = vector.load %arg10[%c0_175, %c0_176] : memref<1x128xf32, #tpu.memory_space<vmem>>, vector<1x128xf32>
    %458 = vector.broadcast %457 : vector<1x128xf32> to vector<16x128xf32>
    %459 = arith.addf %456, %458 : vector<16x128xf32>
    %c0_177 = arith.constant 0 : index
    %c0_178 = arith.constant 0 : index
    %460 = vector.load %arg11[%c0_177, %c0_178] : memref<16x128xf32, #tpu.memory_space<vmem>>, vector<16x128xf32>
    tpu.vector_store %arg11[%c0_177, %c0_178], %459 {strides = array<i32>} : memref<16x128xf32, #tpu.memory_space<vmem>>, vector<16x128xf32>,
    return
  }
  func.func @transform_0(%arg0: i32) -> (i32, i32, i32) {
    %c0_i32 = arith.constant 0 : i32
    %c0_i32_0 = arith.constant 0 : i32
    %c0_i32_1 = arith.constant 0 : i32
    return %c0_i32, %arg0, %c0_i32_0 : i32, i32, i32
  }
  func.func @transform_1(%arg0: i32) -> (i32, i32) {
    %c0_i32 = arith.constant 0 : i32
    %c0_i32_0 = arith.constant 0 : i32
    %c0_i32_1 = arith.constant 0 : i32
    return %c0_i32, %c0_i32_0 : i32, i32
  }
  func.func @transform_2(%arg0: i32) -> (i32, i32) {
    %c0_i32 = arith.constant 0 : i32
    %c0_i32_0 = arith.constant 0 : i32
    %c0_i32_1 = arith.constant 0 : i32
    return %c0_i32, %c0_i32_0 : i32, i32
  }
  func.func @transform_3(%arg0: i32) -> (i32, i32) {
    %c0_i32 = arith.constant 0 : i32
    %c0_i32_0 = arith.constant 0 : i32
    %c0_i32_1 = arith.constant 0 : i32
    return %c0_i32, %c0_i32_0 : i32, i32
  }
  func.func @transform_4(%arg0: i32) -> (i32, i32) {
    %c0_i32 = arith.constant 0 : i32
    %c0_i32_0 = arith.constant 0 : i32
    %c0_i32_1 = arith.constant 0 : i32
    return %c0_i32, %c0_i32_0 : i32, i32
  }
  func.func @transform_5(%arg0: i32) -> (i32, i32) {
    %c0_i32 = arith.constant 0 : i32
    %c0_i32_0 = arith.constant 0 : i32
    %c0_i32_1 = arith.constant 0 : i32
    return %c0_i32, %c0_i32_0 : i32, i32
  }
  func.func @transform_6(%arg0: i32) -> (i32, i32) {
    %c0_i32 = arith.constant 0 : i32
    %c0_i32_0 = arith.constant 0 : i32
    %c0_i32_1 = arith.constant 0 : i32
    return %c0_i32, %c0_i32_0 : i32, i32
  }
  func.func @transform_7(%arg0: i32) -> (i32, i32) {
    %c0_i32 = arith.constant 0 : i32
    %c0_i32_0 = arith.constant 0 : i32
    %c0_i32_1 = arith.constant 0 : i32
    return %c0_i32, %c0_i32_0 : i32, i32
  }
  func.func @transform_8(%arg0: i32) -> (i32, i32) {
    %c0_i32 = arith.constant 0 : i32
    %c0_i32_0 = arith.constant 0 : i32
    %c0_i32_1 = arith.constant 0 : i32
    return %c0_i32, %c0_i32_0 : i32, i32
  }
  func.func @transform_9(%arg0: i32) -> (i32, i32) {
    %c0_i32 = arith.constant 0 : i32
    %c0_i32_0 = arith.constant 0 : i32
    %c0_i32_1 = arith.constant 0 : i32
    return %c0_i32, %c0_i32_0 : i32, i32
  }
  func.func @transform_10(%arg0: i32) -> (i32, i32) {
    %c0_i32 = arith.constant 0 : i32
    %c0_i32_0 = arith.constant 0 : i32
    return %arg0, %c0_i32 : i32, i32
  }
}

</mosaic_0001>

<bundles_post_ra>
// kernel: tpu_custom_call.1
= control target key start
LH: loop header
LB: loop body
LE: loop exit
PB: predicated region body
PF: predicated region fallthrough
CT: control target
= control target key end

     0   :  { %15 = vsyncpa [#allocation7], 0  ;;  %s7626_s0 = inlined_call_operand.hbm [shape: bf16[8,16,128], index: 0, kind: input, shape index: {}]   ;;  %s7627_s1 = inlined_call_operand.hbm [shape: bf16[128,512], index: 1, kind: input, shape index: {}]   ;;  %s7628_s2 = inlined_call_operand.hbm [shape: bf16[128,512], index: 2, kind: input, shape index: {}]   ;;  %s7629_s3 = inlined_call_operand.hbm [shape: bf16[128,512], index: 3, kind: input, shape index: {}]   ;;  %s7630_s4 = inlined_call_operand.hbm [shape: bf16[128,512], index: 4, kind: input, shape index: {}]   ;;  %s7631_s5 = inlined_call_operand.vmem [shape: f32[1,512], index: 5, kind: input, shape index: {}]   ;;  %s7632_s6 = inlined_call_operand.vmem [shape: f32[1,512], index: 6, kind: input, shape index: {}]   ;;  %s7633_s7 = inlined_call_operand.hbm [shape: f32[128,128], index: 7, kind: input, shape index: {}]   ;;  %s7634_s8 = inlined_call_operand.hbm [shape: f32[128,128], index: 8, kind: input, shape index: {}]   ;;  %s7635_s9 = inlined_call_operand.vmem [shape: f32[1,128], index: 9, kind: input, shape index: {}]   ;;  %s7636_s10 = inlined_call_operand.hbm [shape: f32[16,128], index: 10, kind: output, shape index: {}]  }
   0x1   :  { %16 = vsyncpa [#allocation10], 0 }
   0x2   :  { %17 = vsyncpa [#allocation13], 0 }
   0x3   :  { %18 = vsyncpa [#allocation16], 0 }
   0x4   :  { %19 = vsyncpa [#allocation8], 0  ;;  %s5873_s13 = smov [#allocation9]   ;;  %s5687_s17 = scalar_lea.hbm %s7627_s1, 4096 }
   0x5   :  { %s37_s14 = sshll.u32 %s5873_s13, 4  ;;  %p5688_p0 = scmp.ne.s32.totalorder %s7627_s1, %s5687_s17  ;;  %s38_s14 = int_to_ptr.vmem [resolvable:$true] %s37_s14 }
   0x6   :  { %p5691_p1 = scmp.lt.u32.totalorder %s5687_s17, %s7627_s1 }
   0x8   :  { %p5693_p2 = pnand %p5691_p1, %p5688_p0 }
   0xa   :  { %5696 = shalt.err (!%p5693_p2)
}
   0xb   :  { %s5697_s22 = scalar_lea.vmem %s38_s14, 4096  ;;  %p5702_p4 = scmp.lt.s32.totalorder %s38_s14, %s38_s14 }
   0xc   :  { %p5698_p3 = scmp.ne.s32.totalorder %s38_s14, %s5697_s22  ;;  %p5703_p5 = scmp.lt.s32.totalorder %s5697_s22, %s5697_s22 }
   0xe   :  { %p5704_p6 = por %p5703_p5, %p5702_p4 }
  0x10   :  { %p5705_p7 = pnand %p5704_p6, %p5698_p3 }
  0x12   :  { %5708 = shalt.err (!%p5705_p7)
}
  0x13   :  { %s5874_s23 = smov 256   ;;  %s5875_s24 = smov 16  }
  0x14   :  { %43 = dma.hbm_to_vmem [thread:$0]  %s7627_s1, 4096, %s38_s14, [#allocation10], %s5874_s23, %s5874_s23, %s5875_s24  }
  0x15   :  { %s5876_s27 = smov [#allocation12]   ;;  %s5877_s29 = smov [#allocation15]  }
  0x16   :  { %s61_s28 = sshll.u32 %s5876_s27, 4  ;;  %s89_s30 = sshll.u32 %s5877_s29, 4  ;;  %s62_s28 = int_to_ptr.vmem [resolvable:$true] %s61_s28  ;;  %s90_s30 = int_to_ptr.vmem [resolvable:$true] %s89_s30 }
  0x17   :  { %s5709_s13 = scalar_lea.hbm %s7629_s3, 4096 }
  0x18   :  { %p5710_p8 = scmp.ne.s32.totalorder %s7629_s3, %s5709_s13  ;;  %p5713_p9 = scmp.lt.u32.totalorder %s5709_s13, %s7629_s3 }
  0x1a   :  { %p5715_p10 = pnand %p5713_p9, %p5710_p8 }
  0x1c   :  { %5718 = shalt.err (!%p5715_p10)
}
  0x1d   :  { %s5719_s1 = scalar_lea.vmem %s62_s28, 4096  ;;  %p5724_p12 = scmp.lt.s32.totalorder %s62_s28, %s62_s28 }
  0x1e   :  { %p5720_p11 = scmp.ne.s32.totalorder %s62_s28, %s5719_s1  ;;  %p5725_p13 = scmp.lt.s32.totalorder %s5719_s1, %s5719_s1 }
  0x20   :  { %p5726_p0 = por %p5725_p13, %p5724_p12 }
  0x22   :  { %p5727_p1 = pnand %p5726_p0, %p5720_p11 }
  0x24   :  { %5730 = shalt.err (!%p5727_p1)
}
  0x25   :  { %67 = dma.hbm_to_vmem [thread:$0]  %s7629_s3, 4096, %s62_s28, [#allocation13], %s5874_s23, %s5874_s23, %s5875_s24  }
  0x26   :  { %s5731_s22 = scalar_lea.hbm %s7633_s7, 2048 }
  0x27   :  { %p5732_p2 = scmp.ne.s32.totalorder %s7633_s7, %s5731_s22  ;;  %p5735_p3 = scmp.lt.u32.totalorder %s5731_s22, %s7633_s7 }
  0x29   :  { %p5737_p4 = pnand %p5735_p3, %p5732_p2 }
  0x2b   :  { %5740 = shalt.err (!%p5737_p4)
}
  0x2c   :  { %s5741_s11 = scalar_lea.vmem %s90_s30, 2048  ;;  %p5746_p6 = scmp.lt.s32.totalorder %s90_s30, %s90_s30 }
  0x2d   :  { %p5742_p5 = scmp.ne.s32.totalorder %s90_s30, %s5741_s11  ;;  %p5747_p7 = scmp.lt.s32.totalorder %s5741_s11, %s5741_s11 }
  0x2f   :  { %p5748_p8 = por %p5747_p7, %p5746_p6 }
  0x31   :  { %p5749_p9 = pnand %p5748_p8, %p5742_p5 }
  0x33   :  { %5752 = shalt.err (!%p5749_p9)
}
  0x34   :  { %s5878_s3 = smov 128   ;;  %s5879_s28 = smov 8  }
  0x35   :  { %95 = dma.hbm_to_vmem [thread:$0]  %s7633_s7, 2048, %s90_s30, [#allocation16], %s5878_s3, %s5878_s3, %s5879_s28  }
  0x36   :  { %s5880_s15 = smov [#allocation6]   ;;  %s5753_s1 = scalar_lea.hbm %s7626_s0, 1024 }
  0x37   :  { %s25_s16 = sshll.u32 %s5880_s15, 4  ;;  %p5754_p10 = scmp.ne.s32.totalorder %s7626_s0, %s5753_s1  ;;  %s26_s16 = int_to_ptr.vmem [resolvable:$true] %s25_s16 }
  0x38   :  { %p5757_p11 = scmp.lt.u32.totalorder %s5753_s1, %s7626_s0 }
  0x3a   :  { %p5759_p12 = pnand %p5757_p11, %p5754_p10 }
  0x3c   :  { %5762 = shalt.err (!%p5759_p12)
}
  0x3d   :  { %s5763_s22 = scalar_lea.vmem %s26_s16, 1024  ;;  %p5768_p0 = scmp.lt.s32.totalorder %s26_s16, %s26_s16 }
  0x3e   :  { %p5764_p13 = scmp.ne.s32.totalorder %s26_s16, %s5763_s22  ;;  %p5769_p1 = scmp.lt.s32.totalorder %s5763_s22, %s5763_s22 }
  0x40   :  { %p5770_p2 = por %p5769_p1, %p5768_p0 }
  0x42   :  { %p5771_p3 = pnand %p5770_p2, %p5764_p13 }
  0x44   :  { %5774 = shalt.err (!%p5771_p3)
}
  0x45   :  { %s5881_s7 = smov 64   ;;  %s5882_s30 = smov 4  }
  0x46   :  { %31 = dma.hbm_to_vmem [thread:$0]  %s7626_s0, 1024, %s26_s16, [#allocation7], %s5881_s7, %s5881_s7, %s5882_s30  }
  0x47   :  { %s5883_s27 = smov [#allocation11]   ;;  %s5884_s11 = smov [#allocation14]  }
  0x48   :  { %s49_s29 = sshll.u32 %s5883_s27, 4  ;;  %s73_s12 = sshll.u32 %s5884_s11, 4  ;;  %s50_s29 = int_to_ptr.vmem [resolvable:$true] %s49_s29  ;;  %s6000_s12 = int_to_ptr.vmem [resolvable:$true] %s73_s12 }
  0x49   :  { %s5775_s17 = scalar_lea.hbm %s7628_s2, 4096 }
  0x4a   :  { %p5776_p4 = scmp.ne.s32.totalorder %s7628_s2, %s5775_s17  ;;  %p5779_p5 = scmp.lt.u32.totalorder %s5775_s17, %s7628_s2 }
  0x4c   :  { %p5781_p6 = pnand %p5779_p5, %p5776_p4 }
  0x4e   :  { %5784 = shalt.err (!%p5781_p6)
}
  0x4f   :  { %s5785_s0 = scalar_lea.vmem %s50_s29, 4096  ;;  %p5790_p8 = scmp.lt.s32.totalorder %s50_s29, %s50_s29 }
  0x50   :  { %p5786_p7 = scmp.ne.s32.totalorder %s50_s29, %s5785_s0  ;;  %p5791_p9 = scmp.lt.s32.totalorder %s5785_s0, %s5785_s0 }
  0x52   :  { %p5792_p10 = por %p5791_p9, %p5790_p8 }
  0x54   :  { %p5793_p11 = pnand %p5792_p10, %p5786_p7 }
  0x56   :  { %5796 = shalt.err (!%p5793_p11)
}
  0x57   :  { %55 = dma.hbm_to_vmem [thread:$0]  %s7628_s2, 4096, %s50_s29, [#allocation10], %s5874_s23, %s5874_s23, %s5875_s24  }
  0x58   :  { %s5797_s7 = scalar_lea.hbm %s7630_s4, 4096 }
  0x59   :  { %p5798_p12 = scmp.ne.s32.totalorder %s7630_s4, %s5797_s7  ;;  %p5801_p13 = scmp.lt.u32.totalorder %s5797_s7, %s7630_s4 }
  0x5b   :  { %p5803_p0 = pnand %p5801_p13, %p5798_p12 }
  0x5d   :  { %5806 = shalt.err (!%p5803_p0)
}
  0x5e   :  { %s5807_s11 = scalar_lea.vmem %s6000_s12, 4096  ;;  %p5812_p2 = scmp.lt.s32.totalorder %s6000_s12, %s6000_s12 }
  0x5f   :  { %p5808_p1 = scmp.ne.s32.totalorder %s6000_s12, %s5807_s11  ;;  %p5813_p3 = scmp.lt.s32.totalorder %s5807_s11, %s5807_s11 }
  0x61   :  { %p5814_p4 = por %p5813_p3, %p5812_p2 }
  0x63   :  { %p5815_p5 = pnand %p5814_p4, %p5808_p1 }
  0x65   :  { %5818 = shalt.err (!%p5815_p5)
}
  0x66   :  { %79 = dma.hbm_to_vmem [thread:$0]  %s7630_s4, 4096, %s6000_s12, [#allocation13], %s5874_s23, %s5874_s23, %s5875_s24  }
  0x67   :  { %s5885_s13 = smov [#allocation17]   ;;  %s5819_s1 = scalar_lea.hbm %s7634_s8, 2048 }
  0x68   :  { %s101_s15 = sshll.u32 %s5885_s13, 4  ;;  %p5820_p6 = scmp.ne.s32.totalorder %s7634_s8, %s5819_s1  ;;  %s102_s15 = int_to_ptr.vmem [resolvable:$true] %s101_s15 }
  0x69   :  { %p5823_p7 = scmp.lt.u32.totalorder %s5819_s1, %s7634_s8 }
  0x6b   :  { %p5825_p8 = pnand %p5823_p7, %p5820_p6 }
  0x6d   :  { %5828 = shalt.err (!%p5825_p8)
}
  0x6e   :  { %s5829_s20 = scalar_lea.vmem %s102_s15, 2048  ;;  %p5834_p10 = scmp.lt.s32.totalorder %s102_s15, %s102_s15 }
  0x6f   :  { %p5830_p9 = scmp.ne.s32.totalorder %s102_s15, %s5829_s20  ;;  %p5835_p11 = scmp.lt.s32.totalorder %s5829_s20, %s5829_s20 }
  0x71   :  { %p5836_p12 = por %p5835_p11, %p5834_p10 }
  0x73   :  { %p5837_p13 = pnand %p5836_p12, %p5830_p9 }
  0x75   :  { %5840 = shalt.err (!%p5837_p13)
}
  0x76   :  { %107 = dma.hbm_to_vmem [thread:$0]  %s7634_s8, 2048, %s102_s15, [#allocation16], %s5878_s3, %s5878_s3, %s5879_s28  }
  0x77   :  { %5863 = dma.done.wait [#allocation7], 1024  }
  0x78   :  { %5864 = vsyncadd [#allocation7], 4294966272 }
  0x79   :  { %5865 = dma.done.wait [#allocation10], 8192  }
  0x7a   :  { %5866 = vsyncadd [#allocation10], 4294959104 }
  0x7b   :  { %5867 = dma.done.wait [#allocation13], 8192  }
  0x7c   :  { %5868 = vsyncadd [#allocation13], 4294959104 }
  0x7d   :  { %5869 = dma.done.wait [#allocation16], 4096  }
  0x7e   :  { %5870 = vsyncadd [#allocation16], 4294963200  ;;  %v7637_v0 = vmov 0   ;;  %v4817_v1 = vld [vmem:[#allocation9 + $0x4] ss:$16 sps:$4 sm:$0xff]   ;;  %v6060_v43 = vld [vmem:[#allocation6 + $0x8] sm:$0xff]  }
  0x7f   :  { %475 = vmatprep.mubr.bf16.mxu0 %v7637_v0  ;;  %588 = vmatprep.mubr.bf16.mxu1 %v7637_v0  ;;  %v4819_v2 = vld [vmem:[#allocation9 + $0xc] ss:$16 sps:$4 sm:$0xff]   ;;  %v4821_v3 = vld [vmem:[#allocation9] ss:$16 sps:$4 sm:$0xff]   ;;  %v4822_v4 = vld [vmem:[#allocation9 + $0x8] ss:$16 sps:$4 sm:$0xff]  }
  0x80   :  { %443 = vmatprep.subr.bf16.mxu0 %v4817_v1  ;;  %556 = vmatprep.subr.bf16.mxu1 %v4819_v2  ;;  %v4823_v5 = vld [vmem:[#allocation9 + $0x24] ss:$16 sps:$4 sm:$0xff]   ;;  %v4825_v6 = vld [vmem:[#allocation9 + $0x2c] ss:$16 sps:$4 sm:$0xff]   ;;  %v4827_v7 = vld [vmem:[#allocation9 + $0x20] ss:$16 sps:$4 sm:$0xff]  }
  0x81   :  { %444 = vmatpush1.bf16.msra.mxu0 %v4821_v3  ;;  %557 = vmatpush1.bf16.msra.mxu1 %v4822_v4  ;;  %v4828_v8 = vld [vmem:[#allocation9 + $0x28] ss:$16 sps:$4 sm:$0xff]   ;;  %v4829_v9 = vld [vmem:[#allocation9 + $0x44] ss:$16 sps:$4 sm:$0xff]   ;;  %v4831_v10 = vld [vmem:[#allocation9 + $0x4c] ss:$16 sps:$4 sm:$0xff]  }
  0x82   :  { %445 = vmatprep.subr.bf16.mxu0 %v4823_v5  ;;  %558 = vmatprep.subr.bf16.mxu1 %v4825_v6  ;;  %v4833_v11 = vld [vmem:[#allocation9 + $0x40] ss:$16 sps:$4 sm:$0xff]   ;;  %v4834_v12 = vld [vmem:[#allocation9 + $0x48] ss:$16 sps:$4 sm:$0xff]   ;;  %v4835_v13 = vld [vmem:[#allocation9 + $0x64] ss:$16 sps:$4 sm:$0xff]  }
  0x83   :  { %v4837_v14 = vld [vmem:[#allocation9 + $0x6c] ss:$16 sps:$4 sm:$0xff]   ;;  %v4839_v15 = vld [vmem:[#allocation9 + $0x60] ss:$16 sps:$4 sm:$0xff]   ;;  %v4840_v16 = vld [vmem:[#allocation9 + $0x68] ss:$16 sps:$4 sm:$0xff]  }
  0x84   :  { %v4841_v17 = vld [vmem:[#allocation9 + $0x84] ss:$16 sps:$4 sm:$0xff]   ;;  %v4843_v18 = vld [vmem:[#allocation9 + $0x8c] ss:$16 sps:$4 sm:$0xff]   ;;  %v4845_v19 = vld [vmem:[#allocation9 + $0x80] ss:$16 sps:$4 sm:$0xff]  }
  0x85   :  { %446 = vmatpush1.bf16.msra.mxu0 %v4827_v7  ;;  %559 = vmatpush1.bf16.msra.mxu1 %v4828_v8  ;;  %v4846_v20 = vld [vmem:[#allocation9 + $0x88] ss:$16 sps:$4 sm:$0xff]   ;;  %v4847_v21 = vld [vmem:[#allocation9 + $0xa4] ss:$16 sps:$4 sm:$0xff]   ;;  %v4849_v22 = vld [vmem:[#allocation9 + $0xac] ss:$16 sps:$4 sm:$0xff]  }
  0x86   :  { %447 = vmatprep.subr.bf16.mxu0 %v4829_v9  ;;  %560 = vmatprep.subr.bf16.mxu1 %v4831_v10  ;;  %v4851_v23 = vld [vmem:[#allocation9 + $0xa0] ss:$16 sps:$4 sm:$0xff]   ;;  %v4852_v24 = vld [vmem:[#allocation9 + $0xa8] ss:$16 sps:$4 sm:$0xff]   ;;  %v4853_v25 = vld [vmem:[#allocation9 + $0xc4] ss:$16 sps:$4 sm:$0xff]  }
  0x87   :  { %v4855_v26 = vld [vmem:[#allocation9 + $0xcc] ss:$16 sps:$4 sm:$0xff]   ;;  %v4857_v27 = vld [vmem:[#allocation9 + $0xc0] ss:$16 sps:$4 sm:$0xff]   ;;  %v4858_v28 = vld [vmem:[#allocation9 + $0xc8] ss:$16 sps:$4 sm:$0xff]  }
  0x88   :  { %v4859_v29 = vld [vmem:[#allocation9 + $0xe4] ss:$16 sps:$4 sm:$0xff]   ;;  %v4861_v30 = vld [vmem:[#allocation9 + $0xec] ss:$16 sps:$4 sm:$0xff]   ;;  %v4863_v31 = vld [vmem:[#allocation9 + $0xe0] ss:$16 sps:$4 sm:$0xff]  }
  0x89   :  { %448 = vmatpush1.bf16.msra.mxu0 %v4833_v11  ;;  %561 = vmatpush1.bf16.msra.mxu1 %v4834_v12  ;;  %v4864_v32 = vld [vmem:[#allocation9 + $0xe8] ss:$16 sps:$4 sm:$0xff]   ;;  %v4868_v33 = vld [vmem:[#allocation11 + $0x4] ss:$16 sps:$4 sm:$0xff]   ;;  %v4875_v34 = vld [vmem:[#allocation11 + $0xc] ss:$16 sps:$4 sm:$0xff]  }
  0x8a   :  { %449 = vmatprep.subr.bf16.mxu0 %v4835_v13  ;;  %562 = vmatprep.subr.bf16.mxu1 %v4837_v14  ;;  %v6054_v35 = vld [vmem:[#allocation6] sm:$0xff]   ;;  %v4873_v38 = vld [vmem:[#allocation11 + $0x8] ss:$16 sps:$4 sm:$0xff]   ;;  %v4882_v39 = vld [vmem:[#allocation11 + $0x2c] ss:$16 sps:$4 sm:$0xff]   ;;  %s5887_s22 = smov [#allocation18]  }
  0x8b   :  { %v4866_v36 = vld [vmem:[#allocation11] ss:$16 sps:$4 sm:$0xff]   ;;  %v4872_v37 = vld [vmem:[#allocation11 + $0x24] ss:$16 sps:$4 sm:$0xff]   ;;  %v4880_v42 = vld [vmem:[#allocation11 + $0x28] ss:$16 sps:$4 sm:$0xff]  }
  0x8c   :  { %v4870_v40 = vld [vmem:[#allocation11 + $0x20] ss:$16 sps:$4 sm:$0xff]   ;;  %v4879_v41 = vld [vmem:[#allocation11 + $0x44] ss:$16 sps:$4 sm:$0xff]   ;;  %v4889_v46 = vld [vmem:[#allocation11 + $0x4c] ss:$16 sps:$4 sm:$0xff]  }
  0x8d   :  { %450 = vmatpush1.bf16.msra.mxu0 %v4839_v15  ;;  %563 = vmatpush1.bf16.msra.mxu1 %v4840_v16  ;;  %v4877_v44 = vld [vmem:[#allocation11 + $0x40] ss:$16 sps:$4 sm:$0xff]   ;;  %v4886_v45 = vld [vmem:[#allocation11 + $0x64] ss:$16 sps:$4 sm:$0xff]   ;;  %v4887_v47 = vld [vmem:[#allocation11 + $0x48] ss:$16 sps:$4 sm:$0xff]  }
  0x8e   :  { %451 = vmatprep.subr.bf16.mxu0 %v4841_v17  ;;  %564 = vmatprep.subr.bf16.mxu1 %v4843_v18  ;;  %v4896_v48 = vld [vmem:[#allocation11 + $0x6c] ss:$16 sps:$4 sm:$0xff]   ;;  %v4884_v49 = vld [vmem:[#allocation11 + $0x60] ss:$16 sps:$4 sm:$0xff]   ;;  %v4893_v50 = vld [vmem:[#allocation11 + $0x84] ss:$16 sps:$4 sm:$0xff]  }
  0x8f   :  { %v4894_v51 = vld [vmem:[#allocation11 + $0x68] ss:$16 sps:$4 sm:$0xff]   ;;  %v6066_v52 = vld [vmem:[#allocation6 + $0x10] sm:$0xff]   ;;  %v4903_v54 = vld [vmem:[#allocation11 + $0x8c] ss:$16 sps:$4 sm:$0xff]   ;;  %s4382_s7 = sshll.u32 %s5887_s22, 4  ;;  %s4383_s7 = int_to_ptr.vmem [resolvable:$true] %s4382_s7 }
  0x90   :  { %v4891_v53 = vld [vmem:[#allocation11 + $0x80] ss:$16 sps:$4 sm:$0xff]   ;;  %v4900_v55 = vld [vmem:[#allocation11 + $0xa4] ss:$16 sps:$4 sm:$0xff]   ;;  %v4901_v56 = vld [vmem:[#allocation11 + $0x88] ss:$16 sps:$4 sm:$0xff]   ;;  %p5846_p1 = scmp.lt.s32.totalorder %s4383_s7, %s4383_s7 }
  0x91   :  { %452 = vmatpush1.bf16.msra.mxu0 %v4845_v19  ;;  %565 = vmatpush1.bf16.msra.mxu1 %v4846_v20  ;;  %v4910_v57 = vld [vmem:[#allocation11 + $0xac] ss:$16 sps:$4 sm:$0xff]   ;;  %v4898_v58 = vld [vmem:[#allocation11 + $0xa0] ss:$16 sps:$4 sm:$0xff]   ;;  %v4907_v59 = vld [vmem:[#allocation11 + $0xc4] ss:$16 sps:$4 sm:$0xff]  }
  0x92   :  { %453 = vmatprep.subr.bf16.mxu0 %v4847_v21  ;;  %566 = vmatprep.subr.bf16.mxu1 %v4849_v22  ;;  %v4908_v60 = vld [vmem:[#allocation11 + $0xa8] ss:$16 sps:$4 sm:$0xff]   ;;  %v4905_v62 = vld [vmem:[#allocation11 + $0xc0] ss:$16 sps:$4 sm:$0xff]   ;;  %v4917_v63 = vld [vmem:[#allocation11 + $0xcc] ss:$16 sps:$4 sm:$0xff]  }
  0x93   :  { %v6072_v61 = vld [vmem:[#allocation6 + $0x18] sm:$0xff]   ;;  %v4914_v1 = vld [vmem:[#allocation11 + $0xe4] ss:$16 sps:$4 sm:$0xff]   ;;  %v4912_v4 = vld [vmem:[#allocation11 + $0xe0] ss:$16 sps:$4 sm:$0xff]   ;;  %s5841_s30 = scalar_lea.vmem %s4383_s7, 256 }
  0x94   :  { %v4915_v2 = vld [vmem:[#allocation11 + $0xc8] ss:$16 sps:$4 sm:$0xff]   ;;  %v4920_v3 = vld [vmem:[#allocation11 + $0xec] ss:$16 sps:$4 sm:$0xff]   ;;  %v6078_v6 = vld [vmem:[#allocation12 + $0x4] ss:$16 sps:$4 sm:$0xff]   ;;  %p5842_p0 = scmp.ne.s32.totalorder %s4383_s7, %s5841_s30  ;;  %p5847_p2 = scmp.lt.s32.totalorder %s5841_s30, %s5841_s30 }
  0x95   :  { %454 = vmatpush1.bf16.msra.mxu0 %v4851_v23  ;;  %567 = vmatpush1.bf16.msra.mxu1 %v4852_v24  ;;  %v4918_v5 = vld [vmem:[#allocation11 + $0xe8] ss:$16 sps:$4 sm:$0xff]   ;;  %v6080_v7 = vld [vmem:[#allocation6 + $0x20] sm:$0xff]   ;;  %v6082_v8 = vld [vmem:[#allocation12 + $0xc] ss:$16 sps:$4 sm:$0xff]  }
  0x96   :  { %455 = vmatprep.subr.bf16.mxu0 %v4853_v25  ;;  %568 = vmatprep.subr.bf16.mxu1 %v4855_v26  ;;  %v6090_v9 = vld [vmem:[#allocation6 + $0x28] sm:$0xff]   ;;  %v6096_v10 = vld [vmem:[#allocation6 + $0x30] sm:$0xff]   ;;  %v6102_v11 = vld [vmem:[#allocation6 + $0x38] sm:$0xff]   ;;  %p5848_p3 = por %p5847_p2, %p5846_p1 }
  0x97   :  { %v6108_v12 = vld [vmem:[#allocation12] ss:$16 sps:$4 sm:$0xff]   ;;  %v6110_v13 = vld [vmem:[#allocation12 + $0x24] ss:$16 sps:$4 sm:$0xff]   ;;  %v6112_v14 = vld [vmem:[#allocation12 + $0x8] ss:$16 sps:$4 sm:$0xff]  }
  0x98   :  { %v6116_v15 = vld [vmem:[#allocation12 + $0x2c] ss:$16 sps:$4 sm:$0xff]   ;;  %v6120_v16 = vld [vmem:[#allocation12 + $0x20] ss:$16 sps:$4 sm:$0xff]   ;;  %v6124_v17 = vld [vmem:[#allocation12 + $0x44] ss:$16 sps:$4 sm:$0xff]   ;;  %p5849_p4 = pnand %p5848_p3, %p5842_p0 }
  0x99   :  { %456 = vmatpush1.bf16.msra.mxu0 %v4857_v27  ;;  %569 = vmatpush1.bf16.msra.mxu1 %v4858_v28  ;;  %v6127_v18 = vld [vmem:[#allocation12 + $0x28] ss:$16 sps:$4 sm:$0xff]   ;;  %v6132_v19 = vld [vmem:[#allocation12 + $0x40] ss:$16 sps:$4 sm:$0xff]   ;;  %v6134_v20 = vld [vmem:[#allocation12 + $0x4c] ss:$16 sps:$4 sm:$0xff]  }
  0x9a   :  { %457 = vmatprep.subr.bf16.mxu0 %v4859_v29  ;;  %570 = vmatprep.subr.bf16.mxu1 %v4861_v30  ;;  %v6136_v21 = vld [vmem:[#allocation12 + $0x64] ss:$16 sps:$4 sm:$0xff]   ;;  %v6139_v22 = vld [vmem:[#allocation12 + $0x48] ss:$16 sps:$4 sm:$0xff]   ;;  %v6143_v23 = vld [vmem:[#allocation12 + $0x6c] ss:$16 sps:$4 sm:$0xff]  }
  0x9b   :  { %v6148_v24 = vld [vmem:[#allocation12 + $0x60] ss:$16 sps:$4 sm:$0xff]   ;;  %v6152_v25 = vld [vmem:[#allocation12 + $0x84] ss:$16 sps:$4 sm:$0xff]   ;;  %v6155_v26 = vld [vmem:[#allocation12 + $0x68] ss:$16 sps:$4 sm:$0xff]  }
  0x9c   :  { %v6159_v27 = vld [vmem:[#allocation12 + $0x80] ss:$16 sps:$4 sm:$0xff]   ;;  %v6161_v28 = vld [vmem:[#allocation12 + $0x8c] ss:$16 sps:$4 sm:$0xff]   ;;  %v6164_v29 = vld [vmem:[#allocation12 + $0xa4] ss:$16 sps:$4 sm:$0xff]  }
  0x9d   :  { %458 = vmatpush1.bf16.msra.mxu0 %v4863_v31  ;;  %571 = vmatpush1.bf16.msra.mxu1 %v4864_v32  ;;  %v6167_v30 = vld [vmem:[#allocation12 + $0x88] ss:$16 sps:$4 sm:$0xff]   ;;  %v6171_v31 = vld [vmem:[#allocation12 + $0xac] ss:$16 sps:$4 sm:$0xff]   ;;  %v6176_v32 = vld [vmem:[#allocation12 + $0xa0] ss:$16 sps:$4 sm:$0xff]  }
  0x9e   :  { %914 = vmatprep.subr.bf16.mxu0 %v4868_v33  ;;  %1027 = vmatprep.subr.bf16.mxu1 %v4875_v34  ;;  %v6180_v33 = vld [vmem:[#allocation12 + $0xc4] ss:$16 sps:$4 sm:$0xff]   ;;  %v6183_v34 = vld [vmem:[#allocation12 + $0xa8] ss:$16 sps:$4 sm:$0xff]  }
  0xa0   :  { %476 = vmatmul.mubr.bf16.vlgmr.msra.gmra.mrb[0].mxu0 %v6054_v35  ;;  %589 = vmatmul.mubr.bf16.vlgmr.msra.gmra.mrb[0].mxu1 %v6054_v35 }
  0xa1   :  { %915 = vmatpush1.bf16.msra.mxu0 %v4866_v36  ;;  %485 = vmatprep.mubr.bf16.mxu0 %v7637_v0  ;;  %v6189_v36 = vld [vmem:[#allocation12 + $0xcc] ss:$16 sps:$4 sm:$0xff]  }
  0xa2   :  { %598 = vmatprep.mubr.bf16.mxu1 %v7637_v0  ;;  %916 = vmatprep.subr.bf16.mxu0 %v4872_v37  ;;  %v6193_v37 = vld [vmem:[#allocation12 + $0xe4] ss:$16 sps:$4 sm:$0xff]  }
  0xa3   :  { %1028 = vmatpush1.bf16.msra.mxu1 %v4873_v38  ;;  %v6195_v38 = vld [vmem:[#allocation12 + $0xc8] ss:$16 sps:$4 sm:$0xff]  }
  0xa4   :  { %1029 = vmatprep.subr.bf16.mxu1 %v4882_v39  ;;  %v6199_v39 = vld [vmem:[#allocation12 + $0xec] ss:$16 sps:$4 sm:$0xff]  }
  0xa5   :  { %917 = vmatpush1.bf16.msra.mxu0 %v4870_v40  ;;  %v6205_v40 = vld [vmem:[#allocation12 + $0xe0] ss:$16 sps:$4 sm:$0xff]  }
  0xa6   :  { %918 = vmatprep.subr.bf16.mxu0 %v4879_v41  ;;  %v6209_v41 = vld [vmem:[#allocation12 + $0xe8] ss:$16 sps:$4 sm:$0xff]  }
  0xa7   :  { %1030 = vmatpush1.bf16.msra.mxu1 %v4880_v42  ;;  %v6211_v42 = vld [vmem:[#allocation14 + $0x4] ss:$16 sps:$4 sm:$0xff]  }
  0xa8   :  { %486 = vmatmul.mubr.bf16.gmra.mrb[4].mxu0 %v6060_v43  ;;  %599 = vmatmul.mubr.bf16.gmra.mrb[4].mxu1 %v6060_v43 }
  0xa9   :  { %495 = vmatprep.mubr.bf16.mxu0 %v7637_v0  ;;  %608 = vmatprep.mubr.bf16.mxu1 %v7637_v0 }
  0xaa   :  { %919 = vmatpush1.bf16.msra.mxu0 %v4877_v44  ;;  %1031 = vmatprep.subr.bf16.mxu1 %v4889_v46  ;;  %v4973_v44 = vld [vmem:[#allocation14] ss:$16 sps:$4 sm:$0xff]   ;;  %v4975_v46 = vld [vmem:[#allocation14 + $0x24] ss:$16 sps:$4 sm:$0xff]  }
  0xab   :  { %920 = vmatprep.subr.bf16.mxu0 %v4886_v45  ;;  %1032 = vmatpush1.bf16.msra.mxu1 %v4887_v47  ;;  %v4974_v45 = vld [vmem:[#allocation14 + $0x8] ss:$16 sps:$4 sm:$0xff]   ;;  %v4977_v47 = vld [vmem:[#allocation14 + $0x2c] ss:$16 sps:$4 sm:$0xff]  }
  0xac   :  { %1033 = vmatprep.subr.bf16.mxu1 %v4896_v48  ;;  %v4979_v48 = vld [vmem:[#allocation14 + $0x20] ss:$16 sps:$4 sm:$0xff]  }
  0xae   :  { %921 = vmatpush1.bf16.msra.mxu0 %v4884_v49  ;;  %v4980_v49 = vld [vmem:[#allocation14 + $0x28] ss:$16 sps:$4 sm:$0xff]  }
  0xaf   :  { %922 = vmatprep.subr.bf16.mxu0 %v4893_v50  ;;  %1034 = vmatpush1.bf16.msra.mxu1 %v4894_v51  ;;  %v4981_v50 = vld [vmem:[#allocation14 + $0x44] ss:$16 sps:$4 sm:$0xff]   ;;  %v4983_v51 = vld [vmem:[#allocation14 + $0x4c] ss:$16 sps:$4 sm:$0xff]  }
  0xb0   :  { %496 = vmatmul.mubr.bf16.gmra.mrb[8].mxu0 %v6066_v52  ;;  %609 = vmatmul.mubr.bf16.gmra.mrb[8].mxu1 %v6066_v52 }
  0xb1   :  { %505 = vmatprep.mubr.bf16.mxu0 %v7637_v0  ;;  %618 = vmatprep.mubr.bf16.mxu1 %v7637_v0 }
  0xb2   :  { %923 = vmatpush1.bf16.msra.mxu0 %v4891_v53  ;;  %1035 = vmatprep.subr.bf16.mxu1 %v4903_v54  ;;  %v4986_v53 = vld [vmem:[#allocation14 + $0x48] ss:$16 sps:$4 sm:$0xff]   ;;  %v4987_v54 = vld [vmem:[#allocation14 + $0x64] ss:$16 sps:$4 sm:$0xff]  }
  0xb3   :  { %924 = vmatprep.subr.bf16.mxu0 %v4900_v55  ;;  %1036 = vmatpush1.bf16.msra.mxu1 %v4901_v56  ;;  %v4989_v55 = vld [vmem:[#allocation14 + $0x6c] ss:$16 sps:$4 sm:$0xff]   ;;  %v4991_v56 = vld [vmem:[#allocation14 + $0x60] ss:$16 sps:$4 sm:$0xff]  }
  0xb4   :  { %1037 = vmatprep.subr.bf16.mxu1 %v4910_v57  ;;  %v4992_v57 = vld [vmem:[#allocation14 + $0x68] ss:$16 sps:$4 sm:$0xff]  }
  0xb6   :  { %925 = vmatpush1.bf16.msra.mxu0 %v4898_v58  ;;  %v4993_v58 = vld [vmem:[#allocation14 + $0x84] ss:$16 sps:$4 sm:$0xff]  }
  0xb7   :  { %926 = vmatprep.subr.bf16.mxu0 %v4907_v59  ;;  %1038 = vmatpush1.bf16.msra.mxu1 %v4908_v60  ;;  %v4995_v59 = vld [vmem:[#allocation14 + $0x8c] ss:$16 sps:$4 sm:$0xff]   ;;  %v4997_v60 = vld [vmem:[#allocation14 + $0x80] ss:$16 sps:$4 sm:$0xff]  }
  0xb8   :  { %506 = vmatmul.mubr.bf16.gmra.mrb[12].mxu0 %v6072_v61  ;;  %619 = vmatmul.mubr.bf16.gmra.mrb[12].mxu1 %v6072_v61 }
  0xb9   :  { %515 = vmatprep.mubr.bf16.mxu0 %v7637_v0  ;;  %628 = vmatprep.mubr.bf16.mxu1 %v7637_v0 }
  0xba   :  { %927 = vmatpush1.bf16.msra.mxu0 %v4905_v62  ;;  %1039 = vmatprep.subr.bf16.mxu1 %v4917_v63  ;;  %v4999_v62 = vld [vmem:[#allocation14 + $0xa4] ss:$16 sps:$4 sm:$0xff]   ;;  %v5001_v63 = vld [vmem:[#allocation14 + $0xac] ss:$16 sps:$4 sm:$0xff]  }
  0xbb   :  { %928 = vmatprep.subr.bf16.mxu0 %v4914_v1  ;;  %1040 = vmatpush1.bf16.msra.mxu1 %v4915_v2  ;;  %v5003_v1 = vld [vmem:[#allocation14 + $0xa0] ss:$16 sps:$4 sm:$0xff]   ;;  %v5004_v2 = vld [vmem:[#allocation14 + $0xa8] ss:$16 sps:$4 sm:$0xff]  }
  0xbc   :  { %1041 = vmatprep.subr.bf16.mxu1 %v4920_v3  ;;  %v5005_v3 = vld [vmem:[#allocation14 + $0xc4] ss:$16 sps:$4 sm:$0xff]  }
  0xbe   :  { %929 = vmatpush1.bf16.msra.mxu0 %v4912_v4  ;;  %v5007_v4 = vld [vmem:[#allocation14 + $0xcc] ss:$16 sps:$4 sm:$0xff]  }
  0xbf   :  { %1042 = vmatpush1.bf16.msra.mxu1 %v4918_v5  ;;  %1444 = vmatprep.subr.bf16.mxu0 %v6078_v6  ;;  %v5009_v5 = vld [vmem:[#allocation14 + $0xc0] ss:$16 sps:$4 sm:$0xff]  }
  0xc0   :  { %516 = vmatmul.mubr.bf16.gmra.mrb[16].mxu0 %v6080_v7  ;;  %629 = vmatmul.mubr.bf16.gmra.mrb[16].mxu1 %v6080_v7 }
  0xc1   :  { %525 = vmatprep.mubr.bf16.mxu0 %v7637_v0  ;;  %638 = vmatprep.mubr.bf16.mxu1 %v7637_v0 }
  0xc2   :  { %1487 = vmatprep.subr.bf16.mxu1 %v6082_v8 }
  0xc8   :  { %526 = vmatmul.mubr.bf16.gmra.mrb[20].mxu0 %v6090_v9  ;;  %639 = vmatmul.mubr.bf16.gmra.mrb[20].mxu1 %v6090_v9 }
  0xc9   :  { %535 = vmatprep.mubr.bf16.mxu0 %v7637_v0  ;;  %648 = vmatprep.mubr.bf16.mxu1 %v7637_v0 }
  0xd0   :  { %536 = vmatmul.mubr.bf16.gmra.mrb[24].mxu0 %v6096_v10  ;;  %649 = vmatmul.mubr.bf16.gmra.mrb[24].mxu1 %v6096_v10 }
  0xd1   :  { %545 = vmatprep.mubr.bf16.mxu0 %v7637_v0  ;;  %658 = vmatprep.mubr.bf16.mxu1 %v7637_v0 }
  0xd8   :  { %546 = vmatmul.mubr.bf16.gmra.mrb[28].mxu0 %v6102_v11  ;;  %659 = vmatmul.mubr.bf16.gmra.mrb[28].mxu1 %v6102_v11 }
  0xd9   :  { %946 = vmatprep.mubr.bf16.mxu0 %v7637_v0  ;;  %1059 = vmatprep.mubr.bf16.mxu1 %v7637_v0 }
  0xe0   :  { %947 = vmatmul.mubr.bf16.vlgmr.msra.gmra.mrb[32].mxu0 %v6054_v35  ;;  %1060 = vmatmul.mubr.bf16.vlgmr.msra.gmra.mrb[32].mxu1 %v6054_v35  ;;  %v6187_v35 = vld [vmem:[#allocation12 + $0xc0] ss:$16 sps:$4 sm:$0xff]  }
  0xe1   :  { %1445 = vmatpush1.bf16.msra.mxu0 %v6108_v12  ;;  %956 = vmatprep.mubr.bf16.mxu0 %v7637_v0 }
  0xe2   :  { %1069 = vmatprep.mubr.bf16.mxu1 %v7637_v0  ;;  %1446 = vmatprep.subr.bf16.mxu0 %v6110_v13 }
  0xe3   :  { %1488 = vmatpush1.bf16.msra.mxu1 %v6112_v14 }
  0xe4   :  { %1489 = vmatprep.subr.bf16.mxu1 %v6116_v15 }
  0xe5   :  { %1447 = vmatpush1.bf16.msra.mxu0 %v6120_v16 }
  0xe6   :  { %1448 = vmatprep.subr.bf16.mxu0 %v6124_v17 }
  0xe7   :  { %1490 = vmatpush1.bf16.msra.mxu1 %v6127_v18 }
  0xe8   :  { %957 = vmatmul.mubr.bf16.gmra.mrb[36].mxu0 %v6060_v43  ;;  %1070 = vmatmul.mubr.bf16.gmra.mrb[36].mxu1 %v6060_v43  ;;  %v6215_v43 = vld [vmem:[#allocation14 + $0xc] ss:$16 sps:$4 sm:$0xff]  }
  0xe9   :  { %966 = vmatprep.mubr.bf16.mxu0 %v7637_v0  ;;  %1079 = vmatprep.mubr.bf16.mxu1 %v7637_v0 }
  0xea   :  { %1449 = vmatpush1.bf16.msra.mxu0 %v6132_v19  ;;  %1491 = vmatprep.subr.bf16.mxu1 %v6134_v20 }
  0xeb   :  { %1450 = vmatprep.subr.bf16.mxu0 %v6136_v21  ;;  %1492 = vmatpush1.bf16.msra.mxu1 %v6139_v22 }
  0xec   :  { %1493 = vmatprep.subr.bf16.mxu1 %v6143_v23 }
  0xee   :  { %1451 = vmatpush1.bf16.msra.mxu0 %v6148_v24 }
  0xef   :  { %1452 = vmatprep.subr.bf16.mxu0 %v6152_v25  ;;  %1494 = vmatpush1.bf16.msra.mxu1 %v6155_v26 }
  0xf0   :  { %967 = vmatmul.mubr.bf16.gmra.mrb[40].mxu0 %v6066_v52  ;;  %1080 = vmatmul.mubr.bf16.gmra.mrb[40].mxu1 %v6066_v52  ;;  %v4985_v52 = vld [vmem:[#allocation14 + $0x40] ss:$16 sps:$4 sm:$0xff]  }
  0xf1   :  { %976 = vmatprep.mubr.bf16.mxu0 %v7637_v0  ;;  %1089 = vmatprep.mubr.bf16.mxu1 %v7637_v0 }
  0xf2   :  { %1453 = vmatpush1.bf16.msra.mxu0 %v6159_v27  ;;  %1495 = vmatprep.subr.bf16.mxu1 %v6161_v28 }
  0xf3   :  { %1454 = vmatprep.subr.bf16.mxu0 %v6164_v29  ;;  %1496 = vmatpush1.bf16.msra.mxu1 %v6167_v30 }
  0xf4   :  { %1497 = vmatprep.subr.bf16.mxu1 %v6171_v31 }
  0xf6   :  { %1455 = vmatpush1.bf16.msra.mxu0 %v6176_v32 }
  0xf7   :  { %1456 = vmatprep.subr.bf16.mxu0 %v6180_v33  ;;  %1498 = vmatpush1.bf16.msra.mxu1 %v6183_v34 }
  0xf8   :  { %977 = vmatmul.mubr.bf16.gmra.mrb[44].mxu0 %v6072_v61  ;;  %1090 = vmatmul.mubr.bf16.gmra.mrb[44].mxu1 %v6072_v61  ;;  %v4998_v61 = vld [vmem:[#allocation14 + $0x88] ss:$16 sps:$4 sm:$0xff]  }
  0xf9   :  { %986 = vmatprep.mubr.bf16.mxu0 %v7637_v0  ;;  %1099 = vmatprep.mubr.bf16.mxu1 %v7637_v0 }
  0xfa   :  { %1457 = vmatpush1.bf16.msra.mxu0 %v6187_v35  ;;  %1499 = vmatprep.subr.bf16.mxu1 %v6189_v36 }
  0xfb   :  { %1458 = vmatprep.subr.bf16.mxu0 %v6193_v37  ;;  %1500 = vmatpush1.bf16.msra.mxu1 %v6195_v38 }
  0xfc   :  { %1501 = vmatprep.subr.bf16.mxu1 %v6199_v39 }
  0xfe   :  { %1459 = vmatpush1.bf16.msra.mxu0 %v6205_v40 }
  0xff   :  { %1502 = vmatpush1.bf16.msra.mxu1 %v6209_v41  ;;  %1759 = vmatprep.subr.bf16.mxu0 %v6211_v42 }
 0x100   :  { %987 = vmatmul.mubr.bf16.gmra.mrb[48].mxu0 %v6080_v7  ;;  %1100 = vmatmul.mubr.bf16.gmra.mrb[48].mxu1 %v6080_v7  ;;  %v5010_v7 = vld [vmem:[#allocation14 + $0xc8] ss:$16 sps:$4 sm:$0xff]  }
 0x101   :  { %996 = vmatprep.mubr.bf16.mxu0 %v7637_v0  ;;  %1109 = vmatprep.mubr.bf16.mxu1 %v7637_v0 }
 0x102   :  { %1802 = vmatprep.subr.bf16.mxu1 %v6215_v43 }
 0x108   :  { %997 = vmatmul.mubr.bf16.gmra.mrb[52].mxu0 %v6090_v9  ;;  %1110 = vmatmul.mubr.bf16.gmra.mrb[52].mxu1 %v6090_v9  ;;  %v5011_v9 = vld [vmem:[#allocation14 + $0xe4] ss:$16 sps:$4 sm:$0xff]  }
 0x109   :  { %1006 = vmatprep.mubr.bf16.mxu0 %v7637_v0  ;;  %1119 = vmatprep.mubr.bf16.mxu1 %v7637_v0 }
 0x110   :  { %1007 = vmatmul.mubr.bf16.gmra.mrb[56].mxu0 %v6096_v10  ;;  %1120 = vmatmul.mubr.bf16.gmra.mrb[56].mxu1 %v6096_v10  ;;  %v5013_v10 = vld [vmem:[#allocation14 + $0xec] ss:$16 sps:$4 sm:$0xff]  }
 0x111   :  { %1016 = vmatprep.mubr.bf16.mxu0 %v7637_v0  ;;  %1129 = vmatprep.mubr.bf16.mxu1 %v7637_v0 }
 0x118   :  { %1017 = vmatmul.mubr.bf16.gmra.mrb[60].mxu0 %v6102_v11  ;;  %1130 = vmatmul.mubr.bf16.gmra.mrb[60].mxu1 %v6102_v11  ;;  %v5015_v11 = vld [vmem:[#allocation14 + $0xe0] ss:$16 sps:$4 sm:$0xff]  }
 0x119   :  { %1476 = vmatprep.mubr.bf16.mxu0 %v7637_v0  ;;  %1519 = vmatprep.mubr.bf16.mxu1 %v7637_v0 }
 0x120   :  { %1477 = vmatmul.mubr.bf16.vlgmr.msra.gmra.mrb[64].mxu0 %v7637_v0  ;;  %1520 = vmatmul.mubr.bf16.vlgmr.msra.gmra.mrb[64].mxu1 %v7637_v0 }
 0x121   :  { %1760 = vmatpush1.bf16.msra.mxu0 %v4973_v44  ;;  %1803 = vmatpush1.bf16.msra.mxu1 %v4974_v45  ;;  %v5016_v44 = vld [vmem:[#allocation14 + $0xe8] ss:$16 sps:$4 sm:$0xff]  }
 0x122   :  { %1761 = vmatprep.subr.bf16.mxu0 %v4975_v46  ;;  %1804 = vmatprep.subr.bf16.mxu1 %v4977_v47 }
 0x123   :  { %1791 = vmatprep.mubr.bf16.mxu0 %v7637_v0  ;;  %1834 = vmatprep.mubr.bf16.mxu1 %v7637_v0 }
 0x125   :  { %1762 = vmatpush1.bf16.msra.mxu0 %v4979_v48  ;;  %1805 = vmatpush1.bf16.msra.mxu1 %v4980_v49 }
 0x126   :  { %1763 = vmatprep.subr.bf16.mxu0 %v4981_v50  ;;  %1806 = vmatprep.subr.bf16.mxu1 %v4983_v51 }
 0x129   :  { %1764 = vmatpush1.bf16.msra.mxu0 %v4985_v52  ;;  %1807 = vmatpush1.bf16.msra.mxu1 %v4986_v53 }
 0x12a   :  { %1765 = vmatprep.subr.bf16.mxu0 %v4987_v54  ;;  %1808 = vmatprep.subr.bf16.mxu1 %v4989_v55 }
 0x12d   :  { %1766 = vmatpush1.bf16.msra.mxu0 %v4991_v56  ;;  %1809 = vmatpush1.bf16.msra.mxu1 %v4992_v57 }
 0x12e   :  { %1767 = vmatprep.subr.bf16.mxu0 %v4993_v58  ;;  %1810 = vmatprep.subr.bf16.mxu1 %v4995_v59 }
 0x131   :  { %1768 = vmatpush1.bf16.msra.mxu0 %v4997_v60  ;;  %1811 = vmatpush1.bf16.msra.mxu1 %v4998_v61 }
 0x132   :  { %1769 = vmatprep.subr.bf16.mxu0 %v4999_v62  ;;  %1812 = vmatprep.subr.bf16.mxu1 %v5001_v63 }
 0x135   :  { %1770 = vmatpush1.bf16.msra.mxu0 %v5003_v1  ;;  %1813 = vmatpush1.bf16.msra.mxu1 %v5004_v2 }
 0x136   :  { %1771 = vmatprep.subr.bf16.mxu0 %v5005_v3  ;;  %1814 = vmatprep.subr.bf16.mxu1 %v5007_v4 }
 0x139   :  { %1772 = vmatpush1.bf16.msra.mxu0 %v5009_v5  ;;  %1815 = vmatpush1.bf16.msra.mxu1 %v5010_v7 }
 0x13a   :  { %1773 = vmatprep.subr.bf16.mxu0 %v5011_v9  ;;  %1816 = vmatprep.subr.bf16.mxu1 %v5013_v10 }
 0x13d   :  { %1774 = vmatpush1.bf16.msra.mxu0 %v5015_v11  ;;  %1817 = vmatpush1.bf16.msra.mxu1 %v5016_v44 }
 0x13e   :  { %1928 = vmatprep.subr.bf16.mxu0 %v6078_v6  ;;  %1971 = vmatprep.subr.bf16.mxu1 %v6082_v8  ;;  %v215_v6 = vlaneseq }
 0x140   :  { %1792 = vmatmul.mubr.bf16.vlgmr.msra.gmra.mrb[68].mxu0 %v7637_v0  ;;  %1835 = vmatmul.mubr.bf16.vlgmr.msra.gmra.mrb[68].mxu1 %v7637_v0  ;;  %v6278_v8 = vshrl.u32 %v215_v6, 7 }
 0x141   :  { %1929 = vmatpush1.bf16.msra.mxu0 %v6108_v12  ;;  %1972 = vmatpush1.bf16.msra.mxu1 %v6112_v14 }
 0x142   :  { %1930 = vmatprep.subr.bf16.mxu0 %v6110_v13  ;;  %1973 = vmatprep.subr.bf16.mxu1 %v6116_v15  ;;  %v225_v12 = vsub.s32 2, %v6278_v8  ;;  %v229_v13 = vsub.s32 3, %v6278_v8  ;;  %v217_v14 = vsub.s32 0, %v6278_v8  ;;  %v196_v15 = vld [vmem:[%s7631_s5] sm:$0xf] }
 0x143   :  { %1960 = vmatprep.mubr.bf16.mxu0 %v7637_v0  ;;  %2003 = vmatprep.mubr.bf16.mxu1 %v7637_v0 }
 0x145   :  { %1931 = vmatpush1.bf16.msra.mxu0 %v6120_v16  ;;  %1974 = vmatpush1.bf16.msra.mxu1 %v6127_v18  ;;  %v221_v16 = vsub.s32 1, %v6278_v8  ;;  %v6293_v18 = vrot.slane %v196_v15, %v229_v13 }
 0x146   :  { %1932 = vmatprep.subr.bf16.mxu0 %v6124_v17  ;;  %1975 = vmatprep.subr.bf16.mxu1 %v6134_v20  ;;  %v6289_v17 = vrot.slane %v196_v15, %v225_v12 }
 0x149   :  { %1933 = vmatpush1.bf16.msra.mxu0 %v6132_v19  ;;  %1976 = vmatpush1.bf16.msra.mxu1 %v6139_v22  ;;  %v6297_v19 = vrot.slane %v196_v15, %v217_v14 }
 0x14a   :  { %1934 = vmatprep.subr.bf16.mxu0 %v6136_v21  ;;  %1977 = vmatprep.subr.bf16.mxu1 %v6143_v23  ;;  %v6301_v21 = vrot.slane %v196_v15, %v221_v16 }
 0x14d   :  { %1935 = vmatpush1.bf16.msra.mxu0 %v6148_v24  ;;  %1978 = vmatpush1.bf16.msra.mxu1 %v6155_v26 }
 0x14e   :  { %1936 = vmatprep.subr.bf16.mxu0 %v6152_v25  ;;  %1979 = vmatprep.subr.bf16.mxu1 %v6161_v28 }
 0x151   :  { %1937 = vmatpush1.bf16.msra.mxu0 %v6159_v27  ;;  %1980 = vmatpush1.bf16.msra.mxu1 %v6167_v30 }
 0x152   :  { %1938 = vmatprep.subr.bf16.mxu0 %v6164_v29  ;;  %1981 = vmatprep.subr.bf16.mxu1 %v6171_v31 }
 0x155   :  { %1939 = vmatpush1.bf16.msra.mxu0 %v6176_v32  ;;  %1982 = vmatpush1.bf16.msra.mxu1 %v6183_v34 }
 0x156   :  { %1940 = vmatprep.subr.bf16.mxu0 %v6180_v33  ;;  %1983 = vmatprep.subr.bf16.mxu1 %v6189_v36 }
 0x159   :  { %1941 = vmatpush1.bf16.msra.mxu0 %v6187_v35  ;;  %1984 = vmatpush1.bf16.msra.mxu1 %v6195_v38 }
 0x15a   :  { %1942 = vmatprep.subr.bf16.mxu0 %v6193_v37  ;;  %1985 = vmatprep.subr.bf16.mxu1 %v6199_v39 }
 0x15d   :  { %1943 = vmatpush1.bf16.msra.mxu0 %v6205_v40  ;;  %1986 = vmatpush1.bf16.msra.mxu1 %v6209_v41 }
 0x15e   :  { %2083 = vmatprep.subr.bf16.mxu0 %v6211_v42  ;;  %2126 = vmatprep.subr.bf16.mxu1 %v6215_v43 }
 0x173   :  { %v477_v20 = vpop.f32.mrb[0].mxu0  ;;  %v590_v22 = vpop.f32.mrb[0].mxu1 }
 0x174   :  { %v479_v23 = vpop.f32.mrb[1].mxu0  ;;  %v591_v24 = vadd.f32 %v590_v22, %v6289_v17  ;;  %v592_v25 = vpop.f32.mrb[1].mxu1  ;;  %v478_v29 = vadd.f32 %v477_v20, %v6297_v19 }
 0x175   :  { %v481_v26 = vpop.f32.mrb[2].mxu0  ;;  %v593_v27 = vadd.f32 %v592_v25, %v6293_v18  ;;  %v594_v28 = vpop.f32.mrb[2].mxu1  ;;  %v480_v34 = vadd.f32 %v479_v23, %v6301_v21 }
 0x176   :  { %v482_v30 = vadd.f32 %v481_v26, %v6297_v19  ;;  %v483_v31 = vpop.f32.mrb[3].mxu0  ;;  %v595_v32 = vadd.f32 %v594_v28, %v6289_v17  ;;  %v596_v33 = vpop.f32.mrb[3].mxu1 }
 0x177   :  { %v484_v35 = vadd.f32 %v483_v31, %v6301_v21  ;;  %v597_v36 = vadd.f32 %v596_v33, %v6293_v18 }
 0x178   :  { %v6311_v37 = vpack.c.bf16 %v482_v30, %v478_v29  ;;  %v6313_v38 = vpack.c.bf16 %v595_v32, %v591_v24 }
 0x179   :  { %v6315_v39 = vpack.c.bf16 %v484_v35, %v480_v34  ;;  %v6317_v40 = vpack.c.bf16 %v597_v36, %v593_v27 }
 0x17b   :  { %v487_v41 = vpop.f32.mrb[4].mxu0  ;;  %v600_v42 = vpop.f32.mrb[4].mxu1 }
 0x17c   :  { %v488_v43 = vadd.f32 %v487_v41, %v6297_v19  ;;  %v489_v45 = vpop.f32.mrb[5].mxu0  ;;  %v601_v46 = vadd.f32 %v600_v42, %v6289_v17  ;;  %v602_v47 = vpop.f32.mrb[5].mxu1 }
 0x17d   :  { %v490_v48 = vadd.f32 %v489_v45, %v6301_v21  ;;  %v491_v49 = vpop.f32.mrb[6].mxu0  ;;  %v603_v50 = vadd.f32 %v602_v47, %v6293_v18  ;;  %v604_v51 = vpop.f32.mrb[6].mxu1 }
 0x17e   :  { %v492_v52 = vadd.f32 %v491_v49, %v6297_v19  ;;  %v493_v53 = vpop.f32.mrb[7].mxu0  ;;  %v605_v54 = vadd.f32 %v604_v51, %v6289_v17  ;;  %v606_v55 = vpop.f32.mrb[7].mxu1 }
 0x17f   :  { %v494_v56 = vadd.f32 %v493_v53, %v6301_v21  ;;  %v607_v57 = vadd.f32 %v606_v55, %v6293_v18 }
 0x180   :  { %v6327_v58 = vpack.c.bf16 %v492_v52, %v488_v43  ;;  %v6329_v59 = vpack.c.bf16 %v605_v54, %v601_v46 }
 0x181   :  { %v6331_v60 = vpack.c.bf16 %v494_v56, %v490_v48  ;;  %v6333_v61 = vpack.c.bf16 %v607_v57, %v603_v50 }
 0x183   :  { %v497_v62 = vpop.f32.mrb[8].mxu0  ;;  %v610_v63 = vpop.f32.mrb[8].mxu1 }
 0x184   :  { %v498_v1 = vadd.f32 %v497_v62, %v6297_v19  ;;  %v499_v2 = vpop.f32.mrb[9].mxu0  ;;  %v611_v3 = vadd.f32 %v610_v63, %v6289_v17  ;;  %v612_v4 = vpop.f32.mrb[9].mxu1 }
 0x185   :  { %v500_v5 = vadd.f32 %v499_v2, %v6301_v21  ;;  %v501_v7 = vpop.f32.mrb[10].mxu0  ;;  %v613_v9 = vadd.f32 %v612_v4, %v6293_v18  ;;  %v614_v10 = vpop.f32.mrb[10].mxu1 }
 0x186   :  { %v502_v11 = vadd.f32 %v501_v7, %v6297_v19  ;;  %v503_v44 = vpop.f32.mrb[11].mxu0  ;;  %v615_v6 = vadd.f32 %v614_v10, %v6289_v17  ;;  %v616_v15 = vpop.f32.mrb[11].mxu1 }
 0x187   :  { %v504_v20 = vadd.f32 %v503_v44, %v6301_v21  ;;  %v617_v22 = vadd.f32 %v616_v15, %v6293_v18 }
 0x188   :  { %v6343_v23 = vpack.c.bf16 %v502_v11, %v498_v1  ;;  %v6345_v24 = vpack.c.bf16 %v615_v6, %v611_v3 }
 0x189   :  { %v6347_v25 = vpack.c.bf16 %v504_v20, %v500_v5  ;;  %v6349_v26 = vpack.c.bf16 %v617_v22, %v613_v9 }
 0x18a   :  { %7843 = vst [vmem:[#allocation24_spill] sm:$0xff] %v6343_v23  ;;  %7844 = vst [vmem:[#allocation25_spill] sm:$0xff] %v6345_v24  ;;  %v6769_v24 = vld [vmem:[#allocation12 + $0x88] ss:$16 sps:$4 sm:$0xff]   ;;  %v6772_v23 = vld [vmem:[#allocation12 + $0xa4] ss:$16 sps:$4 sm:$0xff]  }
 0x18b   :  { %7845 = vst [vmem:[#allocation26_spill] sm:$0xff] %v6347_v25  ;;  %7846 = vst [vmem:[#allocation27_spill] sm:$0xff] %v6349_v26  ;;  %v507_v27 = vpop.f32.mrb[12].mxu0  ;;  %v620_v28 = vpop.f32.mrb[12].mxu1  ;;  %v6763_v26 = vld [vmem:[#allocation12 + $0x8c] ss:$16 sps:$4 sm:$0xff]  }
 0x18c   :  { %v508_v29 = vadd.f32 %v507_v27, %v6297_v19  ;;  %v509_v30 = vpop.f32.mrb[13].mxu0  ;;  %v621_v31 = vadd.f32 %v620_v28, %v6289_v17  ;;  %v622_v32 = vpop.f32.mrb[13].mxu1  ;;  %7915 = vst [vmem:[#allocation95_spill] sm:$0xff] %v6763_v26  ;;  %v6766_v25 = vld [vmem:[#allocation12 + $0x80] ss:$16 sps:$4 sm:$0xff]   ;;  %7917 = vst [vmem:[#allocation97_spill] sm:$0xff] %v6769_v24 }
 0x18d   :  { %v510_v33 = vadd.f32 %v509_v30, %v6301_v21  ;;  %v511_v34 = vpop.f32.mrb[14].mxu0  ;;  %v623_v35 = vadd.f32 %v622_v32, %v6293_v18  ;;  %v624_v36 = vpop.f32.mrb[14].mxu1  ;;  %7916 = vst [vmem:[#allocation96_spill] sm:$0xff] %v6766_v25  ;;  %7918 = vst [vmem:[#allocation98_spill] sm:$0xff] %v6772_v23 }
 0x18e   :  { %v512_v41 = vadd.f32 %v511_v34, %v6297_v19  ;;  %v513_v42 = vpop.f32.mrb[15].mxu0  ;;  %v625_v43 = vadd.f32 %v624_v36, %v6289_v17  ;;  %v626_v45 = vpop.f32.mrb[15].mxu1 }
 0x18f   :  { %v514_v46 = vadd.f32 %v513_v42, %v6301_v21  ;;  %v627_v47 = vadd.f32 %v626_v45, %v6293_v18 }
 0x190   :  { %v6359_v48 = vpack.c.bf16 %v512_v41, %v508_v29  ;;  %v6361_v49 = vpack.c.bf16 %v625_v43, %v621_v31 }
 0x191   :  { %v6363_v50 = vpack.c.bf16 %v514_v46, %v510_v33  ;;  %v6365_v51 = vpack.c.bf16 %v627_v47, %v623_v35 }
 0x192   :  { %7847 = vst [vmem:[#allocation28_spill] sm:$0xff] %v6359_v48  ;;  %7848 = vst [vmem:[#allocation29_spill] sm:$0xff] %v6361_v49  ;;  %v6716_v49 = vld [vmem:[#allocation12] ss:$16 sps:$4 sm:$0xff]   ;;  %v6736_v48 = vld [vmem:[#allocation12 + $0x44] ss:$16 sps:$4 sm:$0xff]  }
 0x193   :  { %7849 = vst [vmem:[#allocation30_spill] sm:$0xff] %v6363_v50  ;;  %7850 = vst [vmem:[#allocation31_spill] sm:$0xff] %v6365_v51  ;;  %v517_v52 = vpop.f32.mrb[16].mxu0  ;;  %v630_v53 = vpop.f32.mrb[16].mxu1  ;;  %v6711_v51 = vld [vmem:[#allocation12 + $0xc] ss:$16 sps:$4 sm:$0xff]  }
 0x194   :  { %v518_v54 = vadd.f32 %v517_v52, %v6297_v19  ;;  %v519_v55 = vpop.f32.mrb[17].mxu0  ;;  %v631_v56 = vadd.f32 %v630_v53, %v6289_v17  ;;  %v632_v57 = vpop.f32.mrb[17].mxu1  ;;  %7899 = vst [vmem:[#allocation79_spill] sm:$0xff] %v6711_v51  ;;  %7900 = vst [vmem:[#allocation80_spill] sm:$0xff] %v6716_v49 }
 0x195   :  { %v520_v62 = vadd.f32 %v519_v55, %v6301_v21  ;;  %v521_v63 = vpop.f32.mrb[18].mxu0  ;;  %v633_v1 = vadd.f32 %v632_v57, %v6293_v18  ;;  %v634_v2 = vpop.f32.mrb[18].mxu1  ;;  %7906 = vst [vmem:[#allocation86_spill] sm:$0xff] %v6736_v48 }
 0x196   :  { %v522_v3 = vadd.f32 %v521_v63, %v6297_v19  ;;  %v523_v4 = vpop.f32.mrb[19].mxu0  ;;  %v635_v5 = vadd.f32 %v634_v2, %v6289_v17  ;;  %v636_v7 = vpop.f32.mrb[19].mxu1 }
 0x197   :  { %v524_v9 = vadd.f32 %v523_v4, %v6301_v21  ;;  %v637_v10 = vadd.f32 %v636_v7, %v6293_v18 }
 0x198   :  { %v6375_v11 = vpack.c.bf16 %v522_v3, %v518_v54  ;;  %v6377_v44 = vpack.c.bf16 %v635_v5, %v631_v56 }
 0x199   :  { %v6379_v6 = vpack.c.bf16 %v524_v9, %v520_v62  ;;  %v6381_v15 = vpack.c.bf16 %v637_v10, %v633_v1 }
 0x19a   :  { %7851 = vst [vmem:[#allocation32_spill] sm:$0xff] %v6375_v11  ;;  %7852 = vst [vmem:[#allocation33_spill] sm:$0xff] %v6377_v44  ;;  %v6698_v11 = vld [vmem:[#allocation14 + $0xe0] ss:$16 sps:$4 sm:$0xff]  }
 0x19b   :  { %7853 = vst [vmem:[#allocation34_spill] sm:$0xff] %v6379_v6  ;;  %7854 = vst [vmem:[#allocation35_spill] sm:$0xff] %v6381_v15  ;;  %v527_v20 = vpop.f32.mrb[20].mxu0  ;;  %v640_v22 = vpop.f32.mrb[20].mxu1  ;;  %v6695_v15 = vld [vmem:[#allocation14 + $0xec] ss:$16 sps:$4 sm:$0xff]  }
 0x19c   :  { %v528_v27 = vadd.f32 %v527_v20, %v6297_v19  ;;  %v529_v28 = vpop.f32.mrb[21].mxu0  ;;  %v641_v29 = vadd.f32 %v640_v22, %v6289_v17  ;;  %v642_v30 = vpop.f32.mrb[21].mxu1  ;;  %7894 = vst [vmem:[#allocation74_spill] sm:$0xff] %v6698_v11 }
 0x19d   :  { %v530_v31 = vadd.f32 %v529_v28, %v6301_v21  ;;  %v531_v32 = vpop.f32.mrb[22].mxu0  ;;  %v643_v33 = vadd.f32 %v642_v30, %v6293_v18  ;;  %v644_v34 = vpop.f32.mrb[22].mxu1 }
 0x19e   :  { %v532_v35 = vadd.f32 %v531_v32, %v6297_v19  ;;  %v533_v36 = vpop.f32.mrb[23].mxu0  ;;  %v645_v41 = vadd.f32 %v644_v34, %v6289_v17  ;;  %v646_v42 = vpop.f32.mrb[23].mxu1 }
 0x19f   :  { %v534_v43 = vadd.f32 %v533_v36, %v6301_v21  ;;  %v647_v45 = vadd.f32 %v646_v42, %v6293_v18 }
 0x1a0   :  { %v6391_v46 = vpack.c.bf16 %v532_v35, %v528_v27  ;;  %v6393_v47 = vpack.c.bf16 %v645_v41, %v641_v29 }
 0x1a1   :  { %v6395_v52 = vpack.c.bf16 %v534_v43, %v530_v31  ;;  %v6397_v53 = vpack.c.bf16 %v647_v45, %v643_v33  ;;  %v197_v43 = vld [vmem:[%s7632_s6] sm:$0xf] }
 0x1a2   :  { %7855 = vst [vmem:[#allocation36_spill] sm:$0xff] %v6391_v46  ;;  %7856 = vst [vmem:[#allocation37_spill] sm:$0xff] %v6393_v47 }
 0x1a3   :  { %7857 = vst [vmem:[#allocation38_spill] sm:$0xff] %v6395_v52  ;;  %7858 = vst [vmem:[#allocation39_spill] sm:$0xff] %v6397_v53  ;;  %v537_v54 = vpop.f32.mrb[24].mxu0  ;;  %v650_v55 = vpop.f32.mrb[24].mxu1 }
 0x1a4   :  { %v538_v56 = vadd.f32 %v537_v54, %v6297_v19  ;;  %v539_v57 = vpop.f32.mrb[25].mxu0  ;;  %v651_v62 = vadd.f32 %v650_v55, %v6289_v17  ;;  %v652_v63 = vpop.f32.mrb[25].mxu1 }
 0x1a5   :  { %v540_v1 = vadd.f32 %v539_v57, %v6301_v21  ;;  %v541_v2 = vpop.f32.mrb[26].mxu0  ;;  %v653_v3 = vadd.f32 %v652_v63, %v6293_v18  ;;  %v654_v4 = vpop.f32.mrb[26].mxu1 }
 0x1a6   :  { %v542_v5 = vadd.f32 %v541_v2, %v6297_v19  ;;  %v543_v7 = vpop.f32.mrb[27].mxu0  ;;  %v655_v9 = vadd.f32 %v654_v4, %v6289_v17  ;;  %v656_v10 = vpop.f32.mrb[27].mxu1 }
 0x1a7   :  { %v544_v20 = vadd.f32 %v543_v7, %v6301_v21  ;;  %v657_v22 = vadd.f32 %v656_v10, %v6293_v18 }
 0x1a8   :  { %v6407_v27 = vpack.c.bf16 %v542_v5, %v538_v56  ;;  %v6409_v28 = vpack.c.bf16 %v655_v9, %v651_v62  ;;  %v6436_v5 = vrot.slane %v197_v43, %v225_v12 }
 0x1a9   :  { %v6411_v29 = vpack.c.bf16 %v544_v20, %v540_v1  ;;  %v6413_v30 = vpack.c.bf16 %v657_v22, %v653_v3  ;;  %v6430_v3 = vrot.slane %v197_v43, %v217_v14 }
 0x1aa   :  { %7859 = vst [vmem:[#allocation40_spill] sm:$0xff] %v6407_v27  ;;  %7860 = vst [vmem:[#allocation41_spill] sm:$0xff] %v6409_v28 }
 0x1ab   :  { %7861 = vst [vmem:[#allocation42_spill] sm:$0xff] %v6411_v29  ;;  %7862 = vst [vmem:[#allocation43_spill] sm:$0xff] %v6413_v30  ;;  %v547_v31 = vpop.f32.mrb[28].mxu0  ;;  %v660_v32 = vpop.f32.mrb[28].mxu1 }
 0x1ac   :  { %v548_v33 = vadd.f32 %v547_v31, %v6297_v19  ;;  %v549_v34 = vpop.f32.mrb[29].mxu0  ;;  %v661_v35 = vadd.f32 %v660_v32, %v6289_v17  ;;  %v662_v36 = vpop.f32.mrb[29].mxu1 }
 0x1ad   :  { %v550_v41 = vadd.f32 %v549_v34, %v6301_v21  ;;  %v551_v42 = vpop.f32.mrb[30].mxu0  ;;  %v663_v45 = vadd.f32 %v662_v36, %v6293_v18  ;;  %v664_v54 = vpop.f32.mrb[30].mxu1 }
 0x1ae   :  { %v552_v55 = vadd.f32 %v551_v42, %v6297_v19  ;;  %v553_v56 = vpop.f32.mrb[31].mxu0  ;;  %v665_v57 = vadd.f32 %v664_v54, %v6289_v17  ;;  %v666_v62 = vpop.f32.mrb[31].mxu1  ;;  %v6442_v17 = vrot.slane %v197_v43, %v221_v16 }
 0x1af   :  { %v554_v63 = vadd.f32 %v553_v56, %v6301_v21  ;;  %v667_v1 = vadd.f32 %v666_v62, %v6293_v18  ;;  %v6448_v18 = vrot.slane %v197_v43, %v229_v13 }
 0x1b0   :  { %v6426_v2 = vpack.c.bf16 %v552_v55, %v548_v33  ;;  %v6432_v4 = vpack.c.bf16 %v665_v57, %v661_v35 }
 0x1b1   :  { %v6438_v19 = vpack.c.bf16 %v554_v63, %v550_v41  ;;  %v6444_v21 = vpack.c.bf16 %v667_v1, %v663_v45 }
 0x1b2   :  { %7863 = vst [vmem:[#allocation44_spill] sm:$0xff] %v6426_v2  ;;  %7864 = vst [vmem:[#allocation45_spill] sm:$0xff] %v6432_v4 }
 0x1b3   :  { %7865 = vst [vmem:[#allocation46_spill] sm:$0xff] %v6438_v19  ;;  %7866 = vst [vmem:[#allocation47_spill] sm:$0xff] %v6444_v21  ;;  %v948_v14 = vpop.f32.mrb[32].mxu0  ;;  %v1061_v7 = vpop.f32.mrb[32].mxu1 }
 0x1b4   :  { %v949_v9 = vadd.f32 %v948_v14, %v6430_v3  ;;  %v950_v10 = vpop.f32.mrb[33].mxu0  ;;  %v1062_v12 = vadd.f32 %v1061_v7, %v6436_v5  ;;  %v1063_v20 = vpop.f32.mrb[33].mxu1 }
 0x1b5   :  { %v951_v22 = vadd.f32 %v950_v10, %v6442_v17  ;;  %v952_v31 = vpop.f32.mrb[34].mxu0  ;;  %v1064_v16 = vadd.f32 %v1063_v20, %v6448_v18  ;;  %v1065_v32 = vpop.f32.mrb[34].mxu1 }
 0x1b6   :  { %v953_v33 = vadd.f32 %v952_v31, %v6430_v3  ;;  %v954_v34 = vpop.f32.mrb[35].mxu0  ;;  %v1066_v8 = vadd.f32 %v1065_v32, %v6436_v5  ;;  %v1067_v13 = vpop.f32.mrb[35].mxu1 }
 0x1b7   :  { %v955_v35 = vadd.f32 %v954_v34, %v6442_v17  ;;  %v1068_v36 = vadd.f32 %v1067_v13, %v6448_v18 }
 0x1b8   :  { %v6458_v41 = vpack.c.bf16 %v953_v33, %v949_v9  ;;  %v6460_v42 = vpack.c.bf16 %v1066_v8, %v1062_v12 }
 0x1b9   :  { %v6462_v43 = vpack.c.bf16 %v955_v35, %v951_v22  ;;  %v6464_v45 = vpack.c.bf16 %v1068_v36, %v1064_v16 }
 0x1ba   :  { %7867 = vst [vmem:[#allocation48_spill] sm:$0xff] %v6458_v41  ;;  %7868 = vst [vmem:[#allocation49_spill] sm:$0xff] %v6460_v42 }
 0x1bb   :  { %7869 = vst [vmem:[#allocation50_spill] sm:$0xff] %v6462_v43  ;;  %7870 = vst [vmem:[#allocation51_spill] sm:$0xff] %v6464_v45  ;;  %v958_v54 = vpop.f32.mrb[36].mxu0  ;;  %v1071_v55 = vpop.f32.mrb[36].mxu1 }
 0x1bc   :  { %v959_v56 = vadd.f32 %v958_v54, %v6430_v3  ;;  %v960_v57 = vpop.f32.mrb[37].mxu0  ;;  %v1072_v62 = vadd.f32 %v1071_v55, %v6436_v5  ;;  %v1073_v63 = vpop.f32.mrb[37].mxu1 }
 0x1bd   :  { %v961_v1 = vadd.f32 %v960_v57, %v6442_v17  ;;  %v962_v14 = vpop.f32.mrb[38].mxu0  ;;  %v1074_v7 = vadd.f32 %v1073_v63, %v6448_v18  ;;  %v1075_v9 = vpop.f32.mrb[38].mxu1 }
 0x1be   :  { %v963_v10 = vadd.f32 %v962_v14, %v6430_v3  ;;  %v964_v12 = vpop.f32.mrb[39].mxu0  ;;  %v1076_v20 = vadd.f32 %v1075_v9, %v6436_v5  ;;  %v1077_v22 = vpop.f32.mrb[39].mxu1 }
 0x1bf   :  { %v965_v31 = vadd.f32 %v964_v12, %v6442_v17  ;;  %v1078_v16 = vadd.f32 %v1077_v22, %v6448_v18 }
 0x1c0   :  { %v6474_v32 = vpack.c.bf16 %v963_v10, %v959_v56  ;;  %v6476_v33 = vpack.c.bf16 %v1076_v20, %v1072_v62 }
 0x1c1   :  { %v6478_v34 = vpack.c.bf16 %v965_v31, %v961_v1  ;;  %v6480_v8 = vpack.c.bf16 %v1078_v16, %v1074_v7 }
 0x1c2   :  { %7871 = vst [vmem:[#allocation52_spill] sm:$0xff] %v6474_v32  ;;  %7872 = vst [vmem:[#allocation53_spill] sm:$0xff] %v6476_v33 }
 0x1c3   :  { %7873 = vst [vmem:[#allocation54_spill] sm:$0xff] %v6478_v34  ;;  %7874 = vst [vmem:[#allocation55_spill] sm:$0xff] %v6480_v8  ;;  %v968_v13 = vpop.f32.mrb[40].mxu0  ;;  %v1081_v35 = vpop.f32.mrb[40].mxu1 }
 0x1c4   :  { %v969_v36 = vadd.f32 %v968_v13, %v6430_v3  ;;  %v970_v54 = vpop.f32.mrb[41].mxu0  ;;  %v1082_v55 = vadd.f32 %v1081_v35, %v6436_v5  ;;  %v1083_v57 = vpop.f32.mrb[41].mxu1 }
 0x1c5   :  { %v971_v63 = vadd.f32 %v970_v54, %v6442_v17  ;;  %v972_v14 = vpop.f32.mrb[42].mxu0  ;;  %v1084_v56 = vadd.f32 %v1083_v57, %v6448_v18  ;;  %v1085_v9 = vpop.f32.mrb[42].mxu1 }
 0x1c6   :  { %v973_v62 = vadd.f32 %v972_v14, %v6430_v3  ;;  %v974_v1 = vpop.f32.mrb[43].mxu0  ;;  %v1086_v7 = vadd.f32 %v1085_v9, %v6436_v5  ;;  %v1087_v10 = vpop.f32.mrb[43].mxu1 }
 0x1c7   :  { %v975_v12 = vadd.f32 %v974_v1, %v6442_v17  ;;  %v1088_v20 = vadd.f32 %v1087_v10, %v6448_v18 }
 0x1c8   :  { %v6490_v22 = vpack.c.bf16 %v973_v62, %v969_v36  ;;  %v6492_v31 = vpack.c.bf16 %v1086_v7, %v1082_v55 }
 0x1c9   :  { %v6494_v16 = vpack.c.bf16 %v975_v12, %v971_v63  ;;  %v6496_v13 = vpack.c.bf16 %v1088_v20, %v1084_v56 }
 0x1ca   :  { %7875 = vst [vmem:[#allocation56_spill] sm:$0xff] %v6490_v22  ;;  %7876 = vst [vmem:[#allocation57_spill] sm:$0xff] %v6492_v31 }
 0x1cb   :  { %7877 = vst [vmem:[#allocation58_spill] sm:$0xff] %v6494_v16  ;;  %7878 = vst [vmem:[#allocation59_spill] sm:$0xff] %v6496_v13  ;;  %v978_v35 = vpop.f32.mrb[44].mxu0  ;;  %v1091_v54 = vpop.f32.mrb[44].mxu1 }
 0x1cc   :  { %v979_v57 = vadd.f32 %v978_v35, %v6430_v3  ;;  %v980_v14 = vpop.f32.mrb[45].mxu0  ;;  %v1092_v9 = vadd.f32 %v1091_v54, %v6436_v5  ;;  %v1093_v0 = vpop.f32.mrb[45].mxu1 }
 0x1cd   :  { %v981_v1 = vadd.f32 %v980_v14, %v6442_v17  ;;  %v982_v45 = vpop.f32.mrb[46].mxu0  ;;  %v1094_v36 = vadd.f32 %v1093_v0, %v6448_v18  ;;  %v1095_v62 = vpop.f32.mrb[46].mxu1 }
 0x1ce   :  { %v983_v55 = vadd.f32 %v982_v45, %v6430_v3  ;;  %v984_v63 = vpop.f32.mrb[47].mxu0  ;;  %v1096_v56 = vadd.f32 %v1095_v62, %v6436_v5  ;;  %v1097_v7 = vpop.f32.mrb[47].mxu1 }
 0x1cf   :  { %v985_v10 = vadd.f32 %v984_v63, %v6442_v17  ;;  %v1098_v12 = vadd.f32 %v1097_v7, %v6448_v18 }
 0x1d0   :  { %v6506_v20 = vpack.c.bf16 %v983_v55, %v979_v57  ;;  %v6508_v35 = vpack.c.bf16 %v1096_v56, %v1092_v9 }
 0x1d1   :  { %v6510_v54 = vpack.c.bf16 %v985_v10, %v981_v1  ;;  %v6512_v14 = vpack.c.bf16 %v1098_v12, %v1094_v36 }
 0x1d2   :  { %7879 = vst [vmem:[#allocation60_spill] sm:$0xff] %v6506_v20  ;;  %7880 = vst [vmem:[#allocation61_spill] sm:$0xff] %v6508_v35  ;;  %v6692_v20 = vld [vmem:[#allocation14 + $0xe4] ss:$16 sps:$4 sm:$0xff]  }
 0x1d3   :  { %7881 = vst [vmem:[#allocation62_spill] sm:$0xff] %v6510_v54  ;;  %7882 = vst [vmem:[#allocation63_spill] sm:$0xff] %v6512_v14  ;;  %v988_v0 = vpop.f32.mrb[48].mxu0  ;;  %v1101_v43 = vpop.f32.mrb[48].mxu1  ;;  %v6652_v14 = vld [vmem:[#allocation14 + $0x84] ss:$16 sps:$4 sm:$0xff]  }
 0x1d4   :  { %v989_v45 = vadd.f32 %v988_v0, %v6430_v3  ;;  %v990_v42 = vpop.f32.mrb[49].mxu0  ;;  %v1102_v62 = vadd.f32 %v1101_v43, %v6436_v5  ;;  %v1103_v41 = vpop.f32.mrb[49].mxu1  ;;  %v6689_v54 = vld [vmem:[#allocation14 + $0xc8] ss:$16 sps:$4 sm:$0xff]  }
 0x1d5   :  { %v991_v63 = vadd.f32 %v990_v42, %v6442_v17  ;;  %v992_v21 = vpop.f32.mrb[50].mxu0  ;;  %v1104_v57 = vadd.f32 %v1103_v41, %v6448_v18  ;;  %v1105_v55 = vpop.f32.mrb[50].mxu1 }
 0x1d6   :  { %v993_v9 = vadd.f32 %v992_v21, %v6430_v3  ;;  %v994_v1 = vpop.f32.mrb[51].mxu0  ;;  %v1106_v36 = vadd.f32 %v1105_v55, %v6436_v5  ;;  %v1107_v56 = vpop.f32.mrb[51].mxu1 }
 0x1d7   :  { %v995_v7 = vadd.f32 %v994_v1, %v6442_v17  ;;  %v1108_v10 = vadd.f32 %v1107_v56, %v6448_v18 }
 0x1d8   :  { %v6522_v12 = vpack.c.bf16 %v993_v9, %v989_v45  ;;  %v6524_v43 = vpack.c.bf16 %v1106_v36, %v1102_v62 }
 0x1d9   :  { %v6526_v0 = vpack.c.bf16 %v995_v7, %v991_v63  ;;  %v6528_v42 = vpack.c.bf16 %v1108_v10, %v1104_v57 }
 0x1da   :  { %7883 = vst [vmem:[#allocation64_spill] sm:$0xff] %v6522_v12  ;;  %7884 = vst [vmem:[#allocation65_spill] sm:$0xff] %v6524_v43  ;;  %v6708_v12 = vld [vmem:[#allocation12 + $0x4] ss:$16 sps:$4 sm:$0xff]  }
 0x1db   :  { %7885 = vst [vmem:[#allocation66_spill] sm:$0xff] %v6526_v0  ;;  %7886 = vst [vmem:[#allocation67_spill] sm:$0xff] %v6528_v42  ;;  %v998_v41 = vpop.f32.mrb[52].mxu0  ;;  %v1111_v19 = vpop.f32.mrb[52].mxu1  ;;  %v6701_v42 = vld [vmem:[#allocation14 + $0xe8] ss:$16 sps:$4 sm:$0xff]  }
 0x1dc   :  { %v999_v21 = vadd.f32 %v998_v41, %v6430_v3  ;;  %v1000_v4 = vpop.f32.mrb[53].mxu0  ;;  %v1112_v55 = vadd.f32 %v1111_v19, %v6436_v5  ;;  %v1113_v2 = vpop.f32.mrb[53].mxu1  ;;  %7895 = vst [vmem:[#allocation75_spill] sm:$0xff] %v6701_v42  ;;  %7898 = vst [vmem:[#allocation78_spill] sm:$0xff] %v6708_v12 }
 0x1dd   :  { %v1001_v1 = vadd.f32 %v1000_v4, %v6442_v17  ;;  %v1002_v8 = vpop.f32.mrb[54].mxu0  ;;  %v1114_v45 = vadd.f32 %v1113_v2, %v6448_v18  ;;  %v1115_v9 = vpop.f32.mrb[54].mxu1 }
 0x1de   :  { %v1003_v62 = vadd.f32 %v1002_v8, %v6430_v3  ;;  %v1004_v63 = vpop.f32.mrb[55].mxu0  ;;  %v1116_v57 = vadd.f32 %v1115_v9, %v6436_v5  ;;  %v1117_v36 = vpop.f32.mrb[55].mxu1 }
 0x1df   :  { %v1005_v56 = vadd.f32 %v1004_v63, %v6442_v17  ;;  %v1118_v7 = vadd.f32 %v1117_v36, %v6448_v18 }
 0x1e0   :  { %v6538_v10 = vpack.c.bf16 %v1003_v62, %v999_v21  ;;  %v6540_v19 = vpack.c.bf16 %v1116_v57, %v1112_v55 }
 0x1e1   :  { %v6542_v41 = vpack.c.bf16 %v1005_v56, %v1001_v1  ;;  %v6544_v4 = vpack.c.bf16 %v1118_v7, %v1114_v45 }
 0x1e2   :  { %7887 = vst [vmem:[#allocation68_spill] sm:$0xff] %v6538_v10  ;;  %7888 = vst [vmem:[#allocation69_spill] sm:$0xff] %v6540_v19  ;;  %v6757_v19 = vld [vmem:[#allocation12 + $0x68] ss:$16 sps:$4 sm:$0xff]   ;;  %v6760_v10 = vld [vmem:[#allocation12 + $0x84] ss:$16 sps:$4 sm:$0xff]  }
 0x1e3   :  { %7889 = vst [vmem:[#allocation70_spill] sm:$0xff] %v6542_v41  ;;  %7890 = vst [vmem:[#allocation71_spill] sm:$0xff] %v6544_v4  ;;  %v1008_v2 = vpop.f32.mrb[56].mxu0  ;;  %v1121_v34 = vpop.f32.mrb[56].mxu1  ;;  %v6751_v4 = vld [vmem:[#allocation12 + $0x6c] ss:$16 sps:$4 sm:$0xff]  }
 0x1e4   :  { %v1009_v8 = vadd.f32 %v1008_v2, %v6430_v3  ;;  %v1010_v33 = vpop.f32.mrb[57].mxu0  ;;  %v1122_v9 = vadd.f32 %v1121_v34, %v6436_v5  ;;  %v1123_v32 = vpop.f32.mrb[57].mxu1  ;;  %7911 = vst [vmem:[#allocation91_spill] sm:$0xff] %v6751_v4  ;;  %v6754_v41 = vld [vmem:[#allocation12 + $0x60] ss:$16 sps:$4 sm:$0xff]   ;;  %7913 = vst [vmem:[#allocation93_spill] sm:$0xff] %v6757_v19 }
 0x1e5   :  { %v1011_v63 = vadd.f32 %v1010_v33, %v6442_v17  ;;  %v1012_v30 = vpop.f32.mrb[58].mxu0  ;;  %v1124_v21 = vadd.f32 %v1123_v32, %v6448_v18  ;;  %v1125_v62 = vpop.f32.mrb[58].mxu1  ;;  %7912 = vst [vmem:[#allocation92_spill] sm:$0xff] %v6754_v41  ;;  %7914 = vst [vmem:[#allocation94_spill] sm:$0xff] %v6760_v10 }
 0x1e6   :  { %v1013_v55 = vadd.f32 %v1012_v30, %v6430_v3  ;;  %v1014_v1 = vpop.f32.mrb[59].mxu0  ;;  %v1126_v45 = vadd.f32 %v1125_v62, %v6436_v5  ;;  %v1127_v57 = vpop.f32.mrb[59].mxu1 }
 0x1e7   :  { %v1015_v36 = vadd.f32 %v1014_v1, %v6442_v17  ;;  %v1128_v56 = vadd.f32 %v1127_v57, %v6448_v18 }
 0x1e8   :  { %v6554_v7 = vpack.c.bf16 %v1013_v55, %v1009_v8  ;;  %v6556_v34 = vpack.c.bf16 %v1126_v45, %v1122_v9 }
 0x1e9   :  { %v6558_v2 = vpack.c.bf16 %v1015_v36, %v1011_v63  ;;  %v6560_v33 = vpack.c.bf16 %v1128_v56, %v1124_v21 }
 0x1eb   :  { %v1018_v32 = vpop.f32.mrb[60].mxu0  ;;  %v1131_v29 = vpop.f32.mrb[60].mxu1 }
 0x1ec   :  { %v1020_v28 = vpop.f32.mrb[61].mxu0  ;;  %v1132_v30 = vadd.f32 %v1131_v29, %v6436_v5  ;;  %v1133_v27 = vpop.f32.mrb[61].mxu1  ;;  %v1019_v57 = vadd.f32 %v1018_v32, %v6430_v3  ;;  %v1278_v32 = vunpack.c.l.bf16 %v6313_v38 }
 0x1ed   :  { %v1022_v62 = vpop.f32.mrb[62].mxu0  ;;  %v1134_v13 = vadd.f32 %v1133_v27, %v6448_v18  ;;  %v1135_v1 = vpop.f32.mrb[62].mxu1  ;;  %v1021_v21 = vadd.f32 %v1020_v28, %v6442_v17  ;;  %v1277_v28 = vunpack.c.l.bf16 %v6315_v39 }
 0x1ee   :  { %v1023_v8 = vadd.f32 %v1022_v62, %v6430_v3  ;;  %v1024_v9 = vpop.f32.mrb[63].mxu0  ;;  %v1136_v63 = vadd.f32 %v1135_v1, %v6436_v5  ;;  %v1137_v55 = vpop.f32.mrb[63].mxu1  ;;  %v1276_v3 = vunpack.c.l.bf16 %v6311_v37 }
 0x1ef   :  { %v1025_v45 = vadd.f32 %v1024_v9, %v6442_v17  ;;  %v1138_v36 = vadd.f32 %v1137_v55, %v6448_v18  ;;  %v1279_v17 = vunpack.c.l.bf16 %v6317_v40  ;;  %v1282_v9 = vunpack.c.h.bf16 %v6313_v38 }
 0x1f0   :  { %v6570_v29 = vpack.c.bf16 %v1023_v8, %v1019_v57  ;;  %v6572_v56 = vpack.c.bf16 %v1136_v63, %v1132_v30  ;;  %v1280_v30 = vunpack.c.h.bf16 %v6311_v37 }
 0x1f1   :  { %v6574_v27 = vpack.c.bf16 %v1025_v45, %v1021_v21  ;;  %v6576_v16 = vpack.c.bf16 %v1138_v36, %v1134_v13  ;;  %v1281_v45 = vunpack.c.h.bf16 %v6315_v39  ;;  %v1283_v36 = vunpack.c.h.bf16 %v6317_v40 }
 0x1f3   :  { %v1478_v5 = vpop.f32.mrb[64].mxu0  ;;  %v1521_v62 = vpop.f32.mrb[64].mxu1 }
 0x1f4   :  { %v1530_v1 = vadd.f32 %v1478_v5, %v1276_v3  ;;  %v1532_v18 = vadd.f32 %v1521_v62, %v1278_v32  ;;  %v1480_v57 = vpop.f32.mrb[65].mxu0  ;;  %v1523_v8 = vpop.f32.mrb[65].mxu1 }
 0x1f5   :  { %v1531_v13 = vadd.f32 %v1480_v57, %v1277_v28  ;;  %v1533_v63 = vadd.f32 %v1523_v8, %v1279_v17  ;;  %v1482_v55 = vpop.f32.mrb[66].mxu0  ;;  %v1525_v21 = vpop.f32.mrb[66].mxu1 }
 0x1f6   :  { %v4501_v31 = vmul.f32 -1.442695, %v1530_v1  ;;  %v1534_v22 = vadd.f32 %v1482_v55, %v1280_v30  ;;  %v1536_v53 = vadd.f32 %v1525_v21, %v1282_v9  ;;  %v1484_v52 = vpop.f32.mrb[67].mxu0  ;;  %v1527_v3 = vpop.f32.mrb[67].mxu1  ;;  %v4503_v38 = vmul.f32 -1.442695, %v1532_v18 }
 0x1f7   :  { %v4502_v32 = vmul.f32 -1.442695, %v1531_v13  ;;  %v1535_v5 = vadd.f32 %v1484_v52, %v1281_v45  ;;  %v1537_v62 = vadd.f32 %v1527_v3, %v1283_v36  ;;  %v1591_v55 = vunpack.c.l.bf16 %v6570_v29 }
 0x1f8   :  { %5017 = vpow2.f32 %v4501_v31  ;;  %v4504_v37 = vmul.f32 -1.442695, %v1534_v22  ;;  %v4506_v28 = vmul.f32 -1.442695, %v1536_v53  ;;  %v1593_v3 = vunpack.c.l.bf16 %v6572_v56 }
 0x1f9   :  { %v4505_v47 = vmul.f32 -1.442695, %v1535_v5  ;;  %5019 = vpow2.f32 %v4502_v32  ;;  %v1595_v32 = vunpack.c.h.bf16 %v6570_v29 }
 0x1fa   :  { %5021 = vpow2.f32 %v4504_v37 }
 0x1fb   :  { %5023 = vpow2.f32 %v4505_v47 }
 0x1fc   :  { %5025 = vtanh.f32 %v1533_v63 }
 0x1fd   :  { %5027 = vpow2.f32 %v4503_v38  ;;  %v1592_v38 = vunpack.c.l.bf16 %v6574_v27 }
 0x1fe   :  { %5029 = vpow2.f32 %v4506_v28  ;;  %v1594_v28 = vunpack.c.l.bf16 %v6576_v16 }
 0x202   :  { %v5018_v17 = vpop.eup %5017 }
 0x203   :  { %v1556_v39 = vadd.f32 1.0, %v5018_v17  ;;  %v5020_v40 = vpop.eup %5019  ;;  %v1597_v17 = vunpack.c.h.bf16 %v6572_v56  ;;  %v1598_v56 = vunpack.c.h.bf16 %v6576_v16 }
 0x204   :  { %v5022_v1 = vpop.eup %5021  ;;  %v1557_v57 = vadd.f32 1.0, %v5020_v40 }
 0x205   :  { %5031 = vrcp.f32 %v1556_v39  ;;  %v1559_v8 = vadd.f32 1.0, %v5022_v1  ;;  %v5024_v52 = vpop.eup %5023 }
 0x206   :  { %5033 = vtanh.f32 %v1537_v62  ;;  %v1560_v22 = vadd.f32 1.0, %v5024_v52  ;;  %v5026_v31 = vpop.eup %5025 }
 0x207   :  { %5035 = vrcp.f32 %v1557_v57  ;;  %v5028_v47 = vpop.eup %5027 }
 0x208   :  { %5037 = vrcp.f32 %v1559_v8  ;;  %v5030_v18 = vpop.eup %5029  ;;  %v1558_v63 = vadd.f32 1.0, %v5028_v47 }
 0x209   :  { %5039 = vrcp.f32 %v1560_v22  ;;  %v1561_v36 = vadd.f32 1.0, %v5030_v18  ;;  %v1596_v22 = vunpack.c.h.bf16 %v6574_v27 }
 0x20a   :  { %5041 = vrcp.f32 %v1558_v63 }
 0x20b   :  { %5043 = vrcp.f32 %v1561_v36 }
 0x20f   :  { %v5032_v53 = vpop.eup %5031 }
 0x210   :  { %v5034_v30 = vpop.eup %5033  ;;  %v1578_v9 = vmul.f32 %v5032_v53, %v5026_v31 }
 0x211   :  { %v5036_v13 = vpop.eup %5035 }
 0x212   :  { %v5038_v21 = vpop.eup %5037  ;;  %v1576_v45 = vmul.f32 0.0, %v5036_v13 }
 0x213   :  { %v1579_v5 = vmul.f32 %v5038_v21, %v5034_v30  ;;  %v1793_v62 = vpop.f32.mrb[68].mxu0  ;;  %v1836_v37 = vpop.f32.mrb[68].mxu1 }
 0x214   :  { %v5040_v39 = vpop.eup %5039  ;;  %v6592_v40 = vadd.f32 %v1578_v9, %v1576_v45  ;;  %v1845_v1 = vadd.f32 %v1793_v62, %v1591_v55  ;;  %v1847_v57 = vadd.f32 %v1836_v37, %v1593_v3  ;;  %v1795_v8 = vpop.f32.mrb[69].mxu0 }
 0x215   :  { %v1838_v52 = vpop.f32.mrb[69].mxu1  ;;  %v1577_v29 = vmul.f32 0.0, %v5040_v39  ;;  %v1846_v31 = vadd.f32 %v1795_v8, %v1592_v38  ;;  %v1797_v18 = vpop.f32.mrb[70].mxu0 }
 0x216   :  { %v1848_v47 = vadd.f32 %v1838_v52, %v1594_v28  ;;  %v1840_v53 = vpop.f32.mrb[70].mxu1  ;;  %v4539_v30 = vmul.f32 -1.442695, %v1845_v1  ;;  %v1849_v13 = vadd.f32 %v1797_v18, %v1595_v32  ;;  %v1799_v21 = vpop.f32.mrb[71].mxu0  ;;  %5045 = vtanh.f32 %v6592_v40 }
 0x217   :  { %v1842_v9 = vpop.f32.mrb[71].mxu1  ;;  %v6597_v55 = vadd.f32 %v1579_v5, %v1577_v29  ;;  %v4540_v45 = vmul.f32 -1.442695, %v1846_v31  ;;  %v1851_v3 = vadd.f32 %v1840_v53, %v1597_v17  ;;  %v1850_v63 = vadd.f32 %v1799_v21, %v1596_v22  ;;  %v5042_v36 = vpop.eup %5041  ;;  %v6606_v53 = vld [vmem:[#allocation14] ss:$16 sps:$4 sm:$0xff]  }
 0x218   :  { %5047 = vpow2.f32 %v4539_v30  ;;  %v4542_v27 = vmul.f32 -1.442695, %v1849_v13  ;;  %v1852_v62 = vadd.f32 %v1842_v9, %v1598_v56  ;;  %v5044_v32 = vpop.eup %5043  ;;  %v4541_v16 = vmul.f32 -1.442695, %v1847_v57  ;;  %v6609_v30 = vld [vmem:[#allocation14 + $0x8] ss:$16 sps:$4 sm:$0xff]  }
 0x219   :  { %5049 = vtanh.f32 %v6597_v55  ;;  %v4543_v37 = vmul.f32 -1.442695, %v1850_v63  ;;  %v4544_v39 = vmul.f32 -1.442695, %v1851_v3  ;;  %v6612_v13 = vld [vmem:[#allocation14 + $0x24] ss:$16 sps:$4 sm:$0xff]  }
 0x21a   :  { %5051 = vpow2.f32 %v4540_v45  ;;  %v6615_v21 = vld [vmem:[#allocation14 + $0x2c] ss:$16 sps:$4 sm:$0xff]   ;;  %v7893_v56 = vmov 0   ;;  %v6620_v45 = vld [vmem:[#allocation14 + $0x20] ss:$16 sps:$4 sm:$0xff]  }
 0x21b   :  { %5053 = vpow2.f32 %v4542_v27  ;;  %v6623_v3 = vld [vmem:[#allocation14 + $0x28] ss:$16 sps:$4 sm:$0xff]   ;;  %v6626_v63 = vld [vmem:[#allocation14 + $0x44] ss:$16 sps:$4 sm:$0xff]  }
 0x21c   :  { %5055 = vpow2.f32 %v4543_v37 }
 0x21d   :  { %5057 = vtanh.f32 %v1848_v47 }
 0x21e   :  { %5059 = vpow2.f32 %v4541_v16 }
 0x220   :  { %v5046_v38 = vpop.eup %5045 }
 0x221   :  { %v6600_v17 = vmul.f32 %v5046_v38, %v5042_v36  ;;  %v6632_v38 = vld [vmem:[#allocation14 + $0x40] ss:$16 sps:$4 sm:$0xff]  }
 0x222   :  { %v5048_v28 = vpop.eup %5047 }
 0x223   :  { %v5050_v5 = vpop.eup %5049  ;;  %v1871_v1 = vadd.f32 1.0, %v5048_v28  ;;  %7891 = vst [vmem:[#allocation72_spill] sm:$0xff] %v6600_v17  ;;  %v6635_v28 = vld [vmem:[#allocation14 + $0x48] ss:$16 sps:$4 sm:$0xff]  }
 0x224   :  { %v6602_v8 = vmul.f32 %v5050_v5, %v5044_v32  ;;  %v5052_v52 = vpop.eup %5051  ;;  %v6638_v5 = vld [vmem:[#allocation14 + $0x64] ss:$16 sps:$4 sm:$0xff]  }
 0x225   :  { %5061 = vrcp.f32 %v1871_v1  ;;  %v5054_v22 = vpop.eup %5053  ;;  %v1872_v29 = vadd.f32 1.0, %v5052_v52  ;;  %v6641_v1 = vld [vmem:[#allocation14 + $0x6c] ss:$16 sps:$4 sm:$0xff]  }
 0x226   :  { %7892 = vst [vmem:[#allocation73_spill] sm:$0xff] %v6602_v8  ;;  %5063 = vpow2.f32 %v4544_v39  ;;  %v1913_v31 = vpack.c.bf16 %v6602_v8, %v6600_v17  ;;  %v1874_v57 = vadd.f32 1.0, %v5054_v22  ;;  %v5056_v18 = vpop.eup %5055  ;;  %v6745_v8 = vld [vmem:[#allocation12 + $0x48] ss:$16 sps:$4 sm:$0xff]   ;;  %v6748_v17 = vld [vmem:[#allocation12 + $0x64] ss:$16 sps:$4 sm:$0xff]  }
 0x227   :  { %5065 = vtanh.f32 %v1852_v62  ;;  %v1875_v47 = vadd.f32 1.0, %v5056_v18  ;;  %v5058_v9 = vpop.eup %5057  ;;  %v6629_v62 = vld [vmem:[#allocation14 + $0x4c] ss:$16 sps:$4 sm:$0xff]   ;;  %7909 = vst [vmem:[#allocation89_spill] sm:$0xff] %v6745_v8  ;;  %7910 = vst [vmem:[#allocation90_spill] sm:$0xff] %v6748_v17 }
 0x228   :  { %5067 = vrcp.f32 %v1872_v29  ;;  %1961 = vmatmul.mubr.bf16.vlgmr.msra.gmra.mrb[72].mxu0 %v1913_v31  ;;  %2004 = vmatmul.mubr.bf16.vlgmr.msra.gmra.mrb[72].mxu1 %v1913_v31  ;;  %v5060_v27 = vpop.eup %5059 }
 0x229   :  { %5069 = vrcp.f32 %v1874_v57  ;;  %2084 = vmatpush1.bf16.msra.mxu0 %v6606_v53  ;;  %2127 = vmatpush1.bf16.msra.mxu1 %v6609_v30  ;;  %v1873_v22 = vadd.f32 1.0, %v5060_v27  ;;  %v6655_v27 = vld [vmem:[#allocation14 + $0x8c] ss:$16 sps:$4 sm:$0xff]  }
 0x22a   :  { %2085 = vmatprep.subr.bf16.mxu0 %v6612_v13  ;;  %2128 = vmatprep.subr.bf16.mxu1 %v6615_v21  ;;  %5071 = vrcp.f32 %v1875_v47 }
 0x22b   :  { %2115 = vmatprep.mubr.bf16.mxu0 %v7893_v56  ;;  %2158 = vmatprep.mubr.bf16.mxu1 %v7893_v56  ;;  %5073 = vrcp.f32 %v1873_v22  ;;  %v6677_v22 = vld [vmem:[#allocation14 + $0xa8] ss:$16 sps:$4 sm:$0xff]  }
 0x22d   :  { %2086 = vmatpush1.bf16.msra.mxu0 %v6620_v45  ;;  %2129 = vmatpush1.bf16.msra.mxu1 %v6623_v3 }
 0x22e   :  { %2087 = vmatprep.subr.bf16.mxu0 %v6626_v63  ;;  %2130 = vmatprep.subr.bf16.mxu1 %v6629_v62 }
 0x22f   :  { %v5062_v37 = vpop.eup %5061 }
 0x230   :  { %v5064_v36 = vpop.eup %5063  ;;  %v1893_v32 = vmul.f32 %v5062_v37, %v5058_v9  ;;  %v6646_v9 = vld [vmem:[#allocation14 + $0x60] ss:$16 sps:$4 sm:$0xff]   ;;  %v6649_v37 = vld [vmem:[#allocation14 + $0x68] ss:$16 sps:$4 sm:$0xff]  }
 0x231   :  { %v5066_v16 = vpop.eup %5065  ;;  %2088 = vmatpush1.bf16.msra.mxu0 %v6632_v38  ;;  %2131 = vmatpush1.bf16.msra.mxu1 %v6635_v28  ;;  %v1876_v47 = vadd.f32 1.0, %v5064_v36 }
 0x232   :  { %v5068_v39 = vpop.eup %5067  ;;  %2089 = vmatprep.subr.bf16.mxu0 %v6638_v5  ;;  %2132 = vmatprep.subr.bf16.mxu1 %v6641_v1 }
 0x233   :  { %v5070_v52 = vpop.eup %5069  ;;  %v1891_v29 = vmul.f32 0.0, %v5068_v39  ;;  %v6668_v39 = vld [vmem:[#allocation14 + $0xa4] ss:$16 sps:$4 sm:$0xff]  }
 0x234   :  { %v1894_v31 = vmul.f32 %v5070_v52, %v5066_v16  ;;  %v5072_v57 = vpop.eup %5071  ;;  %v6664_v16 = vld [vmem:[#allocation14 + $0x88] ss:$16 sps:$4 sm:$0xff]   ;;  %v6671_v52 = vld [vmem:[#allocation14 + $0xac] ss:$16 sps:$4 sm:$0xff]  }
 0x235   :  { %v6644_v18 = vadd.f32 %v1893_v32, %v1891_v29  ;;  %2090 = vmatpush1.bf16.msra.mxu0 %v6646_v9  ;;  %2133 = vmatpush1.bf16.msra.mxu1 %v6649_v37  ;;  %v1892_v46 = vmul.f32 0.0, %v5072_v57  ;;  %v6661_v32 = vld [vmem:[#allocation14 + $0x80] ss:$16 sps:$4 sm:$0xff]   ;;  %v6680_v29 = vld [vmem:[#allocation14 + $0xc4] ss:$16 sps:$4 sm:$0xff]   ;;  %v5074_v57 = vpop.eup %5073 }
 0x236   :  { %2091 = vmatprep.subr.bf16.mxu0 %v6652_v14  ;;  %2134 = vmatprep.subr.bf16.mxu1 %v6655_v27 }
 0x237   :  { %5075 = vtanh.f32 %v6644_v18  ;;  %v6659_v36 = vadd.f32 %v1894_v31, %v1892_v46  ;;  %v6674_v46 = vld [vmem:[#allocation14 + $0xa0] ss:$16 sps:$4 sm:$0xff]   ;;  %v6683_v31 = vld [vmem:[#allocation14 + $0xcc] ss:$16 sps:$4 sm:$0xff]  }
 0x238   :  { %5077 = vrcp.f32 %v1876_v47  ;;  %v6686_v47 = vld [vmem:[#allocation14 + $0xc0] ss:$16 sps:$4 sm:$0xff]  }
 0x239   :  { %2092 = vmatpush1.bf16.msra.mxu0 %v6661_v32  ;;  %2135 = vmatpush1.bf16.msra.mxu1 %v6664_v16  ;;  %5079 = vtanh.f32 %v6659_v36 }
 0x23a   :  { %2093 = vmatprep.subr.bf16.mxu0 %v6668_v39  ;;  %2136 = vmatprep.subr.bf16.mxu1 %v6671_v52 }
 0x23d   :  { %2094 = vmatpush1.bf16.msra.mxu0 %v6674_v46  ;;  %2137 = vmatpush1.bf16.msra.mxu1 %v6677_v22 }
 0x23e   :  { %2095 = vmatprep.subr.bf16.mxu0 %v6680_v29  ;;  %2138 = vmatprep.subr.bf16.mxu1 %v6683_v31 }
 0x241   :  { %2096 = vmatpush1.bf16.msra.mxu0 %v6686_v47  ;;  %2139 = vmatpush1.bf16.msra.mxu1 %v6689_v54  ;;  %v5076_v35 = vpop.eup %5075 }
 0x242   :  { %2097 = vmatprep.subr.bf16.mxu0 %v6692_v20  ;;  %2140 = vmatprep.subr.bf16.mxu1 %v6695_v15  ;;  %v5078_v6 = vpop.eup %5077  ;;  %v6704_v0 = vmul.f32 %v5076_v35, %v5074_v57  ;;  %v6719_v35 = vld [vmem:[#allocation12 + $0x8] ss:$16 sps:$4 sm:$0xff]  }
 0x243   :  { %v5080_v44 = vpop.eup %5079  ;;  %7901 = vst [vmem:[#allocation81_spill] sm:$0xff] %v6719_v35  ;;  %v6733_v57 = vld [vmem:[#allocation12 + $0x28] ss:$16 sps:$4 sm:$0xff]  }
 0x244   :  { %7896 = vst [vmem:[#allocation76_spill] sm:$0xff] %v6704_v0  ;;  %v6706_v43 = vmul.f32 %v5080_v44, %v5078_v6  ;;  %v6722_v44 = vld [vmem:[#allocation12 + $0x24] ss:$16 sps:$4 sm:$0xff]   ;;  %v6725_v6 = vld [vmem:[#allocation12 + $0x2c] ss:$16 sps:$4 sm:$0xff]   ;;  %7905 = vst [vmem:[#allocation85_spill] sm:$0xff] %v6733_v57 }
 0x245   :  { %2098 = vmatpush1.bf16.msra.mxu0 %v6698_v11  ;;  %2141 = vmatpush1.bf16.msra.mxu1 %v6701_v42  ;;  %7902 = vst [vmem:[#allocation82_spill] sm:$0xff] %v6722_v44  ;;  %7903 = vst [vmem:[#allocation83_spill] sm:$0xff] %v6725_v6 }
 0x246   :  { %7897 = vst [vmem:[#allocation77_spill] sm:$0xff] %v6706_v43  ;;  %2252 = vmatprep.subr.bf16.mxu0 %v6708_v12  ;;  %2295 = vmatprep.subr.bf16.mxu1 %v6711_v51  ;;  %v1914_v50 = vpack.c.bf16 %v6706_v43, %v6704_v0  ;;  %v6739_v43 = vld [vmem:[#allocation12 + $0x4c] ss:$16 sps:$4 sm:$0xff]   ;;  %v6742_v0 = vld [vmem:[#allocation12 + $0x40] ss:$16 sps:$4 sm:$0xff]  }
 0x247   :  { %7907 = vst [vmem:[#allocation87_spill] sm:$0xff] %v6739_v43  ;;  %7908 = vst [vmem:[#allocation88_spill] sm:$0xff] %v6742_v0 }
 0x248   :  { %2116 = vmatmul.mubr.bf16.vlgmr.msra.gmra.mrb[76].mxu0 %v1914_v50  ;;  %2159 = vmatmul.mubr.bf16.vlgmr.msra.gmra.mrb[76].mxu1 %v1914_v50  ;;  %v6730_v50 = vld [vmem:[#allocation12 + $0x20] ss:$16 sps:$4 sm:$0xff]  }
 0x249   :  { %2253 = vmatpush1.bf16.msra.mxu0 %v6716_v49  ;;  %2296 = vmatpush1.bf16.msra.mxu1 %v6719_v35  ;;  %7904 = vst [vmem:[#allocation84_spill] sm:$0xff] %v6730_v50  ;;  %v1927_v35 = vunpack.c.h.bf16 %v6333_v61 }
 0x24a   :  { %2254 = vmatprep.subr.bf16.mxu0 %v6722_v44  ;;  %2297 = vmatprep.subr.bf16.mxu1 %v6725_v6  ;;  %v1925_v44 = vunpack.c.h.bf16 %v6331_v60 }
 0x24b   :  { %2284 = vmatprep.mubr.bf16.mxu0 %v7893_v56  ;;  %2327 = vmatprep.mubr.bf16.mxu1 %v7893_v56 }
 0x24d   :  { %2255 = vmatpush1.bf16.msra.mxu0 %v6730_v50  ;;  %2298 = vmatpush1.bf16.msra.mxu1 %v6733_v57 }
 0x24e   :  { %2256 = vmatprep.subr.bf16.mxu0 %v6736_v48  ;;  %2299 = vmatprep.subr.bf16.mxu1 %v6739_v43  ;;  %v1926_v48 = vunpack.c.h.bf16 %v6329_v59 }
 0x251   :  { %2257 = vmatpush1.bf16.msra.mxu0 %v6742_v0  ;;  %2300 = vmatpush1.bf16.msra.mxu1 %v6745_v8 }
 0x252   :  { %2258 = vmatprep.subr.bf16.mxu0 %v6748_v17  ;;  %2301 = vmatprep.subr.bf16.mxu1 %v6751_v4  ;;  %v1923_v17 = vunpack.c.l.bf16 %v6333_v61 }
 0x255   :  { %2259 = vmatpush1.bf16.msra.mxu0 %v6754_v41  ;;  %2302 = vmatpush1.bf16.msra.mxu1 %v6757_v19  ;;  %v6775_v19 = vld [vmem:[#allocation12 + $0xac] ss:$16 sps:$4 sm:$0xff]  }
 0x256   :  { %2260 = vmatprep.subr.bf16.mxu0 %v6760_v10  ;;  %2303 = vmatprep.subr.bf16.mxu1 %v6763_v26  ;;  %7919 = vst [vmem:[#allocation99_spill] sm:$0xff] %v6775_v19  ;;  %v6778_v10 = vld [vmem:[#allocation12 + $0xa0] ss:$16 sps:$4 sm:$0xff]   ;;  %v6781_v26 = vld [vmem:[#allocation12 + $0xa8] ss:$16 sps:$4 sm:$0xff]  }
 0x257   :  { %7920 = vst [vmem:[#allocation100_spill] sm:$0xff] %v6778_v10  ;;  %7921 = vst [vmem:[#allocation101_spill] sm:$0xff] %v6781_v26 }
 0x259   :  { %2261 = vmatpush1.bf16.msra.mxu0 %v6766_v25  ;;  %2304 = vmatpush1.bf16.msra.mxu1 %v6769_v24  ;;  %v6784_v25 = vld [vmem:[#allocation12 + $0xc4] ss:$16 sps:$4 sm:$0xff]   ;;  %v6787_v24 = vld [vmem:[#allocation12 + $0xcc] ss:$16 sps:$4 sm:$0xff]  }
 0x25a   :  { %2262 = vmatprep.subr.bf16.mxu0 %v6772_v23  ;;  %2305 = vmatprep.subr.bf16.mxu1 %v6775_v19  ;;  %7922 = vst [vmem:[#allocation102_spill] sm:$0xff] %v6784_v25  ;;  %7923 = vst [vmem:[#allocation103_spill] sm:$0xff] %v6787_v24  ;;  %v6790_v23 = vld [vmem:[#allocation12 + $0xc0] ss:$16 sps:$4 sm:$0xff]   ;;  %v6793_v19 = vld [vmem:[#allocation12 + $0xc8] ss:$16 sps:$4 sm:$0xff]  }
 0x25b   :  { %7924 = vst [vmem:[#allocation104_spill] sm:$0xff] %v6790_v23  ;;  %7925 = vst [vmem:[#allocation105_spill] sm:$0xff] %v6793_v19 }
 0x25d   :  { %2263 = vmatpush1.bf16.msra.mxu0 %v6778_v10  ;;  %2306 = vmatpush1.bf16.msra.mxu1 %v6781_v26  ;;  %v6796_v10 = vld [vmem:[#allocation12 + $0xe4] ss:$16 sps:$4 sm:$0xff]   ;;  %v6799_v26 = vld [vmem:[#allocation12 + $0xec] ss:$16 sps:$4 sm:$0xff]  }
 0x25e   :  { %2264 = vmatprep.subr.bf16.mxu0 %v6784_v25  ;;  %2307 = vmatprep.subr.bf16.mxu1 %v6787_v24  ;;  %7926 = vst [vmem:[#allocation106_spill] sm:$0xff] %v6796_v10  ;;  %7927 = vst [vmem:[#allocation107_spill] sm:$0xff] %v6799_v26  ;;  %v6802_v25 = vld [vmem:[#allocation12 + $0xe0] ss:$16 sps:$4 sm:$0xff]   ;;  %v6805_v24 = vld [vmem:[#allocation12 + $0xe8] ss:$16 sps:$4 sm:$0xff]  }
 0x25f   :  { %7928 = vst [vmem:[#allocation108_spill] sm:$0xff] %v6802_v25  ;;  %7929 = vst [vmem:[#allocation109_spill] sm:$0xff] %v6805_v24 }
 0x261   :  { %2265 = vmatpush1.bf16.msra.mxu0 %v6790_v23  ;;  %2308 = vmatpush1.bf16.msra.mxu1 %v6793_v19  ;;  %v6808_v23 = vld [vmem:[#allocation14 + $0x4] ss:$16 sps:$4 sm:$0xff]   ;;  %v6811_v19 = vld [vmem:[#allocation14 + $0xc] ss:$16 sps:$4 sm:$0xff]  }
 0x262   :  { %2266 = vmatprep.subr.bf16.mxu0 %v6796_v10  ;;  %2309 = vmatprep.subr.bf16.mxu1 %v6799_v26  ;;  %7930 = vst [vmem:[#allocation110_spill] sm:$0xff] %v6808_v23  ;;  %7931 = vst [vmem:[#allocation111_spill] sm:$0xff] %v6811_v19  ;;  %v1920_v10 = vunpack.c.l.bf16 %v6327_v58  ;;  %v1922_v26 = vunpack.c.l.bf16 %v6329_v59 }
 0x265   :  { %2267 = vmatpush1.bf16.msra.mxu0 %v6802_v25  ;;  %2310 = vmatpush1.bf16.msra.mxu1 %v6805_v24  ;;  %v1921_v25 = vunpack.c.l.bf16 %v6331_v60 }
 0x266   :  { %2407 = vmatprep.subr.bf16.mxu0 %v6808_v23  ;;  %2450 = vmatprep.subr.bf16.mxu1 %v6811_v19  ;;  %v1924_v23 = vunpack.c.h.bf16 %v6327_v58 }
 0x2fb   :  { %v1962_v41 = vpop.f32.mrb[72].mxu0  ;;  %v2005_v4 = vpop.f32.mrb[72].mxu1 }
 0x2fc   :  { %v2014_v8 = vadd.f32 %v1962_v41, %v1920_v10  ;;  %v2016_v24 = vadd.f32 %v2005_v4, %v1922_v26  ;;  %v1964_v0 = vpop.f32.mrb[73].mxu0  ;;  %v2007_v43 = vpop.f32.mrb[73].mxu1 }
 0x2fd   :  { %v2015_v57 = vadd.f32 %v1964_v0, %v1921_v25  ;;  %v2017_v19 = vadd.f32 %v2007_v43, %v1923_v17  ;;  %v1966_v50 = vpop.f32.mrb[74].mxu0  ;;  %v2009_v6 = vpop.f32.mrb[74].mxu1 }
 0x2fe   :  { %v4545_v49 = vmul.f32 -1.442695, %v2014_v8  ;;  %v2018_v51 = vadd.f32 %v1966_v50, %v1924_v23  ;;  %v2020_v12 = vadd.f32 %v2009_v6, %v1926_v48  ;;  %v1968_v42 = vpop.f32.mrb[75].mxu0  ;;  %v2011_v10 = vpop.f32.mrb[75].mxu1  ;;  %v4547_v59 = vmul.f32 -1.442695, %v2016_v24 }
 0x2ff   :  { %v4546_v26 = vmul.f32 -1.442695, %v2015_v57  ;;  %v2019_v41 = vadd.f32 %v1968_v42, %v1925_v44  ;;  %v2021_v4 = vadd.f32 %v2011_v10, %v1927_v35  ;;  %v2075_v50 = vunpack.c.l.bf16 %v6554_v7 }
 0x300   :  { %5081 = vpow2.f32 %v4545_v49  ;;  %v4548_v58 = vmul.f32 -1.442695, %v2018_v51  ;;  %v4550_v25 = vmul.f32 -1.442695, %v2020_v12  ;;  %v2077_v10 = vunpack.c.l.bf16 %v6556_v34 }
 0x301   :  { %v4549_v11 = vmul.f32 -1.442695, %v2019_v41  ;;  %5083 = vpow2.f32 %v4546_v26  ;;  %v2079_v26 = vunpack.c.h.bf16 %v6554_v7  ;;  %v2081_v41 = vunpack.c.h.bf16 %v6556_v34 }
 0x302   :  { %5085 = vpow2.f32 %v4548_v58  ;;  %v2080_v7 = vunpack.c.h.bf16 %v6558_v2 }
 0x303   :  { %5087 = vpow2.f32 %v4549_v11 }
 0x304   :  { %5089 = vtanh.f32 %v2017_v19 }
 0x305   :  { %5091 = vpow2.f32 %v4547_v59 }
 0x306   :  { %5093 = vpow2.f32 %v4550_v25 }
 0x30a   :  { %v5082_v43 = vpop.eup %5081 }
 0x30b   :  { %v2040_v60 = vadd.f32 1.0, %v5082_v43  ;;  %v5084_v61 = vpop.eup %5083 }
 0x30c   :  { %v5086_v23 = vpop.eup %5085  ;;  %v2041_v48 = vadd.f32 1.0, %v5084_v61  ;;  %v2078_v61 = vunpack.c.l.bf16 %v6560_v33 }
 0x30d   :  { %5095 = vrcp.f32 %v2040_v60  ;;  %v2043_v0 = vadd.f32 1.0, %v5086_v23  ;;  %v5088_v42 = vpop.eup %5087  ;;  %v2076_v60 = vunpack.c.l.bf16 %v6558_v2 }
 0x30e   :  { %5097 = vtanh.f32 %v2021_v4  ;;  %v2044_v49 = vadd.f32 1.0, %v5088_v42  ;;  %v5090_v51 = vpop.eup %5089 }
 0x30f   :  { %5099 = vrcp.f32 %v2041_v48  ;;  %v5092_v11 = vpop.eup %5091 }
 0x310   :  { %5101 = vrcp.f32 %v2043_v0  ;;  %v5094_v24 = vpop.eup %5093  ;;  %v2042_v44 = vadd.f32 1.0, %v5092_v11 }
 0x311   :  { %5103 = vrcp.f32 %v2044_v49  ;;  %v2045_v59 = vadd.f32 1.0, %v5094_v24  ;;  %v2082_v24 = vunpack.c.h.bf16 %v6560_v33 }
 0x312   :  { %5105 = vrcp.f32 %v2042_v44 }
 0x317   :  { %v5096_v12 = vpop.eup %5095 }
 0x318   :  { %v5098_v17 = vpop.eup %5097  ;;  %v2062_v19 = vmul.f32 %v5096_v12, %v5090_v51 }
 0x319   :  { %v5100_v8 = vpop.eup %5099 }
 0x31a   :  { %v5102_v35 = vpop.eup %5101  ;;  %v2060_v6 = vmul.f32 %v5100_v8, %v6592_v40 }
 0x31b   :  { %v2063_v57 = vmul.f32 %v5102_v35, %v5098_v17  ;;  %v5104_v4 = vpop.eup %5103  ;;  %v2117_v25 = vpop.f32.mrb[76].mxu0 }
 0x31c   :  { %v6827_v58 = vadd.f32 %v2062_v19, %v2060_v6  ;;  %v2160_v43 = vpop.f32.mrb[76].mxu1  ;;  %v2061_v40 = vmul.f32 %v5104_v4, %v6597_v55  ;;  %v2169_v23 = vadd.f32 %v2117_v25, %v2075_v50  ;;  %v2119_v0 = vpop.f32.mrb[77].mxu0 }
 0x31d   :  { %v2171_v48 = vadd.f32 %v2160_v43, %v2077_v10  ;;  %v2162_v42 = vpop.f32.mrb[77].mxu1  ;;  %v2170_v34 = vadd.f32 %v2119_v0, %v2076_v60  ;;  %v2121_v51 = vpop.f32.mrb[78].mxu0 }
 0x31e   :  { %v2172_v49 = vadd.f32 %v2162_v42, %v2078_v61  ;;  %v2164_v11 = vpop.f32.mrb[78].mxu1  ;;  %5107 = vtanh.f32 %v6827_v58  ;;  %v6835_v12 = vadd.f32 %v2063_v57, %v2061_v40  ;;  %v4551_v17 = vmul.f32 -1.442695, %v2169_v23  ;;  %v2123_v55 = vpop.f32.mrb[79].mxu0 }
 0x31f   :  { %v2173_v19 = vadd.f32 %v2121_v51, %v2079_v26  ;;  %v2166_v8 = vpop.f32.mrb[79].mxu1  ;;  %5109 = vrcp.f32 %v2045_v59  ;;  %v4552_v35 = vmul.f32 -1.442695, %v2170_v34  ;;  %v2175_v6 = vadd.f32 %v2164_v11, %v2081_v41  ;;  %v5106_v33 = vpop.eup %5105 }
 0x320   :  { %v2174_v50 = vadd.f32 %v2123_v55, %v2080_v7  ;;  %5111 = vtanh.f32 %v6835_v12  ;;  %v2176_v44 = vadd.f32 %v2166_v8, %v2082_v24  ;;  %v4553_v4 = vmul.f32 -1.442695, %v2171_v48 }
 0x321   :  { %v4554_v2 = vmul.f32 -1.442695, %v2173_v19  ;;  %5113 = vpow2.f32 %v4551_v17  ;;  %v4556_v26 = vmul.f32 -1.442695, %v2175_v6 }
 0x322   :  { %v4555_v10 = vmul.f32 -1.442695, %v2174_v50  ;;  %5115 = vpow2.f32 %v4552_v35 }
 0x323   :  { %5117 = vpow2.f32 %v4554_v2 }
 0x324   :  { %5119 = vpow2.f32 %v4555_v10 }
 0x325   :  { %5121 = vtanh.f32 %v2172_v49 }
 0x326   :  { %5123 = vpow2.f32 %v4553_v4 }
 0x327   :  { %5125 = vpow2.f32 %v4556_v26  ;;  %v7932_v26 = vld [vmem:[#allocation74_spill] sm:$0xff] }
 0x328   :  { %v5108_v57 = vpop.eup %5107 }
 0x329   :  { %v5110_v25 = vpop.eup %5109  ;;  %v6838_v59 = vmul.f32 %v5108_v57, %v5106_v33 }
 0x32a   :  { %v5112_v43 = vpop.eup %5111 }
 0x32b   :  { %v5114_v60 = vpop.eup %5113  ;;  %v6840_v41 = vmul.f32 %v5112_v43, %v5110_v25  ;;  %v7933_v43 = vld [vmem:[#allocation75_spill] sm:$0xff] }
 0x32c   :  { %v2195_v61 = vadd.f32 1.0, %v5114_v60  ;;  %v5116_v40 = vpop.eup %5115 }
 0x32d   :  { %v2237_v23 = vpack.c.bf16 %v6840_v41, %v6838_v59  ;;  %v5118_v0 = vpop.eup %5117  ;;  %v2196_v42 = vadd.f32 1.0, %v5116_v40  ;;  %v7935_v40 = vld [vmem:[#allocation78_spill] sm:$0xff] }
 0x32e   :  { %5127 = vrcp.f32 %v2195_v61  ;;  %v2198_v48 = vadd.f32 1.0, %v5118_v0  ;;  %v5120_v7 = vpop.eup %5119 }
 0x32f   :  { %5129 = vtanh.f32 %v2176_v44  ;;  %2285 = vmatmul.mubr.bf16.vlgmr.msra.gmra.mrb[80].mxu0 %v2237_v23  ;;  %2328 = vmatmul.mubr.bf16.vlgmr.msra.gmra.mrb[80].mxu1 %v2237_v23  ;;  %v2199_v34 = vadd.f32 1.0, %v5120_v7  ;;  %v5122_v49 = vpop.eup %5121  ;;  %v7936_v23 = vld [vmem:[#allocation79_spill] sm:$0xff]  ;;  %v7939_v7 = vld [vmem:[#allocation82_spill] sm:$0xff] }
 0x330   :  { %5131 = vrcp.f32 %v2196_v42  ;;  %2408 = vmatpush1.bf16.msra.mxu0 %v6606_v53  ;;  %2451 = vmatpush1.bf16.msra.mxu1 %v6609_v30  ;;  %v5124_v51 = vpop.eup %5123  ;;  %v7937_v42 = vld [vmem:[#allocation80_spill] sm:$0xff] }
 0x331   :  { %5133 = vrcp.f32 %v2198_v48  ;;  %2409 = vmatprep.subr.bf16.mxu0 %v6612_v13  ;;  %2452 = vmatprep.subr.bf16.mxu1 %v6615_v21  ;;  %v5126_v11 = vpop.eup %5125  ;;  %v2197_v35 = vadd.f32 1.0, %v5124_v51  ;;  %v7938_v48 = vld [vmem:[#allocation81_spill] sm:$0xff] }
 0x332   :  { %2439 = vmatprep.mubr.bf16.mxu0 %v7893_v56  ;;  %2482 = vmatprep.mubr.bf16.mxu1 %v7893_v56  ;;  %5135 = vrcp.f32 %v2199_v34  ;;  %v2200_v10 = vadd.f32 1.0, %v5126_v11  ;;  %v7940_v34 = vld [vmem:[#allocation83_spill] sm:$0xff]  ;;  %v7942_v51 = vld [vmem:[#allocation85_spill] sm:$0xff]  ;;  %v7943_v11 = vld [vmem:[#allocation86_spill] sm:$0xff] }
 0x333   :  { %5137 = vrcp.f32 %v2197_v35  ;;  %v7949_v35 = vld [vmem:[#allocation92_spill] sm:$0xff] }
 0x334   :  { %2410 = vmatpush1.bf16.msra.mxu0 %v6620_v45  ;;  %2453 = vmatpush1.bf16.msra.mxu1 %v6623_v3 }
 0x335   :  { %2411 = vmatprep.subr.bf16.mxu0 %v6626_v63  ;;  %2454 = vmatprep.subr.bf16.mxu1 %v6629_v62 }
 0x338   :  { %v5128_v24 = vpop.eup %5127  ;;  %2412 = vmatpush1.bf16.msra.mxu0 %v6632_v38  ;;  %2455 = vmatpush1.bf16.msra.mxu1 %v6635_v28 }
 0x339   :  { %v5130_v17 = vpop.eup %5129  ;;  %v2217_v19 = vmul.f32 %v5128_v24, %v5122_v49  ;;  %2413 = vmatprep.subr.bf16.mxu0 %v6638_v5  ;;  %2456 = vmatprep.subr.bf16.mxu1 %v6641_v1  ;;  %v7941_v49 = vld [vmem:[#allocation84_spill] sm:$0xff]  ;;  %v7944_v24 = vld [vmem:[#allocation87_spill] sm:$0xff] }
 0x33a   :  { %v5132_v55 = vpop.eup %5131 }
 0x33b   :  { %v5134_v8 = vpop.eup %5133  ;;  %v2215_v6 = vmul.f32 %v5132_v55, %v6644_v18  ;;  %v7947_v55 = vld [vmem:[#allocation90_spill] sm:$0xff] }
 0x33c   :  { %v2218_v50 = vmul.f32 %v5134_v8, %v5130_v17  ;;  %2414 = vmatpush1.bf16.msra.mxu0 %v6646_v9  ;;  %2457 = vmatpush1.bf16.msra.mxu1 %v6649_v37  ;;  %v5136_v2 = vpop.eup %5135  ;;  %v7945_v17 = vld [vmem:[#allocation88_spill] sm:$0xff]  ;;  %v7948_v8 = vld [vmem:[#allocation91_spill] sm:$0xff] }
 0x33d   :  { %v6861_v44 = vadd.f32 %v2217_v19, %v2215_v6  ;;  %2415 = vmatprep.subr.bf16.mxu0 %v6652_v14  ;;  %2458 = vmatprep.subr.bf16.mxu1 %v6655_v27  ;;  %v2216_v33 = vmul.f32 %v5136_v2, %v6659_v36  ;;  %v5138_v18 = vpop.eup %5137  ;;  %v7946_v19 = vld [vmem:[#allocation89_spill] sm:$0xff]  ;;  %v7952_v2 = vld [vmem:[#allocation95_spill] sm:$0xff] }
 0x33e   :  { %v7950_v6 = vld [vmem:[#allocation93_spill] sm:$0xff] }
 0x33f   :  { %5139 = vtanh.f32 %v6861_v44  ;;  %v6867_v57 = vadd.f32 %v2218_v50, %v2216_v33  ;;  %v7951_v50 = vld [vmem:[#allocation94_spill] sm:$0xff]  ;;  %v7954_v33 = vld [vmem:[#allocation97_spill] sm:$0xff] }
 0x340   :  { %2416 = vmatpush1.bf16.msra.mxu0 %v6661_v32  ;;  %2459 = vmatpush1.bf16.msra.mxu1 %v6664_v16  ;;  %5141 = vrcp.f32 %v2200_v10  ;;  %v7953_v10 = vld [vmem:[#allocation96_spill] sm:$0xff] }
 0x341   :  { %2417 = vmatprep.subr.bf16.mxu0 %v6668_v39  ;;  %2460 = vmatprep.subr.bf16.mxu1 %v6671_v52  ;;  %5143 = vtanh.f32 %v6867_v57 }
 0x344   :  { %2418 = vmatpush1.bf16.msra.mxu0 %v6674_v46  ;;  %2461 = vmatpush1.bf16.msra.mxu1 %v6677_v22 }
 0x345   :  { %2419 = vmatprep.subr.bf16.mxu0 %v6680_v29  ;;  %2462 = vmatprep.subr.bf16.mxu1 %v6683_v31 }
 0x348   :  { %2420 = vmatpush1.bf16.msra.mxu0 %v6686_v47  ;;  %2463 = vmatpush1.bf16.msra.mxu1 %v6689_v54 }
 0x349   :  { %2421 = vmatprep.subr.bf16.mxu0 %v6692_v20  ;;  %2464 = vmatprep.subr.bf16.mxu1 %v6695_v15  ;;  %v5140_v36 = vpop.eup %5139 }
 0x34a   :  { %v5142_v4 = vpop.eup %5141  ;;  %v6884_v60 = vmul.f32 %v5140_v36, %v5138_v18  ;;  %v7955_v18 = vld [vmem:[#allocation98_spill] sm:$0xff]  ;;  %v7956_v36 = vld [vmem:[#allocation99_spill] sm:$0xff] }
 0x34b   :  { %v5144_v25 = vpop.eup %5143 }
 0x34c   :  { %2422 = vmatpush1.bf16.msra.mxu0 %v7932_v26  ;;  %2465 = vmatpush1.bf16.msra.mxu1 %v7933_v43  ;;  %v6886_v61 = vmul.f32 %v5144_v25, %v5142_v4  ;;  %v7957_v4 = vld [vmem:[#allocation100_spill] sm:$0xff]  ;;  %v7958_v25 = vld [vmem:[#allocation101_spill] sm:$0xff] }
 0x34d   :  { %2576 = vmatprep.subr.bf16.mxu0 %v7935_v40  ;;  %2619 = vmatprep.subr.bf16.mxu1 %v7936_v23 }
 0x34e   :  { %7934 = vst [vmem:[#allocation74_spill] sm:$0xff] %v6886_v61  ;;  %v2238_v0 = vpack.c.bf16 %v6886_v61, %v6884_v60 }
 0x350   :  { %2440 = vmatmul.mubr.bf16.vlgmr.msra.gmra.mrb[84].mxu0 %v2238_v0  ;;  %2483 = vmatmul.mubr.bf16.vlgmr.msra.gmra.mrb[84].mxu1 %v2238_v0  ;;  %v7959_v0 = vld [vmem:[#allocation102_spill] sm:$0xff] }
 0x351   :  { %2577 = vmatpush1.bf16.msra.mxu0 %v7937_v42  ;;  %2620 = vmatpush1.bf16.msra.mxu1 %v7938_v48 }
 0x352   :  { %2578 = vmatprep.subr.bf16.mxu0 %v7939_v7  ;;  %2621 = vmatprep.subr.bf16.mxu1 %v7940_v34 }
 0x353   :  { %2608 = vmatprep.mubr.bf16.mxu0 %v7893_v56  ;;  %2651 = vmatprep.mubr.bf16.mxu1 %v7893_v56 }
 0x355   :  { %2579 = vmatpush1.bf16.msra.mxu0 %v7941_v49  ;;  %2622 = vmatpush1.bf16.msra.mxu1 %v7942_v51 }
 0x356   :  { %2580 = vmatprep.subr.bf16.mxu0 %v7943_v11  ;;  %2623 = vmatprep.subr.bf16.mxu1 %v7944_v24 }
 0x359   :  { %2581 = vmatpush1.bf16.msra.mxu0 %v7945_v17  ;;  %2624 = vmatpush1.bf16.msra.mxu1 %v7946_v19  ;;  %v7971_v19 = vld [vmem:[#allocation26_spill] sm:$0xff]  ;;  %v7972_v17 = vld [vmem:[#allocation27_spill] sm:$0xff] }
 0x35a   :  { %2582 = vmatprep.subr.bf16.mxu0 %v7947_v55  ;;  %2625 = vmatprep.subr.bf16.mxu1 %v7948_v8  ;;  %v7970_v8 = vld [vmem:[#allocation25_spill] sm:$0xff]  ;;  %v2249_v7 = vunpack.c.h.bf16 %v7971_v19  ;;  %v2251_v48 = vunpack.c.h.bf16 %v7972_v17 }
 0x35d   :  { %2583 = vmatpush1.bf16.msra.mxu0 %v7949_v35  ;;  %2626 = vmatpush1.bf16.msra.mxu1 %v7950_v6  ;;  %v7960_v35 = vld [vmem:[#allocation103_spill] sm:$0xff]  ;;  %v7961_v6 = vld [vmem:[#allocation104_spill] sm:$0xff] }
 0x35e   :  { %2584 = vmatprep.subr.bf16.mxu0 %v7951_v50  ;;  %2627 = vmatprep.subr.bf16.mxu1 %v7952_v2  ;;  %v7962_v50 = vld [vmem:[#allocation105_spill] sm:$0xff]  ;;  %v7963_v2 = vld [vmem:[#allocation106_spill] sm:$0xff] }
 0x361   :  { %2585 = vmatpush1.bf16.msra.mxu0 %v7953_v10  ;;  %2628 = vmatpush1.bf16.msra.mxu1 %v7954_v33  ;;  %v7964_v10 = vld [vmem:[#allocation107_spill] sm:$0xff]  ;;  %v7965_v33 = vld [vmem:[#allocation108_spill] sm:$0xff] }
 0x362   :  { %2586 = vmatprep.subr.bf16.mxu0 %v7955_v18  ;;  %2629 = vmatprep.subr.bf16.mxu1 %v7956_v36  ;;  %v7966_v18 = vld [vmem:[#allocation109_spill] sm:$0xff]  ;;  %v7967_v36 = vld [vmem:[#allocation110_spill] sm:$0xff] }
 0x365   :  { %2587 = vmatpush1.bf16.msra.mxu0 %v7957_v4  ;;  %2630 = vmatpush1.bf16.msra.mxu1 %v7958_v25  ;;  %v7968_v4 = vld [vmem:[#allocation111_spill] sm:$0xff]  ;;  %v7969_v25 = vld [vmem:[#allocation24_spill] sm:$0xff] }
 0x366   :  { %2588 = vmatprep.subr.bf16.mxu0 %v7959_v0  ;;  %2631 = vmatprep.subr.bf16.mxu1 %v7960_v35  ;;  %v2244_v0 = vunpack.c.l.bf16 %v7969_v25  ;;  %v2246_v35 = vunpack.c.l.bf16 %v7970_v8 }
 0x369   :  { %2589 = vmatpush1.bf16.msra.mxu0 %v7961_v6  ;;  %2632 = vmatpush1.bf16.msra.mxu1 %v7962_v50  ;;  %v2245_v50 = vunpack.c.l.bf16 %v7971_v19 }
 0x36a   :  { %2590 = vmatprep.subr.bf16.mxu0 %v7963_v2  ;;  %2633 = vmatprep.subr.bf16.mxu1 %v7964_v10  ;;  %v2247_v2 = vunpack.c.l.bf16 %v7972_v17 }
 0x36d   :  { %2591 = vmatpush1.bf16.msra.mxu0 %v7965_v33  ;;  %2634 = vmatpush1.bf16.msra.mxu1 %v7966_v18  ;;  %v2248_v18 = vunpack.c.h.bf16 %v7969_v25 }
 0x36e   :  { %2731 = vmatprep.subr.bf16.mxu0 %v7967_v36  ;;  %2774 = vmatprep.subr.bf16.mxu1 %v7968_v4  ;;  %v2250_v36 = vunpack.c.h.bf16 %v7970_v8 }
 0x402   :  { %v2286_v55 = vpop.f32.mrb[80].mxu0  ;;  %v2329_v6 = vpop.f32.mrb[80].mxu1 }
 0x403   :  { %v2338_v24 = vadd.f32 %v2286_v55, %v2244_v0  ;;  %v2340_v10 = vadd.f32 %v2329_v6, %v2246_v35  ;;  %v2288_v11 = vpop.f32.mrb[81].mxu0  ;;  %v2331_v33 = vpop.f32.mrb[81].mxu1 }
 0x404   :  { %v2339_v51 = vadd.f32 %v2288_v11, %v2245_v50  ;;  %v2341_v4 = vadd.f32 %v2331_v33, %v2247_v2  ;;  %v2290_v49 = vpop.f32.mrb[82].mxu0  ;;  %v2333_v34 = vpop.f32.mrb[82].mxu1 }
 0x405   :  { %v4557_v42 = vmul.f32 -1.442695, %v2338_v24  ;;  %v2342_v61 = vadd.f32 %v2290_v49, %v2248_v18  ;;  %v2344_v23 = vadd.f32 %v2333_v34, %v2250_v36  ;;  %v2292_v40 = vpop.f32.mrb[83].mxu0  ;;  %v2335_v55 = vpop.f32.mrb[83].mxu1  ;;  %v4559_v11 = vmul.f32 -1.442695, %v2340_v10 }
 0x406   :  { %v4558_v35 = vmul.f32 -1.442695, %v2339_v51  ;;  %v2343_v6 = vadd.f32 %v2292_v40, %v2249_v7  ;;  %v2345_v0 = vadd.f32 %v2335_v55, %v2251_v48 }
 0x407   :  { %5145 = vpow2.f32 %v4557_v42  ;;  %v4560_v25 = vmul.f32 -1.442695, %v2342_v61  ;;  %v4562_v8 = vmul.f32 -1.442695, %v2344_v23 }
 0x408   :  { %v4561_v43 = vmul.f32 -1.442695, %v2343_v6  ;;  %5147 = vpow2.f32 %v4558_v35  ;;  %v7974_v35 = vld [vmem:[#allocation69_spill] sm:$0xff] }
 0x409   :  { %5149 = vpow2.f32 %v4560_v25  ;;  %v2401_v6 = vunpack.c.l.bf16 %v7974_v35 }
 0x40a   :  { %5151 = vpow2.f32 %v4561_v43 }
 0x40b   :  { %5153 = vtanh.f32 %v2341_v4  ;;  %v7973_v4 = vld [vmem:[#allocation68_spill] sm:$0xff] }
 0x40c   :  { %5155 = vpow2.f32 %v4559_v11  ;;  %v2399_v55 = vunpack.c.l.bf16 %v7973_v4 }
 0x40d   :  { %5157 = vpow2.f32 %v4562_v8  ;;  %v2403_v8 = vunpack.c.h.bf16 %v7973_v4 }
 0x411   :  { %v5146_v50 = vpop.eup %5145 }
 0x412   :  { %v2364_v19 = vadd.f32 1.0, %v5146_v50  ;;  %v5148_v24 = vpop.eup %5147  ;;  %v2405_v50 = vunpack.c.h.bf16 %v7974_v35 }
 0x413   :  { %v5150_v34 = vpop.eup %5149  ;;  %v2365_v49 = vadd.f32 1.0, %v5148_v24 }
 0x414   :  { %5159 = vrcp.f32 %v2364_v19  ;;  %v2367_v51 = vadd.f32 1.0, %v5150_v34  ;;  %v5152_v40 = vpop.eup %5151 }
 0x415   :  { %5161 = vtanh.f32 %v2345_v0  ;;  %v2368_v61 = vadd.f32 1.0, %v5152_v40  ;;  %v5154_v42 = vpop.eup %5153 }
 0x416   :  { %5163 = vrcp.f32 %v2365_v49  ;;  %v5156_v43 = vpop.eup %5155  ;;  %v7976_v49 = vld [vmem:[#allocation70_spill] sm:$0xff] }
 0x417   :  { %5165 = vrcp.f32 %v2367_v51  ;;  %v5158_v48 = vpop.eup %5157  ;;  %v2366_v10 = vadd.f32 1.0, %v5156_v43  ;;  %v7977_v51 = vld [vmem:[#allocation71_spill] sm:$0xff] }
 0x418   :  { %5167 = vrcp.f32 %v2368_v61  ;;  %v2369_v11 = vadd.f32 1.0, %v5158_v48  ;;  %v2402_v40 = vunpack.c.l.bf16 %v7977_v51  ;;  %v2404_v48 = vunpack.c.h.bf16 %v7976_v49 }
 0x419   :  { %5169 = vrcp.f32 %v2366_v10 }
 0x41e   :  { %v5160_v23 = vpop.eup %5159 }
 0x41f   :  { %v5162_v7 = vpop.eup %5161  ;;  %v2386_v17 = vmul.f32 %v5160_v23, %v5154_v42 }
 0x420   :  { %v5164_v2 = vpop.eup %5163 }
 0x421   :  { %v5166_v33 = vpop.eup %5165  ;;  %v2384_v18 = vmul.f32 %v5164_v2, %v6827_v58  ;;  %v2400_v58 = vunpack.c.l.bf16 %v7976_v49 }
 0x422   :  { %v2387_v36 = vmul.f32 %v5166_v33, %v5162_v7  ;;  %v5168_v0 = vpop.eup %5167  ;;  %v2406_v33 = vunpack.c.h.bf16 %v7977_v51 }
 0x423   :  { %v6937_v25 = vadd.f32 %v2386_v17, %v2384_v18  ;;  %v2385_v19 = vmul.f32 %v5168_v0, %v6835_v12  ;;  %v2441_v24 = vpop.f32.mrb[84].mxu0  ;;  %v2484_v34 = vpop.f32.mrb[84].mxu1 }
 0x424   :  { %v2493_v61 = vadd.f32 %v2441_v24, %v2399_v55  ;;  %v2495_v42 = vadd.f32 %v2484_v34, %v2401_v6  ;;  %v2443_v43 = vpop.f32.mrb[85].mxu0  ;;  %v2486_v23 = vpop.f32.mrb[85].mxu1 }
 0x425   :  { %7975 = vst [vmem:[#allocation24_spill] sm:$0xff] %v6937_v25  ;;  %5171 = vtanh.f32 %v6937_v25  ;;  %v6946_v7 = vadd.f32 %v2387_v36, %v2385_v19  ;;  %v2494_v17 = vadd.f32 %v2443_v43, %v2400_v58  ;;  %v2496_v2 = vadd.f32 %v2486_v23, %v2402_v40  ;;  %v2445_v10 = vpop.f32.mrb[86].mxu0  ;;  %v2488_v12 = vpop.f32.mrb[86].mxu1 }
 0x426   :  { %5173 = vrcp.f32 %v2369_v11  ;;  %v4563_v18 = vmul.f32 -1.442695, %v2493_v61  ;;  %v2497_v4 = vadd.f32 %v2445_v10, %v2403_v8  ;;  %v2499_v35 = vadd.f32 %v2488_v12, %v2405_v50  ;;  %v2447_v0 = vpop.f32.mrb[87].mxu0  ;;  %v2490_v25 = vpop.f32.mrb[87].mxu1  ;;  %v7978_v11 = vld [vmem:[#allocation72_spill] sm:$0xff] }
 0x427   :  { %5175 = vtanh.f32 %v6946_v7  ;;  %v4564_v55 = vmul.f32 -1.442695, %v2494_v17  ;;  %v2498_v6 = vadd.f32 %v2447_v0, %v2404_v48  ;;  %v2500_v24 = vadd.f32 %v2490_v25, %v2406_v33  ;;  %v5170_v34 = vpop.eup %5169  ;;  %v7979_v25 = vld [vmem:[#allocation73_spill] sm:$0xff] }
 0x428   :  { %5177 = vpow2.f32 %v4563_v18  ;;  %v4566_v36 = vmul.f32 -1.442695, %v2497_v4  ;;  %v2227_v58 = vmax.f32 %v7978_v11, %v6838_v59  ;;  %v4565_v8 = vmul.f32 -1.442695, %v2495_v42  ;;  %v7996_v11 = vld [vmem:[#allocation88_spill] sm:$0xff] }
 0x429   :  { %5179 = vpow2.f32 %v4564_v55  ;;  %v4567_v19 = vmul.f32 -1.442695, %v2498_v6  ;;  %v2228_v23 = vmax.f32 %v7979_v25, %v6840_v41  ;;  %v4568_v48 = vmul.f32 -1.442695, %v2499_v35  ;;  %v7990_v6 = vld [vmem:[#allocation82_spill] sm:$0xff]  ;;  %v8003_v25 = vld [vmem:[#allocation95_spill] sm:$0xff] }
 0x42a   :  { %5181 = vpow2.f32 %v4566_v36  ;;  %v7992_v36 = vld [vmem:[#allocation84_spill] sm:$0xff] }
 0x42b   :  { %5183 = vpow2.f32 %v4567_v19  ;;  %v7993_v19 = vld [vmem:[#allocation85_spill] sm:$0xff] }
 0x42c   :  { %5185 = vpow2.f32 %v4565_v8  ;;  %v7998_v8 = vld [vmem:[#allocation90_spill] sm:$0xff] }
 0x42d   :  { %5187 = vtanh.f32 %v2496_v2 }
 0x42f   :  { %v5172_v49 = vpop.eup %5171 }
 0x430   :  { %v2392_v50 = vmul.f32 %v5172_v49, %v5170_v34  ;;  %v5174_v51 = vpop.eup %5173  ;;  %v7994_v34 = vld [vmem:[#allocation86_spill] sm:$0xff]  ;;  %v7995_v49 = vld [vmem:[#allocation87_spill] sm:$0xff] }
 0x431   :  { %v5176_v40 = vpop.eup %5175 }
 0x432   :  { %v6952_v61 = vmax.f32 %v2227_v58, %v2392_v50  ;;  %v5178_v43 = vpop.eup %5177  ;;  %v2393_v17 = vmul.f32 %v5176_v40, %v5174_v51  ;;  %v7997_v58 = vld [vmem:[#allocation89_spill] sm:$0xff]  ;;  %v8000_v51 = vld [vmem:[#allocation92_spill] sm:$0xff] }
 0x433   :  { %v2519_v10 = vadd.f32 1.0, %v5178_v43  ;;  %v5180_v12 = vpop.eup %5179  ;;  %v8001_v40 = vld [vmem:[#allocation93_spill] sm:$0xff]  ;;  %v8002_v43 = vld [vmem:[#allocation94_spill] sm:$0xff] }
 0x434   :  { %v6956_v33 = vmax.f32 %v2228_v23, %v2393_v17  ;;  %v2561_v18 = vpack.c.bf16 %v2393_v17, %v2392_v50  ;;  %v2520_v59 = vadd.f32 1.0, %v5180_v12  ;;  %v5182_v42 = vpop.eup %5181  ;;  %v7999_v50 = vld [vmem:[#allocation91_spill] sm:$0xff]  ;;  %v8004_v23 = vld [vmem:[#allocation96_spill] sm:$0xff]  ;;  %v8006_v17 = vld [vmem:[#allocation98_spill] sm:$0xff] }
 0x435   :  { %5189 = vrcp.f32 %v2519_v10  ;;  %v2522_v4 = vadd.f32 1.0, %v5182_v42  ;;  %v5184_v41 = vpop.eup %5183  ;;  %v8007_v10 = vld [vmem:[#allocation99_spill] sm:$0xff]  ;;  %v8008_v12 = vld [vmem:[#allocation100_spill] sm:$0xff] }
 0x436   :  { %5191 = vpow2.f32 %v4568_v48  ;;  %2609 = vmatmul.mubr.bf16.vlgmr.msra.gmra.mrb[88].mxu0 %v2561_v18  ;;  %2652 = vmatmul.mubr.bf16.vlgmr.msra.gmra.mrb[88].mxu1 %v2561_v18  ;;  %v2523_v2 = vadd.f32 1.0, %v5184_v41  ;;  %v8005_v48 = vld [vmem:[#allocation97_spill] sm:$0xff]  ;;  %v8011_v42 = vld [vmem:[#allocation103_spill] sm:$0xff] }
 0x437   :  { %5193 = vrcp.f32 %v2520_v59  ;;  %2732 = vmatpush1.bf16.msra.mxu0 %v6606_v53  ;;  %2775 = vmatpush1.bf16.msra.mxu1 %v6609_v30  ;;  %v5186_v53 = vpop.eup %5185  ;;  %v8009_v18 = vld [vmem:[#allocation101_spill] sm:$0xff]  ;;  %v8010_v59 = vld [vmem:[#allocation102_spill] sm:$0xff] }
 0x438   :  { %5195 = vtanh.f32 %v2500_v24  ;;  %2733 = vmatprep.subr.bf16.mxu0 %v6612_v13  ;;  %2776 = vmatprep.subr.bf16.mxu1 %v6615_v21  ;;  %v5188_v30 = vpop.eup %5187  ;;  %v2521_v0 = vadd.f32 1.0, %v5186_v53  ;;  %v7991_v24 = vld [vmem:[#allocation83_spill] sm:$0xff]  ;;  %v8013_v41 = vld [vmem:[#allocation105_spill] sm:$0xff] }
 0x439   :  { %5197 = vrcp.f32 %v2522_v4  ;;  %2763 = vmatprep.mubr.bf16.mxu0 %v7893_v56  ;;  %2806 = vmatprep.mubr.bf16.mxu1 %v7893_v56  ;;  %v8012_v4 = vld [vmem:[#allocation104_spill] sm:$0xff]  ;;  %v8015_v53 = vld [vmem:[#allocation107_spill] sm:$0xff] }
 0x43a   :  { %5199 = vrcp.f32 %v2523_v2  ;;  %v8014_v2 = vld [vmem:[#allocation106_spill] sm:$0xff] }
 0x43b   :  { %2734 = vmatpush1.bf16.msra.mxu0 %v6620_v45  ;;  %2777 = vmatpush1.bf16.msra.mxu1 %v6623_v3  ;;  %5201 = vrcp.f32 %v2521_v0 }
 0x43c   :  { %2735 = vmatprep.subr.bf16.mxu0 %v6626_v63  ;;  %2778 = vmatprep.subr.bf16.mxu1 %v6629_v62 }
 0x43f   :  { %v5190_v13 = vpop.eup %5189  ;;  %2736 = vmatpush1.bf16.msra.mxu0 %v6632_v38  ;;  %2779 = vmatpush1.bf16.msra.mxu1 %v6635_v28 }
 0x440   :  { %v5192_v21 = vpop.eup %5191  ;;  %v2541_v35 = vmul.f32 %v5190_v13, %v5188_v30  ;;  %2737 = vmatprep.subr.bf16.mxu0 %v6638_v5  ;;  %2780 = vmatprep.subr.bf16.mxu1 %v6641_v1  ;;  %v8016_v30 = vld [vmem:[#allocation108_spill] sm:$0xff]  ;;  %v8017_v13 = vld [vmem:[#allocation109_spill] sm:$0xff] }
 0x441   :  { %v5194_v45 = vpop.eup %5193  ;;  %v2524_v5 = vadd.f32 1.0, %v5192_v21  ;;  %v8018_v21 = vld [vmem:[#allocation110_spill] sm:$0xff] }
 0x442   :  { %v5196_v3 = vpop.eup %5195  ;;  %v2539_v63 = vmul.f32 %v5194_v45, %v6861_v44  ;;  %v8020_v45 = vld [vmem:[#allocation28_spill] sm:$0xff] }
 0x443   :  { %v5198_v55 = vpop.eup %5197  ;;  %2738 = vmatpush1.bf16.msra.mxu0 %v6646_v9  ;;  %2781 = vmatpush1.bf16.msra.mxu1 %v6649_v37  ;;  %v2568_v0 = vunpack.c.l.bf16 %v8020_v45 }
 0x444   :  { %v6975_v62 = vadd.f32 %v2541_v35, %v2539_v63  ;;  %v2542_v38 = vmul.f32 %v5198_v55, %v5196_v3  ;;  %2739 = vmatprep.subr.bf16.mxu0 %v6652_v14  ;;  %2782 = vmatprep.subr.bf16.mxu1 %v6655_v27  ;;  %v5200_v28 = vpop.eup %5199  ;;  %v7980_v27 = vld [vmem:[#allocation76_spill] sm:$0xff]  ;;  %v8019_v35 = vld [vmem:[#allocation111_spill] sm:$0xff]  ;;  %v8021_v3 = vld [vmem:[#allocation29_spill] sm:$0xff] }
 0x445   :  { %v2540_v1 = vmul.f32 %v5200_v28, %v6867_v57  ;;  %v5202_v14 = vpop.eup %5201  ;;  %v2570_v63 = vunpack.c.l.bf16 %v8021_v3  ;;  %v8022_v28 = vld [vmem:[#allocation30_spill] sm:$0xff] }
 0x446   :  { %5203 = vtanh.f32 %v6975_v62 }
 0x447   :  { %2740 = vmatpush1.bf16.msra.mxu0 %v6661_v32  ;;  %2783 = vmatpush1.bf16.msra.mxu1 %v6664_v16  ;;  %v6983_v9 = vadd.f32 %v2542_v38, %v2540_v1  ;;  %5205 = vrcp.f32 %v2524_v5  ;;  %v2233_v32 = vmax.f32 %v7980_v27, %v6884_v60  ;;  %v7988_v60 = vld [vmem:[#allocation80_spill] sm:$0xff]  ;;  %v2569_v5 = vunpack.c.l.bf16 %v8022_v28  ;;  %v8023_v1 = vld [vmem:[#allocation31_spill] sm:$0xff] }
 0x448   :  { %2741 = vmatprep.subr.bf16.mxu0 %v6668_v39  ;;  %2784 = vmatprep.subr.bf16.mxu1 %v6671_v52  ;;  %v7981_v52 = vld [vmem:[#allocation75_spill] sm:$0xff] }
 0x449   :  { %5207 = vtanh.f32 %v6983_v9 }
 0x44b   :  { %2742 = vmatpush1.bf16.msra.mxu0 %v6674_v46  ;;  %2785 = vmatpush1.bf16.msra.mxu1 %v6677_v22 }
 0x44c   :  { %2743 = vmatprep.subr.bf16.mxu0 %v6680_v29  ;;  %2786 = vmatprep.subr.bf16.mxu1 %v6683_v31  ;;  %v7983_v29 = vld [vmem:[#allocation78_spill] sm:$0xff] }
 0x44d   :  { %v7985_v31 = vld [vmem:[#allocation74_spill] sm:$0xff] }
 0x44f   :  { %2744 = vmatpush1.bf16.msra.mxu0 %v6686_v47  ;;  %2787 = vmatpush1.bf16.msra.mxu1 %v6689_v54  ;;  %v7984_v54 = vld [vmem:[#allocation79_spill] sm:$0xff] }
 0x450   :  { %v5204_v37 = vpop.eup %5203  ;;  %2745 = vmatprep.subr.bf16.mxu0 %v6692_v20  ;;  %2788 = vmatprep.subr.bf16.mxu1 %v6695_v15  ;;  %v7986_v20 = vld [vmem:[#allocation77_spill] sm:$0xff] }
 0x451   :  { %v2547_v16 = vmul.f32 %v5204_v37, %v5202_v14  ;;  %v5206_v39 = vpop.eup %5205  ;;  %v2234_v47 = vmax.f32 %v7986_v20, %v7985_v31  ;;  %v2571_v14 = vunpack.c.l.bf16 %v8023_v1  ;;  %v2573_v20 = vunpack.c.h.bf16 %v8022_v28 }
 0x453   :  { %2746 = vmatpush1.bf16.msra.mxu0 %v7932_v26  ;;  %2789 = vmatpush1.bf16.msra.mxu1 %v7981_v52  ;;  %v7000_v46 = vmax.f32 %v2233_v32, %v2547_v16  ;;  %v5208_v22 = vpop.eup %5207  ;;  %v7989_v26 = vld [vmem:[#allocation81_spill] sm:$0xff]  ;;  %v2574_v52 = vunpack.c.h.bf16 %v8021_v3  ;;  %v8025_v3 = vld [vmem:[#allocation64_spill] sm:$0xff] }
 0x454   :  { %2900 = vmatprep.subr.bf16.mxu0 %v7983_v29  ;;  %2943 = vmatprep.subr.bf16.mxu1 %v7984_v54  ;;  %v2548_v15 = vmul.f32 %v5208_v22, %v5206_v39  ;;  %v2572_v39 = vunpack.c.h.bf16 %v8020_v45 }
 0x455   :  { %7982 = vst [vmem:[#allocation25_spill] sm:$0xff] %v7000_v46 }
 0x456   :  { %v7006_v44 = vmax.f32 %v2234_v47, %v2548_v15  ;;  %v2562_v57 = vpack.c.bf16 %v2548_v15, %v2547_v16  ;;  %v2575_v47 = vunpack.c.h.bf16 %v8023_v1  ;;  %v8027_v1 = vld [vmem:[#allocation66_spill] sm:$0xff] }
 0x458   :  { %7987 = vst [vmem:[#allocation26_spill] sm:$0xff] %v7006_v44  ;;  %2764 = vmatmul.mubr.bf16.vlgmr.msra.gmra.mrb[92].mxu0 %v2562_v57  ;;  %2807 = vmatmul.mubr.bf16.vlgmr.msra.gmra.mrb[92].mxu1 %v2562_v57 }
 0x459   :  { %2901 = vmatpush1.bf16.msra.mxu0 %v7988_v60  ;;  %2944 = vmatpush1.bf16.msra.mxu1 %v7989_v26 }
 0x45a   :  { %2902 = vmatprep.subr.bf16.mxu0 %v7990_v6  ;;  %2945 = vmatprep.subr.bf16.mxu1 %v7991_v24 }
 0x45b   :  { %2932 = vmatprep.mubr.bf16.mxu0 %v7893_v56  ;;  %2975 = vmatprep.mubr.bf16.mxu1 %v7893_v56 }
 0x45d   :  { %2903 = vmatpush1.bf16.msra.mxu0 %v7992_v36  ;;  %2946 = vmatpush1.bf16.msra.mxu1 %v7993_v19 }
 0x45e   :  { %2904 = vmatprep.subr.bf16.mxu0 %v7994_v34  ;;  %2947 = vmatprep.subr.bf16.mxu1 %v7995_v49 }
 0x461   :  { %2905 = vmatpush1.bf16.msra.mxu0 %v7996_v11  ;;  %2948 = vmatpush1.bf16.msra.mxu1 %v7997_v58 }
 0x462   :  { %2906 = vmatprep.subr.bf16.mxu0 %v7998_v8  ;;  %2949 = vmatprep.subr.bf16.mxu1 %v7999_v50 }
 0x465   :  { %2907 = vmatpush1.bf16.msra.mxu0 %v8000_v51  ;;  %2950 = vmatpush1.bf16.msra.mxu1 %v8001_v40 }
 0x466   :  { %2908 = vmatprep.subr.bf16.mxu0 %v8002_v43  ;;  %2951 = vmatprep.subr.bf16.mxu1 %v8003_v25 }
 0x469   :  { %2909 = vmatpush1.bf16.msra.mxu0 %v8004_v23  ;;  %2952 = vmatpush1.bf16.msra.mxu1 %v8005_v48 }
 0x46a   :  { %2910 = vmatprep.subr.bf16.mxu0 %v8006_v17  ;;  %2953 = vmatprep.subr.bf16.mxu1 %v8007_v10 }
 0x46d   :  { %2911 = vmatpush1.bf16.msra.mxu0 %v8008_v12  ;;  %2954 = vmatpush1.bf16.msra.mxu1 %v8009_v18 }
 0x46e   :  { %2912 = vmatprep.subr.bf16.mxu0 %v8010_v59  ;;  %2955 = vmatprep.subr.bf16.mxu1 %v8011_v42 }
 0x471   :  { %2913 = vmatpush1.bf16.msra.mxu0 %v8012_v4  ;;  %2956 = vmatpush1.bf16.msra.mxu1 %v8013_v41 }
 0x472   :  { %2914 = vmatprep.subr.bf16.mxu0 %v8014_v2  ;;  %2957 = vmatprep.subr.bf16.mxu1 %v8015_v53  ;;  %v8024_v53 = vld [vmem:[#allocation24_spill] sm:$0xff] }
 0x475   :  { %2915 = vmatpush1.bf16.msra.mxu0 %v8016_v30  ;;  %2958 = vmatpush1.bf16.msra.mxu1 %v8017_v13 }
 0x476   :  { %3055 = vmatprep.subr.bf16.mxu0 %v8018_v21  ;;  %3098 = vmatprep.subr.bf16.mxu1 %v8019_v35 }
 0x509   :  { %v2610_v55 = vpop.f32.mrb[88].mxu0  ;;  %v2653_v38 = vpop.f32.mrb[88].mxu1 }
 0x50a   :  { %v2662_v37 = vadd.f32 %v2610_v55, %v2568_v0  ;;  %v2664_v27 = vadd.f32 %v2653_v38, %v2570_v63  ;;  %v2612_v32 = vpop.f32.mrb[89].mxu0  ;;  %v2655_v16 = vpop.f32.mrb[89].mxu1  ;;  %v2723_v63 = vunpack.c.l.bf16 %v8025_v3  ;;  %v8026_v55 = vld [vmem:[#allocation65_spill] sm:$0xff] }
 0x50b   :  { %v2663_v22 = vadd.f32 %v2612_v32, %v2569_v5  ;;  %v2665_v29 = vadd.f32 %v2655_v16, %v2571_v14  ;;  %v2614_v54 = vpop.f32.mrb[90].mxu0  ;;  %v2657_v31 = vpop.f32.mrb[90].mxu1  ;;  %v2725_v38 = vunpack.c.l.bf16 %v8026_v55  ;;  %v2724_v14 = vunpack.c.l.bf16 %v8027_v1 }
 0x50c   :  { %v4569_v15 = vmul.f32 -1.442695, %v2662_v37  ;;  %v2666_v57 = vadd.f32 %v2614_v54, %v2572_v39  ;;  %v2668_v60 = vadd.f32 %v2657_v31, %v2574_v52  ;;  %v2616_v26 = vpop.f32.mrb[91].mxu0  ;;  %v2659_v6 = vpop.f32.mrb[91].mxu1  ;;  %v4571_v11 = vmul.f32 -1.442695, %v2664_v27 }
 0x50d   :  { %v4570_v24 = vmul.f32 -1.442695, %v2663_v22  ;;  %v2667_v36 = vadd.f32 %v2616_v26, %v2573_v20  ;;  %v2669_v19 = vadd.f32 %v2659_v6, %v2575_v47  ;;  %v8028_v37 = vld [vmem:[#allocation67_spill] sm:$0xff]  ;;  %v2727_v32 = vunpack.c.h.bf16 %v8025_v3  ;;  %v7090_v3 = vld [vmem:[#allocation14 + $0x20] ss:$16 sps:$4 sm:$0xff]  }
 0x50e   :  { %5209 = vpow2.f32 %v4569_v15  ;;  %v4572_v34 = vmul.f32 -1.442695, %v2666_v57  ;;  %v4574_v58 = vmul.f32 -1.442695, %v2668_v60  ;;  %v2726_v27 = vunpack.c.l.bf16 %v8028_v37 }
 0x50f   :  { %v4573_v49 = vmul.f32 -1.442695, %v2667_v36  ;;  %5211 = vpow2.f32 %v4570_v24  ;;  %v2728_v15 = vunpack.c.h.bf16 %v8027_v1  ;;  %v2730_v6 = vunpack.c.h.bf16 %v8028_v37  ;;  %v7105_v37 = vld [vmem:[#allocation14 + $0x48] ss:$16 sps:$4 sm:$0xff]  }
 0x510   :  { %5213 = vpow2.f32 %v4572_v34 }
 0x511   :  { %5215 = vpow2.f32 %v4573_v49 }
 0x512   :  { %5217 = vtanh.f32 %v2665_v29  ;;  %v2729_v29 = vunpack.c.h.bf16 %v8026_v55  ;;  %v7096_v55 = vld [vmem:[#allocation14 + $0x44] ss:$16 sps:$4 sm:$0xff]  }
 0x513   :  { %5219 = vpow2.f32 %v4571_v11 }
 0x514   :  { %5221 = vpow2.f32 %v4574_v58 }
 0x518   :  { %v5210_v8 = vpop.eup %5209 }
 0x519   :  { %v2688_v50 = vadd.f32 1.0, %v5210_v8  ;;  %v5212_v51 = vpop.eup %5211 }
 0x51a   :  { %v5214_v40 = vpop.eup %5213  ;;  %v2689_v43 = vadd.f32 1.0, %v5212_v51 }
 0x51b   :  { %5223 = vrcp.f32 %v2688_v50  ;;  %v2691_v25 = vadd.f32 1.0, %v5214_v40  ;;  %v5216_v23 = vpop.eup %5215 }
 0x51c   :  { %5225 = vtanh.f32 %v2669_v19  ;;  %v2692_v48 = vadd.f32 1.0, %v5216_v23  ;;  %v5218_v17 = vpop.eup %5217 }
 0x51d   :  { %5227 = vrcp.f32 %v2689_v43  ;;  %v5220_v10 = vpop.eup %5219 }
 0x51e   :  { %5229 = vrcp.f32 %v2691_v25  ;;  %v5222_v12 = vpop.eup %5221  ;;  %v2690_v41 = vadd.f32 1.0, %v5220_v10 }
 0x51f   :  { %5231 = vrcp.f32 %v2692_v48  ;;  %v2693_v45 = vadd.f32 1.0, %v5222_v12  ;;  %v7248_v48 = vld [vmem:[#allocation12 + $0xa4] ss:$16 sps:$4 sm:$0xff]  }
 0x520   :  { %5233 = vrcp.f32 %v2690_v41  ;;  %8053 = vst [vmem:[#allocation91_spill] sm:$0xff] %v7248_v48 }
 0x525   :  { %v5224_v18 = vpop.eup %5223 }
 0x526   :  { %v5226_v59 = vpop.eup %5225  ;;  %v2710_v42 = vmul.f32 %v5224_v18, %v5218_v17  ;;  %v7245_v18 = vld [vmem:[#allocation12 + $0x88] ss:$16 sps:$4 sm:$0xff]  }
 0x527   :  { %v5228_v4 = vpop.eup %5227  ;;  %8052 = vst [vmem:[#allocation90_spill] sm:$0xff] %v7245_v18 }
 0x528   :  { %v5230_v2 = vpop.eup %5229  ;;  %v2708_v30 = vmul.f32 %v5228_v4, %v8024_v53  ;;  %v7076_v53 = vld [vmem:[#allocation14] ss:$16 sps:$4 sm:$0xff]  }
 0x529   :  { %v2711_v13 = vmul.f32 %v5230_v2, %v5226_v59  ;;  %v5232_v21 = vpop.eup %5231 }
 0x52a   :  { %v7051_v35 = vadd.f32 %v2710_v42, %v2708_v30  ;;  %v2709_v0 = vmul.f32 %v5232_v21, %v6946_v7  ;;  %v5234_v8 = vpop.eup %5233  ;;  %v7079_v30 = vld [vmem:[#allocation14 + $0x8] ss:$16 sps:$4 sm:$0xff]   ;;  %v7082_v21 = vld [vmem:[#allocation14 + $0x24] ss:$16 sps:$4 sm:$0xff]  }
 0x52b   :  { %v2765_v28 = vpop.f32.mrb[92].mxu0  ;;  %v2808_v5 = vpop.f32.mrb[92].mxu1 }
 0x52c   :  { %5235 = vtanh.f32 %v7051_v35  ;;  %v7060_v16 = vadd.f32 %v2711_v13, %v2709_v0  ;;  %v2817_v39 = vadd.f32 %v2765_v28, %v2723_v63  ;;  %v2819_v52 = vadd.f32 %v2808_v5, %v2725_v38  ;;  %v2767_v22 = vpop.f32.mrb[93].mxu0  ;;  %v2810_v7 = vpop.f32.mrb[93].mxu1  ;;  %v7093_v63 = vld [vmem:[#allocation14 + $0x28] ss:$16 sps:$4 sm:$0xff]   ;;  %v7099_v38 = vld [vmem:[#allocation14 + $0x4c] ss:$16 sps:$4 sm:$0xff]  }
 0x52d   :  { %5237 = vrcp.f32 %v2693_v45  ;;  %v2818_v54 = vadd.f32 %v2767_v22, %v2724_v14  ;;  %v2820_v31 = vadd.f32 %v2810_v7, %v2726_v27  ;;  %v2769_v20 = vpop.f32.mrb[94].mxu0  ;;  %v2812_v47 = vpop.f32.mrb[94].mxu1  ;;  %v7085_v45 = vld [vmem:[#allocation14 + $0x2c] ss:$16 sps:$4 sm:$0xff]   ;;  %v7102_v14 = vld [vmem:[#allocation14 + $0x40] ss:$16 sps:$4 sm:$0xff]  }
 0x52e   :  { %5239 = vtanh.f32 %v7060_v16  ;;  %v4575_v57 = vmul.f32 -1.442695, %v2817_v39  ;;  %v2821_v60 = vadd.f32 %v2769_v20, %v2727_v32  ;;  %v2771_v26 = vpop.f32.mrb[95].mxu0  ;;  %v2814_v24 = vpop.f32.mrb[95].mxu1  ;;  %v2823_v19 = vadd.f32 %v2812_v47, %v2729_v29  ;;  %v7108_v32 = vld [vmem:[#allocation14 + $0x64] ss:$16 sps:$4 sm:$0xff]  }
 0x52f   :  { %v4576_v36 = vmul.f32 -1.442695, %v2818_v54  ;;  %v2822_v34 = vadd.f32 %v2771_v26, %v2728_v15  ;;  %v2824_v11 = vadd.f32 %v2814_v24, %v2730_v6  ;;  %v4577_v43 = vmul.f32 -1.442695, %v2819_v52  ;;  %v7111_v39 = vld [vmem:[#allocation14 + $0x6c] ss:$16 sps:$4 sm:$0xff]  }
 0x530   :  { %5241 = vpow2.f32 %v4575_v57  ;;  %v4578_v49 = vmul.f32 -1.442695, %v2821_v60  ;;  %v4580_v23 = vmul.f32 -1.442695, %v2823_v19  ;;  %v7115_v20 = vld [vmem:[#allocation14 + $0x60] ss:$16 sps:$4 sm:$0xff]  }
 0x531   :  { %v4579_v58 = vmul.f32 -1.442695, %v2822_v34  ;;  %5243 = vpow2.f32 %v4576_v36  ;;  %v7118_v47 = vld [vmem:[#allocation14 + $0x68] ss:$16 sps:$4 sm:$0xff]   ;;  %v7121_v57 = vld [vmem:[#allocation14 + $0x84] ss:$16 sps:$4 sm:$0xff]  }
 0x532   :  { %5245 = vpow2.f32 %v4578_v49  ;;  %v7124_v60 = vld [vmem:[#allocation14 + $0x8c] ss:$16 sps:$4 sm:$0xff]   ;;  %v7131_v36 = vld [vmem:[#allocation14 + $0x80] ss:$16 sps:$4 sm:$0xff]   ;;  %v7134_v19 = vld [vmem:[#allocation14 + $0x88] ss:$16 sps:$4 sm:$0xff]  }
 0x533   :  { %5247 = vpow2.f32 %v4579_v58  ;;  %v7139_v49 = vld [vmem:[#allocation14 + $0xa4] ss:$16 sps:$4 sm:$0xff]   ;;  %v7149_v58 = vld [vmem:[#allocation14 + $0xa8] ss:$16 sps:$4 sm:$0xff]  }
 0x534   :  { %5249 = vtanh.f32 %v2820_v31 }
 0x535   :  { %5251 = vpow2.f32 %v4577_v43  ;;  %v7161_v43 = vld [vmem:[#allocation14 + $0xc8] ss:$16 sps:$4 sm:$0xff]  }
 0x536   :  { %v5236_v50 = vpop.eup %5235  ;;  %5253 = vpow2.f32 %v4580_v23  ;;  %v7164_v23 = vld [vmem:[#allocation14 + $0xe4] ss:$16 sps:$4 sm:$0xff]  }
 0x537   :  { %v7066_v51 = vmul.f32 %v5236_v50, %v5234_v8  ;;  %v5238_v40 = vpop.eup %5237  ;;  %v7152_v8 = vld [vmem:[#allocation14 + $0xc4] ss:$16 sps:$4 sm:$0xff]   ;;  %v7155_v50 = vld [vmem:[#allocation14 + $0xcc] ss:$16 sps:$4 sm:$0xff]  }
 0x538   :  { %v5240_v25 = vpop.eup %5239 }
 0x539   :  { %v7070_v17 = vmul.f32 %v5240_v25, %v5238_v40  ;;  %v7158_v40 = vld [vmem:[#allocation14 + $0xc0] ss:$16 sps:$4 sm:$0xff]  }
 0x53a   :  { %v5242_v10 = vpop.eup %5241 }
 0x53b   :  { %v2843_v12 = vadd.f32 1.0, %v5242_v10  ;;  %v2885_v59 = vpack.c.bf16 %v7070_v17, %v7066_v51  ;;  %v5244_v42 = vpop.eup %5243  ;;  %v7167_v10 = vld [vmem:[#allocation14 + $0xec] ss:$16 sps:$4 sm:$0xff]  }
 0x53c   :  { %v5246_v4 = vpop.eup %5245  ;;  %v2844_v41 = vadd.f32 1.0, %v5244_v42 }
 0x53d   :  { %5255 = vrcp.f32 %v2843_v12  ;;  %2933 = vmatmul.mubr.bf16.vlgmr.msra.gmra.mrb[96].mxu0 %v2885_v59  ;;  %2976 = vmatmul.mubr.bf16.vlgmr.msra.gmra.mrb[96].mxu1 %v2885_v59  ;;  %v2846_v2 = vadd.f32 1.0, %v5246_v4  ;;  %v5248_v13 = vpop.eup %5247  ;;  %v7172_v4 = vld [vmem:[#allocation14 + $0xe0] ss:$16 sps:$4 sm:$0xff]  }
 0x53e   :  { %5257 = vtanh.f32 %v2824_v11  ;;  %3056 = vmatpush1.bf16.msra.mxu0 %v7076_v53  ;;  %3099 = vmatpush1.bf16.msra.mxu1 %v7079_v30  ;;  %v2847_v0 = vadd.f32 1.0, %v5248_v13  ;;  %v5250_v28 = vpop.eup %5249  ;;  %v7142_v11 = vld [vmem:[#allocation14 + $0xac] ss:$16 sps:$4 sm:$0xff]   ;;  %8030 = vst [vmem:[#allocation68_spill] sm:$0xff] %v7172_v4  ;;  %v7242_v13 = vld [vmem:[#allocation12 + $0x80] ss:$16 sps:$4 sm:$0xff]  }
 0x53f   :  { %5259 = vrcp.f32 %v2844_v41  ;;  %3057 = vmatprep.subr.bf16.mxu0 %v7082_v21  ;;  %3100 = vmatprep.subr.bf16.mxu1 %v7085_v45  ;;  %v5252_v5 = vpop.eup %5251  ;;  %v7175_v41 = vld [vmem:[#allocation14 + $0xe8] ss:$16 sps:$4 sm:$0xff]   ;;  %8051 = vst [vmem:[#allocation89_spill] sm:$0xff] %v7242_v13 }
 0x540   :  { %5261 = vrcp.f32 %v2846_v2  ;;  %3087 = vmatprep.mubr.bf16.mxu0 %v7893_v56  ;;  %3130 = vmatprep.mubr.bf16.mxu1 %v7893_v56  ;;  %v5254_v1 = vpop.eup %5253  ;;  %v2845_v29 = vadd.f32 1.0, %v5252_v5  ;;  %8031 = vst [vmem:[#allocation69_spill] sm:$0xff] %v7175_v41 }
 0x541   :  { %5263 = vrcp.f32 %v2847_v0  ;;  %v7180_v0 = vld [vmem:[#allocation12 + $0x4] ss:$16 sps:$4 sm:$0xff]  }
 0x542   :  { %3058 = vmatpush1.bf16.msra.mxu0 %v7090_v3  ;;  %3101 = vmatpush1.bf16.msra.mxu1 %v7093_v63  ;;  %5265 = vrcp.f32 %v2845_v29  ;;  %8032 = vst [vmem:[#allocation70_spill] sm:$0xff] %v7180_v0  ;;  %v7201_v29 = vld [vmem:[#allocation12 + $0x2c] ss:$16 sps:$4 sm:$0xff]  }
 0x543   :  { %3059 = vmatprep.subr.bf16.mxu0 %v7096_v55  ;;  %3102 = vmatprep.subr.bf16.mxu1 %v7099_v38  ;;  %8038 = vst [vmem:[#allocation78_spill] sm:$0xff] %v7201_v29 }
 0x546   :  { %3060 = vmatpush1.bf16.msra.mxu0 %v7102_v14  ;;  %3103 = vmatpush1.bf16.msra.mxu1 %v7105_v37 }
 0x547   :  { %v5256_v27 = vpop.eup %5255  ;;  %3061 = vmatprep.subr.bf16.mxu0 %v7108_v32  ;;  %3104 = vmatprep.subr.bf16.mxu1 %v7111_v39 }
 0x548   :  { %v5258_v52 = vpop.eup %5257  ;;  %v2865_v22 = vmul.f32 %v5256_v27, %v5250_v28  ;;  %v7183_v28 = vld [vmem:[#allocation12 + $0xc] ss:$16 sps:$4 sm:$0xff]  }
 0x549   :  { %v5260_v7 = vpop.eup %5259  ;;  %8033 = vst [vmem:[#allocation71_spill] sm:$0xff] %v7183_v28 }
 0x54a   :  { %v5262_v54 = vpop.eup %5261  ;;  %v2863_v31 = vmul.f32 %v5260_v7, %v6975_v62  ;;  %3062 = vmatpush1.bf16.msra.mxu0 %v7115_v20  ;;  %3105 = vmatpush1.bf16.msra.mxu1 %v7118_v47  ;;  %v2848_v62 = vadd.f32 1.0, %v5254_v1  ;;  %v7198_v7 = vld [vmem:[#allocation12 + $0x24] ss:$16 sps:$4 sm:$0xff]   ;;  %v7239_v1 = vld [vmem:[#allocation12 + $0x8c] ss:$16 sps:$4 sm:$0xff]  }
 0x54b   :  { %v2866_v15 = vmul.f32 %v5262_v54, %v5258_v52  ;;  %3063 = vmatprep.subr.bf16.mxu0 %v7121_v57  ;;  %3106 = vmatprep.subr.bf16.mxu1 %v7124_v60  ;;  %v5264_v26 = vpop.eup %5263  ;;  %v7192_v52 = vld [vmem:[#allocation12] ss:$16 sps:$4 sm:$0xff]   ;;  %8037 = vst [vmem:[#allocation75_spill] sm:$0xff] %v7198_v7  ;;  %8050 = vst [vmem:[#allocation88_spill] sm:$0xff] %v7239_v1 }
 0x54c   :  { %v7127_v6 = vadd.f32 %v2865_v22, %v2863_v31  ;;  %v2864_v24 = vmul.f32 %v5264_v26, %v6983_v9  ;;  %v7146_v9 = vld [vmem:[#allocation14 + $0xa0] ss:$16 sps:$4 sm:$0xff]   ;;  %v5266_v25 = vpop.eup %5265  ;;  %8035 = vst [vmem:[#allocation73_spill] sm:$0xff] %v7192_v52  ;;  %v7195_v22 = vld [vmem:[#allocation12 + $0x8] ss:$16 sps:$4 sm:$0xff]  }
 0x54d   :  { %8036 = vst [vmem:[#allocation76_spill] sm:$0xff] %v7195_v22  ;;  %v7206_v54 = vld [vmem:[#allocation12 + $0x20] ss:$16 sps:$4 sm:$0xff]   ;;  %v7209_v31 = vld [vmem:[#allocation12 + $0x28] ss:$16 sps:$4 sm:$0xff]  }
 0x54e   :  { %5267 = vtanh.f32 %v7127_v6  ;;  %3064 = vmatpush1.bf16.msra.mxu0 %v7131_v36  ;;  %3107 = vmatpush1.bf16.msra.mxu1 %v7134_v19  ;;  %v7137_v34 = vadd.f32 %v2866_v15, %v2864_v24  ;;  %8039 = vst [vmem:[#allocation79_spill] sm:$0xff] %v7206_v54  ;;  %8040 = vst [vmem:[#allocation74_spill] sm:$0xff] %v7209_v31  ;;  %v7212_v15 = vld [vmem:[#allocation12 + $0x44] ss:$16 sps:$4 sm:$0xff]   ;;  %v7215_v26 = vld [vmem:[#allocation12 + $0x4c] ss:$16 sps:$4 sm:$0xff]  }
 0x54f   :  { %3065 = vmatprep.subr.bf16.mxu0 %v7139_v49  ;;  %3108 = vmatprep.subr.bf16.mxu1 %v7142_v11  ;;  %5269 = vrcp.f32 %v2848_v62  ;;  %8041 = vst [vmem:[#allocation77_spill] sm:$0xff] %v7212_v15  ;;  %8042 = vst [vmem:[#allocation80_spill] sm:$0xff] %v7215_v26  ;;  %v7218_v62 = vld [vmem:[#allocation12 + $0x40] ss:$16 sps:$4 sm:$0xff]   ;;  %v7221_v24 = vld [vmem:[#allocation12 + $0x48] ss:$16 sps:$4 sm:$0xff]  }
 0x550   :  { %5271 = vtanh.f32 %v7137_v34  ;;  %8043 = vst [vmem:[#allocation81_spill] sm:$0xff] %v7218_v62  ;;  %8044 = vst [vmem:[#allocation82_spill] sm:$0xff] %v7221_v24 }
 0x552   :  { %3066 = vmatpush1.bf16.msra.mxu0 %v7146_v9  ;;  %3109 = vmatpush1.bf16.msra.mxu1 %v7149_v58 }
 0x553   :  { %3067 = vmatprep.subr.bf16.mxu0 %v7152_v8  ;;  %3110 = vmatprep.subr.bf16.mxu1 %v7155_v50 }
 0x556   :  { %3068 = vmatpush1.bf16.msra.mxu0 %v7158_v40  ;;  %3111 = vmatpush1.bf16.msra.mxu1 %v7161_v43 }
 0x557   :  { %3069 = vmatprep.subr.bf16.mxu0 %v7164_v23  ;;  %3112 = vmatprep.subr.bf16.mxu1 %v7167_v10 }
 0x558   :  { %v5268_v12 = vpop.eup %5267 }
 0x559   :  { %v7170_v59 = vmul.f32 %v5268_v12, %v5266_v25  ;;  %v5270_v42 = vpop.eup %5269  ;;  %v7224_v25 = vld [vmem:[#allocation12 + $0x64] ss:$16 sps:$4 sm:$0xff]   ;;  %v7227_v12 = vld [vmem:[#allocation12 + $0x6c] ss:$16 sps:$4 sm:$0xff]  }
 0x55a   :  { %3070 = vmatpush1.bf16.msra.mxu0 %v7172_v4  ;;  %3113 = vmatpush1.bf16.msra.mxu1 %v7175_v41  ;;  %v5272_v2 = vpop.eup %5271  ;;  %8045 = vst [vmem:[#allocation83_spill] sm:$0xff] %v7224_v25  ;;  %8046 = vst [vmem:[#allocation84_spill] sm:$0xff] %v7227_v12 }
 0x55b   :  { %8029 = vst [vmem:[#allocation27_spill] sm:$0xff] %v7170_v59  ;;  %3224 = vmatprep.subr.bf16.mxu0 %v7180_v0  ;;  %3267 = vmatprep.subr.bf16.mxu1 %v7183_v28  ;;  %v7186_v5 = vmul.f32 %v5272_v2, %v5270_v42  ;;  %v7230_v42 = vld [vmem:[#allocation12 + $0x60] ss:$16 sps:$4 sm:$0xff]   ;;  %v7233_v2 = vld [vmem:[#allocation12 + $0x68] ss:$16 sps:$4 sm:$0xff]  }
 0x55c   :  { %8047 = vst [vmem:[#allocation85_spill] sm:$0xff] %v7230_v42  ;;  %8048 = vst [vmem:[#allocation86_spill] sm:$0xff] %v7233_v2 }
 0x55d   :  { %8034 = vst [vmem:[#allocation72_spill] sm:$0xff] %v7186_v5  ;;  %v2886_v27 = vpack.c.bf16 %v7186_v5, %v7170_v59 }
 0x55f   :  { %3088 = vmatmul.mubr.bf16.vlgmr.msra.gmra.mrb[100].mxu0 %v2886_v27  ;;  %3131 = vmatmul.mubr.bf16.vlgmr.msra.gmra.mrb[100].mxu1 %v2886_v27  ;;  %v7236_v27 = vld [vmem:[#allocation12 + $0x84] ss:$16 sps:$4 sm:$0xff]  }
 0x560   :  { %3225 = vmatpush1.bf16.msra.mxu0 %v7192_v52  ;;  %3268 = vmatpush1.bf16.msra.mxu1 %v7195_v22  ;;  %8049 = vst [vmem:[#allocation87_spill] sm:$0xff] %v7236_v27 }
 0x561   :  { %3226 = vmatprep.subr.bf16.mxu0 %v7198_v7  ;;  %3269 = vmatprep.subr.bf16.mxu1 %v7201_v29 }
 0x562   :  { %3256 = vmatprep.mubr.bf16.mxu0 %v7893_v56  ;;  %3299 = vmatprep.mubr.bf16.mxu1 %v7893_v56 }
 0x564   :  { %3227 = vmatpush1.bf16.msra.mxu0 %v7206_v54  ;;  %3270 = vmatpush1.bf16.msra.mxu1 %v7209_v31 }
 0x565   :  { %3228 = vmatprep.subr.bf16.mxu0 %v7212_v15  ;;  %3271 = vmatprep.subr.bf16.mxu1 %v7215_v26  ;;  %v8070_v26 = vld [vmem:[#allocation35_spill] sm:$0xff] }
 0x566   :  { %v2895_v15 = vunpack.c.l.bf16 %v8070_v26  ;;  %v2899_v59 = vunpack.c.h.bf16 %v8070_v26 }
 0x568   :  { %3229 = vmatpush1.bf16.msra.mxu0 %v7218_v62  ;;  %3272 = vmatpush1.bf16.msra.mxu1 %v7221_v24  ;;  %v8069_v62 = vld [vmem:[#allocation34_spill] sm:$0xff] }
 0x569   :  { %3230 = vmatprep.subr.bf16.mxu0 %v7224_v25  ;;  %3273 = vmatprep.subr.bf16.mxu1 %v7227_v12  ;;  %v8068_v12 = vld [vmem:[#allocation33_spill] sm:$0xff]  ;;  %v2897_v44 = vunpack.c.h.bf16 %v8069_v62 }
 0x56a   :  { %v2898_v7 = vunpack.c.h.bf16 %v8068_v12 }
 0x56c   :  { %3231 = vmatpush1.bf16.msra.mxu0 %v7230_v42  ;;  %3274 = vmatpush1.bf16.msra.mxu1 %v7233_v2  ;;  %v7251_v2 = vld [vmem:[#allocation12 + $0xac] ss:$16 sps:$4 sm:$0xff]  }
 0x56d   :  { %3232 = vmatprep.subr.bf16.mxu0 %v7236_v27  ;;  %3275 = vmatprep.subr.bf16.mxu1 %v7239_v1  ;;  %8054 = vst [vmem:[#allocation92_spill] sm:$0xff] %v7251_v2  ;;  %v7254_v27 = vld [vmem:[#allocation12 + $0xa0] ss:$16 sps:$4 sm:$0xff]   ;;  %v7257_v1 = vld [vmem:[#allocation12 + $0xa8] ss:$16 sps:$4 sm:$0xff]  }
 0x56e   :  { %8055 = vst [vmem:[#allocation93_spill] sm:$0xff] %v7254_v27  ;;  %8056 = vst [vmem:[#allocation94_spill] sm:$0xff] %v7257_v1 }
 0x570   :  { %3233 = vmatpush1.bf16.msra.mxu0 %v7242_v13  ;;  %3276 = vmatpush1.bf16.msra.mxu1 %v7245_v18  ;;  %v7260_v13 = vld [vmem:[#allocation12 + $0xc4] ss:$16 sps:$4 sm:$0xff]   ;;  %v7263_v18 = vld [vmem:[#allocation12 + $0xcc] ss:$16 sps:$4 sm:$0xff]  }
 0x571   :  { %3234 = vmatprep.subr.bf16.mxu0 %v7248_v48  ;;  %3277 = vmatprep.subr.bf16.mxu1 %v7251_v2  ;;  %8057 = vst [vmem:[#allocation95_spill] sm:$0xff] %v7260_v13  ;;  %8058 = vst [vmem:[#allocation96_spill] sm:$0xff] %v7263_v18  ;;  %v7266_v48 = vld [vmem:[#allocation12 + $0xc0] ss:$16 sps:$4 sm:$0xff]   ;;  %v7269_v2 = vld [vmem:[#allocation12 + $0xc8] ss:$16 sps:$4 sm:$0xff]  }
 0x572   :  { %8059 = vst [vmem:[#allocation97_spill] sm:$0xff] %v7266_v48  ;;  %8060 = vst [vmem:[#allocation98_spill] sm:$0xff] %v7269_v2 }
 0x574   :  { %3235 = vmatpush1.bf16.msra.mxu0 %v7254_v27  ;;  %3278 = vmatpush1.bf16.msra.mxu1 %v7257_v1  ;;  %v7272_v27 = vld [vmem:[#allocation12 + $0xe4] ss:$16 sps:$4 sm:$0xff]   ;;  %v7275_v1 = vld [vmem:[#allocation12 + $0xec] ss:$16 sps:$4 sm:$0xff]  }
 0x575   :  { %3236 = vmatprep.subr.bf16.mxu0 %v7260_v13  ;;  %3279 = vmatprep.subr.bf16.mxu1 %v7263_v18  ;;  %8061 = vst [vmem:[#allocation99_spill] sm:$0xff] %v7272_v27  ;;  %8062 = vst [vmem:[#allocation100_spill] sm:$0xff] %v7275_v1  ;;  %v7278_v13 = vld [vmem:[#allocation12 + $0xe0] ss:$16 sps:$4 sm:$0xff]   ;;  %v7281_v18 = vld [vmem:[#allocation12 + $0xe8] ss:$16 sps:$4 sm:$0xff]  }
 0x576   :  { %8063 = vst [vmem:[#allocation101_spill] sm:$0xff] %v7278_v13  ;;  %8064 = vst [vmem:[#allocation102_spill] sm:$0xff] %v7281_v18 }
 0x578   :  { %3237 = vmatpush1.bf16.msra.mxu0 %v7266_v48  ;;  %3280 = vmatpush1.bf16.msra.mxu1 %v7269_v2  ;;  %v7284_v48 = vld [vmem:[#allocation14 + $0x4] ss:$16 sps:$4 sm:$0xff]   ;;  %v7287_v2 = vld [vmem:[#allocation14 + $0xc] ss:$16 sps:$4 sm:$0xff]  }
 0x579   :  { %3238 = vmatprep.subr.bf16.mxu0 %v7272_v27  ;;  %3281 = vmatprep.subr.bf16.mxu1 %v7275_v1  ;;  %8065 = vst [vmem:[#allocation103_spill] sm:$0xff] %v7284_v48  ;;  %8066 = vst [vmem:[#allocation104_spill] sm:$0xff] %v7287_v2  ;;  %v8067_v27 = vld [vmem:[#allocation32_spill] sm:$0xff]  ;;  %v2894_v1 = vunpack.c.l.bf16 %v8068_v12 }
 0x57a   :  { %v2892_v42 = vunpack.c.l.bf16 %v8067_v27 }
 0x57c   :  { %3239 = vmatpush1.bf16.msra.mxu0 %v7278_v13  ;;  %3282 = vmatpush1.bf16.msra.mxu1 %v7281_v18  ;;  %v2893_v13 = vunpack.c.l.bf16 %v8069_v62 }
 0x57d   :  { %3379 = vmatprep.subr.bf16.mxu0 %v7284_v48  ;;  %3422 = vmatprep.subr.bf16.mxu1 %v7287_v2  ;;  %v2896_v48 = vunpack.c.h.bf16 %v8067_v27 }
 0x610   :  { %v2934_v25 = vpop.f32.mrb[96].mxu0  ;;  %v2977_v24 = vpop.f32.mrb[96].mxu1 }
 0x611   :  { %v2986_v31 = vadd.f32 %v2934_v25, %v2892_v42  ;;  %v2988_v18 = vadd.f32 %v2977_v24, %v2894_v1  ;;  %v2936_v54 = vpop.f32.mrb[97].mxu0  ;;  %v2979_v29 = vpop.f32.mrb[97].mxu1 }
 0x612   :  { %v2987_v22 = vadd.f32 %v2936_v54, %v2893_v13  ;;  %v2989_v2 = vadd.f32 %v2979_v29, %v2895_v15  ;;  %v2938_v52 = vpop.f32.mrb[98].mxu0  ;;  %v2981_v5 = vpop.f32.mrb[98].mxu1 }
 0x613   :  { %v4581_v46 = vmul.f32 -1.442695, %v2986_v31  ;;  %v2990_v28 = vadd.f32 %v2938_v52, %v2896_v48  ;;  %v2992_v0 = vadd.f32 %v2981_v5, %v2898_v7  ;;  %v2940_v41 = vpop.f32.mrb[99].mxu0  ;;  %v2983_v25 = vpop.f32.mrb[99].mxu1  ;;  %v4583_v13 = vmul.f32 -1.442695, %v2988_v18 }
 0x614   :  { %v4582_v1 = vmul.f32 -1.442695, %v2987_v22  ;;  %v2991_v24 = vadd.f32 %v2940_v41, %v2897_v44  ;;  %v2993_v42 = vadd.f32 %v2983_v25, %v2899_v59 }
 0x615   :  { %5273 = vpow2.f32 %v4581_v46  ;;  %v4584_v27 = vmul.f32 -1.442695, %v2990_v28  ;;  %v4586_v29 = vmul.f32 -1.442695, %v2992_v0 }
 0x616   :  { %v4585_v4 = vmul.f32 -1.442695, %v2991_v24  ;;  %5275 = vpow2.f32 %v4582_v1 }
 0x617   :  { %5277 = vpow2.f32 %v4584_v27 }
 0x618   :  { %5279 = vpow2.f32 %v4585_v4 }
 0x619   :  { %5281 = vtanh.f32 %v2989_v2 }
 0x61a   :  { %5283 = vpow2.f32 %v4583_v13  ;;  %v8072_v13 = vld [vmem:[#allocation61_spill] sm:$0xff] }
 0x61b   :  { %5285 = vpow2.f32 %v4586_v29  ;;  %v3049_v29 = vunpack.c.l.bf16 %v8072_v13 }
 0x61f   :  { %v5274_v54 = vpop.eup %5273 }
 0x620   :  { %v3012_v15 = vadd.f32 1.0, %v5274_v54  ;;  %v5276_v31 = vpop.eup %5275 }
 0x621   :  { %v5278_v48 = vpop.eup %5277  ;;  %v3013_v5 = vadd.f32 1.0, %v5276_v31  ;;  %v8073_v31 = vld [vmem:[#allocation62_spill] sm:$0xff] }
 0x622   :  { %5287 = vrcp.f32 %v3012_v15  ;;  %v3015_v52 = vadd.f32 1.0, %v5278_v48  ;;  %v5280_v44 = vpop.eup %5279  ;;  %v3048_v48 = vunpack.c.l.bf16 %v8073_v31 }
 0x623   :  { %5289 = vtanh.f32 %v2993_v42  ;;  %v3016_v46 = vadd.f32 1.0, %v5280_v44  ;;  %v5282_v59 = vpop.eup %5281  ;;  %v8071_v42 = vld [vmem:[#allocation60_spill] sm:$0xff] }
 0x624   :  { %5291 = vrcp.f32 %v3013_v5  ;;  %v5284_v4 = vpop.eup %5283  ;;  %v3047_v27 = vunpack.c.l.bf16 %v8071_v42  ;;  %v8074_v5 = vld [vmem:[#allocation63_spill] sm:$0xff] }
 0x625   :  { %5293 = vrcp.f32 %v3015_v52  ;;  %v5286_v18 = vpop.eup %5285  ;;  %v3014_v7 = vadd.f32 1.0, %v5284_v4  ;;  %v3051_v52 = vunpack.c.h.bf16 %v8071_v42 }
 0x626   :  { %5295 = vrcp.f32 %v3016_v46  ;;  %v3017_v1 = vadd.f32 1.0, %v5286_v18  ;;  %v3053_v18 = vunpack.c.h.bf16 %v8072_v13 }
 0x627   :  { %5297 = vrcp.f32 %v3014_v7  ;;  %v3052_v7 = vunpack.c.h.bf16 %v8073_v31 }
 0x62c   :  { %v5288_v41 = vpop.eup %5287 }
 0x62d   :  { %v5290_v0 = vpop.eup %5289  ;;  %v3034_v28 = vmul.f32 %v5288_v41, %v5282_v59 }
 0x62e   :  { %v5292_v22 = vpop.eup %5291 }
 0x62f   :  { %v5294_v26 = vpop.eup %5293  ;;  %v3032_v62 = vmul.f32 %v5292_v22, %v7051_v35  ;;  %v3050_v35 = vunpack.c.l.bf16 %v8074_v5 }
 0x630   :  { %v3035_v12 = vmul.f32 %v5294_v26, %v5290_v0  ;;  %v5296_v2 = vpop.eup %5295 }
 0x631   :  { %v7299_v25 = vadd.f32 %v3034_v28, %v3032_v62  ;;  %v3033_v24 = vmul.f32 %v5296_v2, %v7060_v16 }
 0x632   :  { %v3089_v54 = vpop.f32.mrb[100].mxu0  ;;  %v3132_v15 = vpop.f32.mrb[100].mxu1 }
 0x633   :  { %5299 = vtanh.f32 %v7299_v25  ;;  %v7308_v44 = vadd.f32 %v3035_v12, %v3033_v24  ;;  %v3141_v46 = vadd.f32 %v3089_v54, %v3047_v27  ;;  %v3143_v59 = vadd.f32 %v3132_v15, %v3049_v29  ;;  %v3091_v4 = vpop.f32.mrb[101].mxu0  ;;  %v3134_v16 = vpop.f32.mrb[101].mxu1 }
 0x634   :  { %5301 = vrcp.f32 %v3017_v1  ;;  %v3142_v41 = vadd.f32 %v3091_v4, %v3048_v48  ;;  %v3144_v0 = vadd.f32 %v3134_v16, %v3050_v35  ;;  %v3093_v28 = vpop.f32.mrb[102].mxu0  ;;  %v3136_v22 = vpop.f32.mrb[102].mxu1  ;;  %v3054_v12 = vunpack.c.h.bf16 %v8074_v5 }
 0x635   :  { %5303 = vtanh.f32 %v7308_v44  ;;  %v4587_v26 = vmul.f32 -1.442695, %v3141_v46  ;;  %v3145_v62 = vadd.f32 %v3093_v28, %v3051_v52  ;;  %v3095_v2 = vpop.f32.mrb[103].mxu0  ;;  %v3138_v24 = vpop.f32.mrb[103].mxu1  ;;  %v3147_v27 = vadd.f32 %v3136_v22, %v3053_v18 }
 0x636   :  { %v4588_v42 = vmul.f32 -1.442695, %v3142_v41  ;;  %v3146_v29 = vadd.f32 %v3095_v2, %v3052_v7  ;;  %v3148_v1 = vadd.f32 %v3138_v24, %v3054_v12  ;;  %v5298_v15 = vpop.eup %5297  ;;  %v4589_v46 = vmul.f32 -1.442695, %v3143_v59 }
 0x637   :  { %5305 = vpow2.f32 %v4587_v26  ;;  %v4590_v13 = vmul.f32 -1.442695, %v3145_v62  ;;  %v4592_v4 = vmul.f32 -1.442695, %v3147_v27  ;;  %v8075_v5 = vmax.f32 %v6952_v61, %v7066_v51 }
 0x638   :  { %v4591_v54 = vmul.f32 -1.442695, %v3146_v29  ;;  %5307 = vpow2.f32 %v4588_v42  ;;  %v8076_v22 = vmax.f32 %v6956_v33, %v7070_v17 }
 0x639   :  { %5309 = vpow2.f32 %v4590_v13 }
 0x63a   :  { %5311 = vpow2.f32 %v4591_v54 }
 0x63b   :  { %5313 = vtanh.f32 %v3144_v0 }
 0x63c   :  { %5315 = vpow2.f32 %v4589_v46 }
 0x63d   :  { %v5300_v48 = vpop.eup %5299  ;;  %5317 = vpow2.f32 %v4592_v4 }
 0x63e   :  { %v3040_v31 = vmul.f32 %v5300_v48, %v5298_v15  ;;  %v5302_v35 = vpop.eup %5301 }
 0x63f   :  { %v5304_v52 = vpop.eup %5303 }
 0x640   :  { %v7317_v16 = vmax.f32 %v8075_v5, %v3040_v31  ;;  %v3041_v18 = vmul.f32 %v5304_v52, %v5302_v35 }
 0x641   :  { %v5306_v41 = vpop.eup %5305 }
 0x642   :  { %v3167_v28 = vadd.f32 1.0, %v5306_v41  ;;  %v7322_v7 = vmax.f32 %v8076_v22, %v3041_v18  ;;  %v3209_v26 = vpack.c.bf16 %v3041_v18, %v3040_v31  ;;  %v5308_v62 = vpop.eup %5307  ;;  %v8077_v18 = vld [vmem:[#allocation68_spill] sm:$0xff]  ;;  %v8078_v41 = vld [vmem:[#allocation69_spill] sm:$0xff]  ;;  %v8079_v22 = vld [vmem:[#allocation70_spill] sm:$0xff] }
 0x643   :  { %v5310_v59 = vpop.eup %5309  ;;  %v3168_v2 = vadd.f32 1.0, %v5308_v62  ;;  %v8081_v62 = vld [vmem:[#allocation25_spill] sm:$0xff] }
 0x644   :  { %5319 = vrcp.f32 %v3167_v28  ;;  %3257 = vmatmul.mubr.bf16.vlgmr.msra.gmra.mrb[104].mxu0 %v3209_v26  ;;  %3300 = vmatmul.mubr.bf16.vlgmr.msra.gmra.mrb[104].mxu1 %v3209_v26  ;;  %v3170_v61 = vadd.f32 1.0, %v5310_v59  ;;  %v5312_v51 = vpop.eup %5311  ;;  %v8080_v26 = vld [vmem:[#allocation71_spill] sm:$0xff] }
 0x645   :  { %5321 = vtanh.f32 %v3148_v1  ;;  %3380 = vmatpush1.bf16.msra.mxu0 %v7076_v53  ;;  %3423 = vmatpush1.bf16.msra.mxu1 %v7079_v30  ;;  %v3171_v33 = vadd.f32 1.0, %v5312_v51  ;;  %v5314_v17 = vpop.eup %5313  ;;  %v8082_v59 = vld [vmem:[#allocation27_spill] sm:$0xff] }
 0x646   :  { %5323 = vrcp.f32 %v3168_v2  ;;  %3381 = vmatprep.subr.bf16.mxu0 %v7082_v21  ;;  %3424 = vmatprep.subr.bf16.mxu1 %v7085_v45  ;;  %v5316_v0 = vpop.eup %5315  ;;  %v8083_v2 = vmax.f32 %v8081_v62, %v8082_v59  ;;  %v8104_v62 = vld [vmem:[#allocation88_spill] sm:$0xff]  ;;  %v8105_v59 = vld [vmem:[#allocation89_spill] sm:$0xff] }
 0x647   :  { %5325 = vrcp.f32 %v3170_v61  ;;  %3411 = vmatprep.mubr.bf16.mxu0 %v7893_v56  ;;  %3454 = vmatprep.mubr.bf16.mxu1 %v7893_v56  ;;  %v5318_v12 = vpop.eup %5317  ;;  %v3169_v13 = vadd.f32 1.0, %v5316_v0 }
 0x648   :  { %5327 = vrcp.f32 %v3171_v33  ;;  %v3172_v35 = vadd.f32 1.0, %v5318_v12  ;;  %v8085_v33 = vld [vmem:[#allocation26_spill] sm:$0xff] }
 0x649   :  { %3382 = vmatpush1.bf16.msra.mxu0 %v7090_v3  ;;  %3425 = vmatpush1.bf16.msra.mxu1 %v7093_v63  ;;  %5329 = vrcp.f32 %v3169_v13  ;;  %v8092_v13 = vld [vmem:[#allocation78_spill] sm:$0xff] }
 0x64a   :  { %3383 = vmatprep.subr.bf16.mxu0 %v7096_v55  ;;  %3426 = vmatprep.subr.bf16.mxu1 %v7099_v38 }
 0x64d   :  { %3384 = vmatpush1.bf16.msra.mxu0 %v7102_v14  ;;  %3427 = vmatpush1.bf16.msra.mxu1 %v7105_v37 }
 0x64e   :  { %v5320_v24 = vpop.eup %5319  ;;  %3385 = vmatprep.subr.bf16.mxu0 %v7108_v32  ;;  %3428 = vmatprep.subr.bf16.mxu1 %v7111_v39 }
 0x64f   :  { %v5322_v42 = vpop.eup %5321  ;;  %v3189_v27 = vmul.f32 %v5320_v24, %v5314_v17  ;;  %v8086_v17 = vld [vmem:[#allocation72_spill] sm:$0xff] }
 0x650   :  { %v5324_v29 = vpop.eup %5323  ;;  %v8087_v0 = vmax.f32 %v8085_v33, %v8086_v17  ;;  %v8108_v33 = vld [vmem:[#allocation92_spill] sm:$0xff]  ;;  %v8109_v17 = vld [vmem:[#allocation93_spill] sm:$0xff] }
 0x651   :  { %v5326_v1 = vpop.eup %5325  ;;  %v3187_v54 = vmul.f32 %v5324_v29, %v7127_v6  ;;  %3386 = vmatpush1.bf16.msra.mxu0 %v7115_v20  ;;  %3429 = vmatpush1.bf16.msra.mxu1 %v7118_v47  ;;  %v8091_v29 = vld [vmem:[#allocation75_spill] sm:$0xff] }
 0x652   :  { %v3190_v15 = vmul.f32 %v5326_v1, %v5322_v42  ;;  %3387 = vmatprep.subr.bf16.mxu0 %v7121_v57  ;;  %3430 = vmatprep.subr.bf16.mxu1 %v7124_v60  ;;  %v5328_v48 = vpop.eup %5327  ;;  %v8089_v42 = vld [vmem:[#allocation73_spill] sm:$0xff]  ;;  %v8093_v1 = vld [vmem:[#allocation79_spill] sm:$0xff] }
 0x653   :  { %v7343_v31 = vadd.f32 %v3189_v27, %v3187_v54  ;;  %v3188_v46 = vmul.f32 %v5328_v48, %v7137_v34  ;;  %v5330_v34 = vpop.eup %5329  ;;  %v8090_v27 = vld [vmem:[#allocation76_spill] sm:$0xff]  ;;  %v8094_v54 = vld [vmem:[#allocation74_spill] sm:$0xff] }
 0x654   :  { %v8096_v48 = vld [vmem:[#allocation80_spill] sm:$0xff] }
 0x655   :  { %5331 = vtanh.f32 %v7343_v31  ;;  %3388 = vmatpush1.bf16.msra.mxu0 %v7131_v36  ;;  %3431 = vmatpush1.bf16.msra.mxu1 %v7134_v19  ;;  %v7349_v6 = vadd.f32 %v3190_v15, %v3188_v46  ;;  %v8095_v15 = vld [vmem:[#allocation77_spill] sm:$0xff]  ;;  %v8098_v46 = vld [vmem:[#allocation82_spill] sm:$0xff] }
 0x656   :  { %3389 = vmatprep.subr.bf16.mxu0 %v7139_v49  ;;  %3432 = vmatprep.subr.bf16.mxu1 %v7142_v11  ;;  %5333 = vrcp.f32 %v3172_v35  ;;  %v8097_v35 = vld [vmem:[#allocation81_spill] sm:$0xff] }
 0x657   :  { %5335 = vtanh.f32 %v7349_v6 }
 0x659   :  { %3390 = vmatpush1.bf16.msra.mxu0 %v7146_v9  ;;  %3433 = vmatpush1.bf16.msra.mxu1 %v7149_v58 }
 0x65a   :  { %3391 = vmatprep.subr.bf16.mxu0 %v7152_v8  ;;  %3434 = vmatprep.subr.bf16.mxu1 %v7155_v50 }
 0x65d   :  { %3392 = vmatpush1.bf16.msra.mxu0 %v7158_v40  ;;  %3435 = vmatpush1.bf16.msra.mxu1 %v7161_v43 }
 0x65e   :  { %3393 = vmatprep.subr.bf16.mxu0 %v7164_v23  ;;  %3436 = vmatprep.subr.bf16.mxu1 %v7167_v10 }
 0x65f   :  { %v5332_v52 = vpop.eup %5331 }
 0x660   :  { %v3195_v4 = vmul.f32 %v5332_v52, %v5330_v34  ;;  %v5334_v5 = vpop.eup %5333  ;;  %v8099_v34 = vld [vmem:[#allocation83_spill] sm:$0xff]  ;;  %v8100_v52 = vld [vmem:[#allocation84_spill] sm:$0xff] }
 0x661   :  { %3394 = vmatpush1.bf16.msra.mxu0 %v8077_v18  ;;  %3437 = vmatpush1.bf16.msra.mxu1 %v8078_v41  ;;  %v5336_v28 = vpop.eup %5335 }
 0x662   :  { %3548 = vmatprep.subr.bf16.mxu0 %v8079_v22  ;;  %3591 = vmatprep.subr.bf16.mxu1 %v8080_v26  ;;  %v7369_v61 = vmax.f32 %v8083_v2, %v3195_v4  ;;  %v3196_v51 = vmul.f32 %v5336_v28, %v5334_v5  ;;  %v8102_v5 = vld [vmem:[#allocation86_spill] sm:$0xff]  ;;  %v8103_v28 = vld [vmem:[#allocation87_spill] sm:$0xff] }
 0x663   :  { %v8106_v2 = vld [vmem:[#allocation90_spill] sm:$0xff] }
 0x664   :  { %8084 = vst [vmem:[#allocation105_spill] sm:$0xff] %v7369_v61  ;;  %v7374_v12 = vmax.f32 %v8087_v0, %v3196_v51  ;;  %v3210_v24 = vpack.c.bf16 %v3196_v51, %v3195_v4  ;;  %v8101_v4 = vld [vmem:[#allocation85_spill] sm:$0xff]  ;;  %v8107_v51 = vld [vmem:[#allocation91_spill] sm:$0xff]  ;;  %v8110_v0 = vld [vmem:[#allocation94_spill] sm:$0xff] }
 0x666   :  { %8088 = vst [vmem:[#allocation106_spill] sm:$0xff] %v7374_v12  ;;  %3412 = vmatmul.mubr.bf16.vlgmr.msra.gmra.mrb[108].mxu0 %v3210_v24  ;;  %3455 = vmatmul.mubr.bf16.vlgmr.msra.gmra.mrb[108].mxu1 %v3210_v24  ;;  %v8111_v24 = vld [vmem:[#allocation95_spill] sm:$0xff] }
 0x667   :  { %3549 = vmatpush1.bf16.msra.mxu0 %v8089_v42  ;;  %3592 = vmatpush1.bf16.msra.mxu1 %v8090_v27 }
 0x668   :  { %3550 = vmatprep.subr.bf16.mxu0 %v8091_v29  ;;  %3593 = vmatprep.subr.bf16.mxu1 %v8092_v13 }
 0x669   :  { %3580 = vmatprep.mubr.bf16.mxu0 %v7893_v56  ;;  %3623 = vmatprep.mubr.bf16.mxu1 %v7893_v56 }
 0x66b   :  { %3551 = vmatpush1.bf16.msra.mxu0 %v8093_v1  ;;  %3594 = vmatpush1.bf16.msra.mxu1 %v8094_v54 }
 0x66c   :  { %3552 = vmatprep.subr.bf16.mxu0 %v8095_v15  ;;  %3595 = vmatprep.subr.bf16.mxu1 %v8096_v48 }
 0x66f   :  { %3553 = vmatpush1.bf16.msra.mxu0 %v8097_v35  ;;  %3596 = vmatpush1.bf16.msra.mxu1 %v8098_v46  ;;  %v8123_v46 = vld [vmem:[#allocation38_spill] sm:$0xff]  ;;  %v8124_v35 = vld [vmem:[#allocation39_spill] sm:$0xff] }
 0x670   :  { %3554 = vmatprep.subr.bf16.mxu0 %v8099_v34  ;;  %3597 = vmatprep.subr.bf16.mxu1 %v8100_v52  ;;  %v8122_v52 = vld [vmem:[#allocation37_spill] sm:$0xff]  ;;  %v3221_v29 = vunpack.c.h.bf16 %v8123_v46  ;;  %v3223_v27 = vunpack.c.h.bf16 %v8124_v35 }
 0x673   :  { %3555 = vmatpush1.bf16.msra.mxu0 %v8101_v4  ;;  %3598 = vmatpush1.bf16.msra.mxu1 %v8102_v5  ;;  %v8112_v4 = vld [vmem:[#allocation96_spill] sm:$0xff]  ;;  %v8113_v5 = vld [vmem:[#allocation97_spill] sm:$0xff] }
 0x674   :  { %3556 = vmatprep.subr.bf16.mxu0 %v8103_v28  ;;  %3599 = vmatprep.subr.bf16.mxu1 %v8104_v62  ;;  %v8114_v28 = vld [vmem:[#allocation98_spill] sm:$0xff]  ;;  %v8115_v62 = vld [vmem:[#allocation99_spill] sm:$0xff] }
 0x677   :  { %3557 = vmatpush1.bf16.msra.mxu0 %v8105_v59  ;;  %3600 = vmatpush1.bf16.msra.mxu1 %v8106_v2  ;;  %v8116_v59 = vld [vmem:[#allocation100_spill] sm:$0xff]  ;;  %v8117_v2 = vld [vmem:[#allocation101_spill] sm:$0xff] }
 0x678   :  { %3558 = vmatprep.subr.bf16.mxu0 %v8107_v51  ;;  %3601 = vmatprep.subr.bf16.mxu1 %v8108_v33  ;;  %v8118_v51 = vld [vmem:[#allocation102_spill] sm:$0xff]  ;;  %v8119_v33 = vld [vmem:[#allocation103_spill] sm:$0xff] }
 0x67b   :  { %3559 = vmatpush1.bf16.msra.mxu0 %v8109_v17  ;;  %3602 = vmatpush1.bf16.msra.mxu1 %v8110_v0  ;;  %v8120_v17 = vld [vmem:[#allocation104_spill] sm:$0xff] }
 0x67c   :  { %3560 = vmatprep.subr.bf16.mxu0 %v8111_v24  ;;  %3603 = vmatprep.subr.bf16.mxu1 %v8112_v4  ;;  %v8121_v0 = vld [vmem:[#allocation36_spill] sm:$0xff]  ;;  %v3218_v4 = vunpack.c.l.bf16 %v8122_v52 }
 0x67d   :  { %v3216_v24 = vunpack.c.l.bf16 %v8121_v0 }
 0x67f   :  { %3561 = vmatpush1.bf16.msra.mxu0 %v8113_v5  ;;  %3604 = vmatpush1.bf16.msra.mxu1 %v8114_v28  ;;  %v3217_v28 = vunpack.c.l.bf16 %v8123_v46 }
 0x680   :  { %3562 = vmatprep.subr.bf16.mxu0 %v8115_v62  ;;  %3605 = vmatprep.subr.bf16.mxu1 %v8116_v59  ;;  %v3219_v62 = vunpack.c.l.bf16 %v8124_v35 }
 0x683   :  { %3563 = vmatpush1.bf16.msra.mxu0 %v8117_v2  ;;  %3606 = vmatpush1.bf16.msra.mxu1 %v8118_v51  ;;  %v3220_v51 = vunpack.c.h.bf16 %v8121_v0 }
 0x684   :  { %3703 = vmatprep.subr.bf16.mxu0 %v8119_v33  ;;  %3746 = vmatprep.subr.bf16.mxu1 %v8120_v17  ;;  %v3222_v33 = vunpack.c.h.bf16 %v8122_v52 }
 0x717   :  { %v3258_v34 = vpop.f32.mrb[104].mxu0  ;;  %v3301_v5 = vpop.f32.mrb[104].mxu1 }
 0x718   :  { %v3310_v48 = vadd.f32 %v3258_v34, %v3216_v24  ;;  %v3312_v59 = vadd.f32 %v3301_v5, %v3218_v4  ;;  %v3260_v15 = vpop.f32.mrb[105].mxu0  ;;  %v3303_v2 = vpop.f32.mrb[105].mxu1 }
 0x719   :  { %v3311_v54 = vadd.f32 %v3260_v15, %v3217_v28  ;;  %v3313_v17 = vadd.f32 %v3303_v2, %v3219_v62  ;;  %v3262_v1 = vpop.f32.mrb[106].mxu0  ;;  %v3305_v13 = vpop.f32.mrb[106].mxu1 }
 0x71a   :  { %v4593_v42 = vmul.f32 -1.442695, %v3310_v48  ;;  %v3314_v12 = vadd.f32 %v3262_v1, %v3220_v51  ;;  %v3316_v61 = vadd.f32 %v3305_v13, %v3222_v33  ;;  %v3264_v26 = vpop.f32.mrb[107].mxu0  ;;  %v3307_v34 = vpop.f32.mrb[107].mxu1  ;;  %v4595_v15 = vmul.f32 -1.442695, %v3312_v59 }
 0x71b   :  { %v4594_v4 = vmul.f32 -1.442695, %v3311_v54  ;;  %v3315_v5 = vadd.f32 %v3264_v26, %v3221_v29  ;;  %v3317_v24 = vadd.f32 %v3307_v34, %v3223_v27 }
 0x71c   :  { %5337 = vpow2.f32 %v4593_v42  ;;  %v4596_v0 = vmul.f32 -1.442695, %v3314_v12  ;;  %v4598_v52 = vmul.f32 -1.442695, %v3316_v61 }
 0x71d   :  { %v4597_v22 = vmul.f32 -1.442695, %v3315_v5  ;;  %5339 = vpow2.f32 %v4594_v4 }
 0x71e   :  { %5341 = vpow2.f32 %v4596_v0 }
 0x71f   :  { %5343 = vpow2.f32 %v4597_v22 }
 0x720   :  { %5345 = vtanh.f32 %v3313_v17 }
 0x721   :  { %5347 = vpow2.f32 %v4595_v15  ;;  %v8126_v15 = vld [vmem:[#allocation57_spill] sm:$0xff] }
 0x722   :  { %5349 = vpow2.f32 %v4598_v52  ;;  %v3373_v52 = vunpack.c.l.bf16 %v8126_v15 }
 0x726   :  { %v5338_v28 = vpop.eup %5337 }
 0x727   :  { %v3336_v46 = vadd.f32 1.0, %v5338_v28  ;;  %v5340_v48 = vpop.eup %5339 }
 0x728   :  { %v5342_v13 = vpop.eup %5341  ;;  %v3337_v1 = vadd.f32 1.0, %v5340_v48  ;;  %v8127_v48 = vld [vmem:[#allocation58_spill] sm:$0xff] }
 0x729   :  { %5351 = vrcp.f32 %v3336_v46  ;;  %v3339_v54 = vadd.f32 1.0, %v5342_v13  ;;  %v5344_v26 = vpop.eup %5343  ;;  %v3372_v13 = vunpack.c.l.bf16 %v8127_v48 }
 0x72a   :  { %5353 = vtanh.f32 %v3317_v24  ;;  %v3340_v12 = vadd.f32 1.0, %v5344_v26  ;;  %v5346_v42 = vpop.eup %5345  ;;  %v8125_v24 = vld [vmem:[#allocation56_spill] sm:$0xff] }
 0x72b   :  { %5355 = vrcp.f32 %v3337_v1  ;;  %v5348_v22 = vpop.eup %5347  ;;  %v3371_v0 = vunpack.c.l.bf16 %v8125_v24  ;;  %v8128_v1 = vld [vmem:[#allocation59_spill] sm:$0xff] }
 0x72c   :  { %5357 = vrcp.f32 %v3339_v54  ;;  %v5350_v27 = vpop.eup %5349  ;;  %v3338_v59 = vadd.f32 1.0, %v5348_v22  ;;  %v3375_v54 = vunpack.c.h.bf16 %v8125_v24 }
 0x72d   :  { %5359 = vrcp.f32 %v3340_v12  ;;  %v3341_v4 = vadd.f32 1.0, %v5350_v27  ;;  %v3377_v27 = vunpack.c.h.bf16 %v8126_v15 }
 0x72e   :  { %5361 = vrcp.f32 %v3338_v59  ;;  %v3376_v59 = vunpack.c.h.bf16 %v8127_v48 }
 0x733   :  { %v5352_v61 = vpop.eup %5351 }
 0x734   :  { %v5354_v29 = vpop.eup %5353  ;;  %v3358_v35 = vmul.f32 %v5352_v61, %v5346_v42 }
 0x735   :  { %v5356_v62 = vpop.eup %5355 }
 0x736   :  { %v5358_v2 = vpop.eup %5357  ;;  %v3356_v51 = vmul.f32 %v5356_v62, %v7299_v25  ;;  %v3374_v25 = vunpack.c.l.bf16 %v8128_v1 }
 0x737   :  { %v3359_v33 = vmul.f32 %v5358_v2, %v5354_v29  ;;  %v5360_v17 = vpop.eup %5359 }
 0x738   :  { %v7419_v34 = vadd.f32 %v3358_v35, %v3356_v51  ;;  %v3357_v5 = vmul.f32 %v5360_v17, %v7308_v44 }
 0x739   :  { %v3413_v28 = vpop.f32.mrb[108].mxu0  ;;  %v3456_v46 = vpop.f32.mrb[108].mxu1 }
 0x73a   :  { %5363 = vtanh.f32 %v7419_v34  ;;  %v7428_v26 = vadd.f32 %v3359_v33, %v3357_v5  ;;  %v3465_v12 = vadd.f32 %v3413_v28, %v3371_v0  ;;  %v3467_v42 = vadd.f32 %v3456_v46, %v3373_v52  ;;  %v3415_v22 = vpop.f32.mrb[109].mxu0  ;;  %v3458_v44 = vpop.f32.mrb[109].mxu1 }
 0x73b   :  { %5365 = vrcp.f32 %v3341_v4  ;;  %v3466_v61 = vadd.f32 %v3415_v22, %v3372_v13  ;;  %v3468_v29 = vadd.f32 %v3458_v44, %v3374_v25  ;;  %v3417_v35 = vpop.f32.mrb[110].mxu0  ;;  %v3460_v62 = vpop.f32.mrb[110].mxu1  ;;  %v3378_v33 = vunpack.c.h.bf16 %v8128_v1 }
 0x73c   :  { %5367 = vtanh.f32 %v7428_v26  ;;  %v4599_v2 = vmul.f32 -1.442695, %v3465_v12  ;;  %v3469_v51 = vadd.f32 %v3417_v35, %v3375_v54  ;;  %v3419_v17 = vpop.f32.mrb[111].mxu0  ;;  %v3462_v5 = vpop.f32.mrb[111].mxu1  ;;  %v3471_v0 = vadd.f32 %v3460_v62, %v3377_v27 }
 0x73d   :  { %v4600_v24 = vmul.f32 -1.442695, %v3466_v61  ;;  %v3470_v52 = vadd.f32 %v3419_v17, %v3376_v59  ;;  %v3472_v4 = vadd.f32 %v3462_v5, %v3378_v33  ;;  %v5362_v46 = vpop.eup %5361  ;;  %v4601_v54 = vmul.f32 -1.442695, %v3467_v42 }
 0x73e   :  { %5369 = vpow2.f32 %v4599_v2  ;;  %v4602_v15 = vmul.f32 -1.442695, %v3469_v51  ;;  %v4604_v22 = vmul.f32 -1.442695, %v3471_v0  ;;  %v8139_v0 = vld [vmem:[#allocation77_spill] sm:$0xff] }
 0x73f   :  { %v4603_v28 = vmul.f32 -1.442695, %v3470_v52  ;;  %5371 = vpow2.f32 %v4600_v24  ;;  %v8140_v52 = vld [vmem:[#allocation80_spill] sm:$0xff] }
 0x740   :  { %5373 = vpow2.f32 %v4602_v15  ;;  %v8141_v15 = vld [vmem:[#allocation81_spill] sm:$0xff] }
 0x741   :  { %5375 = vpow2.f32 %v4603_v28  ;;  %v8143_v28 = vld [vmem:[#allocation83_spill] sm:$0xff] }
 0x742   :  { %5377 = vtanh.f32 %v3468_v29 }
 0x743   :  { %5379 = vpow2.f32 %v4601_v54  ;;  %v8147_v54 = vld [vmem:[#allocation87_spill] sm:$0xff] }
 0x744   :  { %v5364_v13 = vpop.eup %5363  ;;  %5381 = vpow2.f32 %v4604_v22  ;;  %v8149_v22 = vld [vmem:[#allocation89_spill] sm:$0xff] }
 0x745   :  { %v7434_v48 = vmul.f32 %v5364_v13, %v5362_v46  ;;  %v5366_v25 = vpop.eup %5365  ;;  %v8144_v46 = vld [vmem:[#allocation84_spill] sm:$0xff]  ;;  %v8145_v13 = vld [vmem:[#allocation85_spill] sm:$0xff] }
 0x746   :  { %v5368_v12 = vpop.eup %5367 }
 0x747   :  { %v3523_v1 = vmax.f32 %v7317_v16, %v7434_v48  ;;  %v7438_v44 = vmul.f32 %v5368_v12, %v5366_v25  ;;  %v8146_v25 = vld [vmem:[#allocation86_spill] sm:$0xff]  ;;  %v8148_v12 = vld [vmem:[#allocation88_spill] sm:$0xff] }
 0x748   :  { %v5370_v27 = vpop.eup %5369 }
 0x749   :  { %v3491_v61 = vadd.f32 1.0, %v5370_v27  ;;  %v3533_v35 = vpack.c.bf16 %v7438_v44, %v7434_v48  ;;  %v3524_v62 = vmax.f32 %v7322_v7, %v7438_v44  ;;  %v5372_v59 = vpop.eup %5371  ;;  %v8150_v27 = vld [vmem:[#allocation90_spill] sm:$0xff]  ;;  %v5660_v7 = vld [vmem:[#allocation14 + $0x2c] ss:$16 sps:$4 sm:$0xff]  }
 0x74a   :  { %v5374_v42 = vpop.eup %5373  ;;  %v3492_v2 = vadd.f32 1.0, %v5372_v59  ;;  %v8153_v59 = vld [vmem:[#allocation93_spill] sm:$0xff]  ;;  %v5657_v48 = vld [vmem:[#allocation14] ss:$16 sps:$4 sm:$0xff]  }
 0x74b   :  { %5383 = vrcp.f32 %v3491_v61  ;;  %3581 = vmatmul.mubr.bf16.vlgmr.msra.gmra.mrb[112].mxu0 %v3533_v35  ;;  %3624 = vmatmul.mubr.bf16.vlgmr.msra.gmra.mrb[112].mxu1 %v3533_v35  ;;  %v3494_v51 = vadd.f32 1.0, %v5374_v42  ;;  %v5376_v29 = vpop.eup %5375  ;;  %v8151_v61 = vld [vmem:[#allocation91_spill] sm:$0xff]  ;;  %v8152_v35 = vld [vmem:[#allocation92_spill] sm:$0xff]  ;;  %v8154_v42 = vld [vmem:[#allocation94_spill] sm:$0xff] }
 0x74c   :  { %5385 = vtanh.f32 %v3472_v4  ;;  %3704 = vmatpush1.bf16.msra.mxu0 %v7076_v53  ;;  %3747 = vmatpush1.bf16.msra.mxu1 %v7079_v30  ;;  %v3495_v17 = vadd.f32 1.0, %v5376_v29  ;;  %v5378_v53 = vpop.eup %5377  ;;  %v8142_v4 = vld [vmem:[#allocation82_spill] sm:$0xff]  ;;  %v8157_v29 = vld [vmem:[#allocation97_spill] sm:$0xff] }
 0x74d   :  { %5387 = vrcp.f32 %v3492_v2  ;;  %3705 = vmatprep.subr.bf16.mxu0 %v7082_v21  ;;  %3748 = vmatprep.subr.bf16.mxu1 %v7085_v45  ;;  %v5380_v30 = vpop.eup %5379  ;;  %v8155_v2 = vld [vmem:[#allocation95_spill] sm:$0xff] }
 0x74e   :  { %5389 = vrcp.f32 %v3494_v51  ;;  %3735 = vmatprep.mubr.bf16.mxu0 %v7893_v56  ;;  %3778 = vmatprep.mubr.bf16.mxu1 %v7893_v56  ;;  %v5382_v21 = vpop.eup %5381  ;;  %v8156_v51 = vld [vmem:[#allocation96_spill] sm:$0xff] }
 0x74f   :  { %5391 = vrcp.f32 %v3495_v17  ;;  %v8158_v17 = vld [vmem:[#allocation98_spill] sm:$0xff] }
 0x750   :  { %3706 = vmatpush1.bf16.msra.mxu0 %v7090_v3  ;;  %3749 = vmatpush1.bf16.msra.mxu1 %v7093_v63  ;;  %v3493_v63 = vadd.f32 1.0, %v5380_v30  ;;  %v8160_v30 = vld [vmem:[#allocation100_spill] sm:$0xff] }
 0x751   :  { %3707 = vmatprep.subr.bf16.mxu0 %v7096_v55  ;;  %3750 = vmatprep.subr.bf16.mxu1 %v7099_v38 }
 0x752   :  { %5393 = vrcp.f32 %v3493_v63 }
 0x754   :  { %3708 = vmatpush1.bf16.msra.mxu0 %v7102_v14  ;;  %3751 = vmatpush1.bf16.msra.mxu1 %v7105_v37 }
 0x755   :  { %v5384_v45 = vpop.eup %5383  ;;  %3709 = vmatprep.subr.bf16.mxu0 %v7108_v32  ;;  %3752 = vmatprep.subr.bf16.mxu1 %v7111_v39  ;;  %v3496_v32 = vadd.f32 1.0, %v5382_v21  ;;  %v8161_v21 = vld [vmem:[#allocation101_spill] sm:$0xff] }
 0x756   :  { %v5386_v33 = vpop.eup %5385  ;;  %v3513_v3 = vmul.f32 %v5384_v45, %v5378_v53  ;;  %v8159_v53 = vld [vmem:[#allocation99_spill] sm:$0xff]  ;;  %v8162_v45 = vld [vmem:[#allocation102_spill] sm:$0xff] }
 0x757   :  { %v5388_v5 = vpop.eup %5387 }
 0x758   :  { %v5390_v24 = vpop.eup %5389  ;;  %v3511_v55 = vmul.f32 %v5388_v5, %v7343_v31  ;;  %3710 = vmatpush1.bf16.msra.mxu0 %v7115_v20  ;;  %3753 = vmatpush1.bf16.msra.mxu1 %v7118_v47  ;;  %v8135_v31 = vld [vmem:[#allocation75_spill] sm:$0xff]  ;;  %v8165_v5 = vld [vmem:[#allocation40_spill] sm:$0xff] }
 0x759   :  { %v3514_v38 = vmul.f32 %v5390_v24, %v5386_v33  ;;  %3711 = vmatprep.subr.bf16.mxu0 %v7121_v57  ;;  %3754 = vmatprep.subr.bf16.mxu1 %v7124_v60  ;;  %v5392_v14 = vpop.eup %5391  ;;  %v8163_v33 = vld [vmem:[#allocation103_spill] sm:$0xff]  ;;  %v3540_v63 = vunpack.c.l.bf16 %v8165_v5  ;;  %v8166_v24 = vld [vmem:[#allocation41_spill] sm:$0xff] }
 0x75a   :  { %v7463_v37 = vadd.f32 %v3513_v3, %v3511_v55  ;;  %v3512_v39 = vmul.f32 %v5392_v14, %v7349_v6  ;;  %v8136_v6 = vld [vmem:[#allocation78_spill] sm:$0xff]  ;;  %v8164_v3 = vld [vmem:[#allocation104_spill] sm:$0xff]  ;;  %v3542_v55 = vunpack.c.l.bf16 %v8166_v24 }
 0x75c   :  { %5395 = vtanh.f32 %v7463_v37  ;;  %3712 = vmatpush1.bf16.msra.mxu0 %v7131_v36  ;;  %3755 = vmatpush1.bf16.msra.mxu1 %v7134_v19  ;;  %v7469_v20 = vadd.f32 %v3514_v38, %v3512_v39  ;;  %v5394_v47 = vpop.eup %5393 }
 0x75d   :  { %3713 = vmatprep.subr.bf16.mxu0 %v7139_v49  ;;  %3756 = vmatprep.subr.bf16.mxu1 %v7142_v11  ;;  %5397 = vrcp.f32 %v3496_v32  ;;  %v8129_v49 = vld [vmem:[#allocation70_spill] sm:$0xff]  ;;  %v8130_v11 = vld [vmem:[#allocation71_spill] sm:$0xff] }
 0x75e   :  { %5399 = vtanh.f32 %v7469_v20  ;;  %v8167_v32 = vld [vmem:[#allocation42_spill] sm:$0xff] }
 0x75f   :  { %v3541_v39 = vunpack.c.l.bf16 %v8167_v32 }
 0x760   :  { %3714 = vmatpush1.bf16.msra.mxu0 %v7146_v9  ;;  %3757 = vmatpush1.bf16.msra.mxu1 %v7149_v58  ;;  %v8131_v9 = vld [vmem:[#allocation105_spill] sm:$0xff] }
 0x761   :  { %3715 = vmatprep.subr.bf16.mxu0 %v7152_v8  ;;  %3758 = vmatprep.subr.bf16.mxu1 %v7155_v50 }
 0x764   :  { %3716 = vmatpush1.bf16.msra.mxu0 %v7158_v40  ;;  %3759 = vmatpush1.bf16.msra.mxu1 %v7161_v43  ;;  %v8132_v40 = vld [vmem:[#allocation106_spill] sm:$0xff] }
 0x765   :  { %3717 = vmatprep.subr.bf16.mxu0 %v7164_v23  ;;  %3760 = vmatprep.subr.bf16.mxu1 %v7167_v10  ;;  %v8133_v23 = vld [vmem:[#allocation73_spill] sm:$0xff]  ;;  %v8134_v10 = vld [vmem:[#allocation76_spill] sm:$0xff] }
 0x766   :  { %v5396_v57 = vpop.eup %5395 }
 0x767   :  { %v7482_v60 = vmul.f32 %v5396_v57, %v5394_v47  ;;  %v5398_v36 = vpop.eup %5397  ;;  %v8168_v47 = vld [vmem:[#allocation43_spill] sm:$0xff] }
 0x768   :  { %3718 = vmatpush1.bf16.msra.mxu0 %v8077_v18  ;;  %3761 = vmatpush1.bf16.msra.mxu1 %v8078_v41  ;;  %v5400_v19 = vpop.eup %5399  ;;  %v8137_v18 = vld [vmem:[#allocation79_spill] sm:$0xff]  ;;  %v8138_v41 = vld [vmem:[#allocation74_spill] sm:$0xff]  ;;  %v3543_v57 = vunpack.c.l.bf16 %v8168_v47 }
 0x769   :  { %3872 = vmatprep.subr.bf16.mxu0 %v8129_v49  ;;  %3915 = vmatprep.subr.bf16.mxu1 %v8130_v11  ;;  %v3529_v58 = vmax.f32 %v8131_v9, %v7482_v60  ;;  %v7490_v8 = vmul.f32 %v5400_v19, %v5398_v36  ;;  %v4187_v9 = vld [vmem:[#allocation15 + $0x28] sm:$0xff] }
 0x76b   :  { %v3534_v50 = vpack.c.bf16 %v7490_v8, %v7482_v60  ;;  %v3530_v43 = vmax.f32 %v8132_v40, %v7490_v8  ;;  %v4186_v60 = vld [vmem:[#allocation15 + $0x20] sm:$0xff]  ;;  %v4188_v8 = vld [vmem:[#allocation15 + $0x30] sm:$0xff]  ;;  %v4189_v40 = vld [vmem:[#allocation15 + $0x38] sm:$0xff] }
 0x76d   :  { %3736 = vmatmul.mubr.bf16.vlgmr.msra.gmra.mrb[116].mxu0 %v3534_v50  ;;  %3779 = vmatmul.mubr.bf16.vlgmr.msra.gmra.mrb[116].mxu1 %v3534_v50  ;;  %v3544_v50 = vunpack.c.h.bf16 %v8165_v5 }
 0x76e   :  { %3873 = vmatpush1.bf16.msra.mxu0 %v8133_v23  ;;  %3916 = vmatpush1.bf16.msra.mxu1 %v8134_v10  ;;  %v3546_v23 = vunpack.c.h.bf16 %v8166_v24 }
 0x76f   :  { %3874 = vmatprep.subr.bf16.mxu0 %v8135_v31  ;;  %3917 = vmatprep.subr.bf16.mxu1 %v8136_v6 }
 0x770   :  { %3904 = vmatprep.mubr.bf16.mxu0 %v7893_v56  ;;  %3947 = vmatprep.mubr.bf16.mxu1 %v7893_v56 }
 0x772   :  { %3875 = vmatpush1.bf16.msra.mxu0 %v8137_v18  ;;  %3918 = vmatpush1.bf16.msra.mxu1 %v8138_v41  ;;  %v3545_v41 = vunpack.c.h.bf16 %v8167_v32 }
 0x773   :  { %3876 = vmatprep.subr.bf16.mxu0 %v8139_v0  ;;  %3919 = vmatprep.subr.bf16.mxu1 %v8140_v52  ;;  %v3547_v0 = vunpack.c.h.bf16 %v8168_v47 }
 0x776   :  { %3877 = vmatpush1.bf16.msra.mxu0 %v8141_v15  ;;  %3920 = vmatpush1.bf16.msra.mxu1 %v8142_v4 }
 0x777   :  { %3878 = vmatprep.subr.bf16.mxu0 %v8143_v28  ;;  %3921 = vmatprep.subr.bf16.mxu1 %v8144_v46 }
 0x77a   :  { %3879 = vmatpush1.bf16.msra.mxu0 %v8145_v13  ;;  %3922 = vmatpush1.bf16.msra.mxu1 %v8146_v25 }
 0x77b   :  { %3880 = vmatprep.subr.bf16.mxu0 %v8147_v54  ;;  %3923 = vmatprep.subr.bf16.mxu1 %v8148_v12 }
 0x77e   :  { %3881 = vmatpush1.bf16.msra.mxu0 %v8149_v22  ;;  %3924 = vmatpush1.bf16.msra.mxu1 %v8150_v27 }
 0x77f   :  { %3882 = vmatprep.subr.bf16.mxu0 %v8151_v61  ;;  %3925 = vmatprep.subr.bf16.mxu1 %v8152_v35 }
 0x782   :  { %3883 = vmatpush1.bf16.msra.mxu0 %v8153_v59  ;;  %3926 = vmatpush1.bf16.msra.mxu1 %v8154_v42 }
 0x783   :  { %3884 = vmatprep.subr.bf16.mxu0 %v8155_v2  ;;  %3927 = vmatprep.subr.bf16.mxu1 %v8156_v51 }
 0x786   :  { %3885 = vmatpush1.bf16.msra.mxu0 %v8157_v29  ;;  %3928 = vmatpush1.bf16.msra.mxu1 %v8158_v17 }
 0x787   :  { %3886 = vmatprep.subr.bf16.mxu0 %v8159_v53  ;;  %3929 = vmatprep.subr.bf16.mxu1 %v8160_v30 }
 0x78a   :  { %3887 = vmatpush1.bf16.msra.mxu0 %v8161_v21  ;;  %3930 = vmatpush1.bf16.msra.mxu1 %v8162_v45 }
 0x78b   :  { %4026 = vmatprep.subr.bf16.mxu0 %v8163_v33  ;;  %4069 = vmatprep.subr.bf16.mxu1 %v8164_v3 }
 0x81e   :  { %v3582_v38 = vpop.f32.mrb[112].mxu0  ;;  %v3625_v14 = vpop.f32.mrb[112].mxu1 }
 0x81f   :  { %v3634_v36 = vadd.f32 %v3582_v38, %v3540_v63  ;;  %v3636_v19 = vadd.f32 %v3625_v14, %v3542_v55  ;;  %v3584_v49 = vpop.f32.mrb[113].mxu0  ;;  %v3627_v11 = vpop.f32.mrb[113].mxu1 }
 0x820   :  { %v3635_v10 = vadd.f32 %v3584_v49, %v3541_v39  ;;  %v3637_v31 = vadd.f32 %v3627_v11, %v3543_v57  ;;  %v3586_v6 = vpop.f32.mrb[114].mxu0  ;;  %v3629_v18 = vpop.f32.mrb[114].mxu1  ;;  %v8170_v49 = vld [vmem:[#allocation53_spill] sm:$0xff] }
 0x821   :  { %v4605_v52 = vmul.f32 -1.442695, %v3634_v36  ;;  %v3638_v15 = vadd.f32 %v3586_v6, %v3544_v50  ;;  %v3640_v4 = vadd.f32 %v3629_v18, %v3546_v23  ;;  %v3588_v28 = vpop.f32.mrb[115].mxu0  ;;  %v3631_v46 = vpop.f32.mrb[115].mxu1  ;;  %v4607_v27 = vmul.f32 -1.442695, %v3636_v19 }
 0x822   :  { %v4606_v13 = vmul.f32 -1.442695, %v3635_v10  ;;  %v3639_v25 = vadd.f32 %v3588_v28, %v3545_v41  ;;  %v3641_v54 = vadd.f32 %v3631_v46, %v3547_v0  ;;  %v8169_v36 = vld [vmem:[#allocation52_spill] sm:$0xff]  ;;  %v3697_v11 = vunpack.c.l.bf16 %v8170_v49  ;;  %v8171_v10 = vld [vmem:[#allocation54_spill] sm:$0xff]  ;;  %v8172_v6 = vld [vmem:[#allocation55_spill] sm:$0xff] }
 0x823   :  { %5401 = vpow2.f32 %v4605_v52  ;;  %v4608_v12 = vmul.f32 -1.442695, %v3638_v15  ;;  %v4610_v61 = vmul.f32 -1.442695, %v3640_v4  ;;  %v3695_v19 = vunpack.c.l.bf16 %v8169_v36 }
 0x824   :  { %v4609_v22 = vmul.f32 -1.442695, %v3639_v25  ;;  %5403 = vpow2.f32 %v4606_v13  ;;  %v3699_v18 = vunpack.c.h.bf16 %v8169_v36  ;;  %v3701_v4 = vunpack.c.h.bf16 %v8170_v49  ;;  %v5659_v49 = vld [vmem:[#allocation14 + $0x24] ss:$16 sps:$4 sm:$0xff]  }
 0x825   :  { %5405 = vpow2.f32 %v4608_v12 }
 0x826   :  { %5407 = vpow2.f32 %v4609_v22 }
 0x827   :  { %5409 = vtanh.f32 %v3637_v31  ;;  %v3696_v31 = vunpack.c.l.bf16 %v8171_v10 }
 0x828   :  { %5411 = vpow2.f32 %v4607_v27 }
 0x829   :  { %5413 = vpow2.f32 %v4610_v61  ;;  %v3702_v61 = vunpack.c.h.bf16 %v8172_v6 }
 0x82d   :  { %v5402_v35 = vpop.eup %5401 }
 0x82e   :  { %v3660_v59 = vadd.f32 1.0, %v5402_v35  ;;  %v5404_v42 = vpop.eup %5403 }
 0x82f   :  { %v5406_v2 = vpop.eup %5405  ;;  %v3661_v51 = vadd.f32 1.0, %v5404_v42 }
 0x830   :  { %5415 = vrcp.f32 %v3660_v59  ;;  %v3663_v29 = vadd.f32 1.0, %v5406_v2  ;;  %v5408_v17 = vpop.eup %5407 }
 0x831   :  { %5417 = vtanh.f32 %v3641_v54  ;;  %v3664_v53 = vadd.f32 1.0, %v5408_v17  ;;  %v5410_v30 = vpop.eup %5409  ;;  %v3700_v54 = vunpack.c.h.bf16 %v8171_v10 }
 0x832   :  { %5419 = vrcp.f32 %v3661_v51  ;;  %v5412_v21 = vpop.eup %5411 }
 0x833   :  { %5421 = vrcp.f32 %v3663_v29  ;;  %v5414_v45 = vpop.eup %5413  ;;  %v3662_v24 = vadd.f32 1.0, %v5412_v21 }
 0x834   :  { %5423 = vrcp.f32 %v3664_v53  ;;  %v3665_v47 = vadd.f32 1.0, %v5414_v45 }
 0x835   :  { %5425 = vrcp.f32 %v3662_v24 }
 0x83a   :  { %v5416_v33 = vpop.eup %5415 }
 0x83b   :  { %v5418_v3 = vpop.eup %5417  ;;  %v3682_v5 = vmul.f32 %v5416_v33, %v5410_v30 }
 0x83c   :  { %v5420_v63 = vpop.eup %5419 }
 0x83d   :  { %v5422_v55 = vpop.eup %5421  ;;  %v3680_v38 = vmul.f32 %v5420_v63, %v7419_v34  ;;  %v3698_v34 = vunpack.c.l.bf16 %v8172_v6 }
 0x83e   :  { %v3683_v14 = vmul.f32 %v5422_v55, %v5418_v3  ;;  %v5424_v32 = vpop.eup %5423 }
 0x83f   :  { %v7539_v39 = vadd.f32 %v3682_v5, %v3680_v38  ;;  %v3681_v57 = vmul.f32 %v5424_v32, %v7428_v26  ;;  %v5426_v53 = vpop.eup %5425 }
 0x840   :  { %v3737_v50 = vpop.f32.mrb[116].mxu0  ;;  %v3780_v23 = vpop.f32.mrb[116].mxu1 }
 0x841   :  { %5427 = vtanh.f32 %v7539_v39  ;;  %v7548_v41 = vadd.f32 %v3683_v14, %v3681_v57  ;;  %v3789_v0 = vadd.f32 %v3737_v50, %v3695_v19  ;;  %v3791_v52 = vadd.f32 %v3780_v23, %v3697_v11  ;;  %v3739_v15 = vpop.f32.mrb[117].mxu0  ;;  %v3782_v26 = vpop.f32.mrb[117].mxu1  ;;  %v5662_v11 = vld [vmem:[#allocation14 + $0x28] ss:$16 sps:$4 sm:$0xff]   ;;  %v5663_v50 = vld [vmem:[#allocation14 + $0x44] ss:$16 sps:$4 sm:$0xff]  }
 0x842   :  { %5429 = vrcp.f32 %v3665_v47  ;;  %v3790_v28 = vadd.f32 %v3739_v15, %v3696_v31  ;;  %v3792_v46 = vadd.f32 %v3782_v26, %v3698_v34  ;;  %v3741_v13 = vpop.f32.mrb[118].mxu0  ;;  %v3784_v25 = vpop.f32.mrb[118].mxu1  ;;  %v5664_v23 = vld [vmem:[#allocation14 + $0x4c] ss:$16 sps:$4 sm:$0xff]   ;;  %v5665_v34 = vld [vmem:[#allocation14 + $0x40] ss:$16 sps:$4 sm:$0xff]  }
 0x843   :  { %5431 = vtanh.f32 %v7548_v41  ;;  %v4611_v12 = vmul.f32 -1.442695, %v3789_v0  ;;  %v3793_v22 = vadd.f32 %v3741_v13, %v3699_v18  ;;  %v3743_v27 = vpop.f32.mrb[119].mxu0  ;;  %v3786_v35 = vpop.f32.mrb[119].mxu1  ;;  %v3795_v42 = vadd.f32 %v3784_v25, %v3701_v4  ;;  %v5666_v18 = vld [vmem:[#allocation14 + $0x48] ss:$16 sps:$4 sm:$0xff]  }
 0x844   :  { %v4612_v59 = vmul.f32 -1.442695, %v3790_v28  ;;  %v3794_v2 = vadd.f32 %v3743_v27, %v3700_v54  ;;  %v3796_v29 = vadd.f32 %v3786_v35, %v3702_v61  ;;  %v4613_v33 = vmul.f32 -1.442695, %v3791_v52  ;;  %v5667_v52 = vld [vmem:[#allocation14 + $0x64] ss:$16 sps:$4 sm:$0xff]  }
 0x845   :  { %5433 = vpow2.f32 %v4611_v12  ;;  %v4614_v51 = vmul.f32 -1.442695, %v3793_v22  ;;  %v4616_v5 = vmul.f32 -1.442695, %v3795_v42  ;;  %v5669_v25 = vld [vmem:[#allocation14 + $0x60] ss:$16 sps:$4 sm:$0xff]  }
 0x846   :  { %v4615_v17 = vmul.f32 -1.442695, %v3794_v2  ;;  %5435 = vpow2.f32 %v4612_v59  ;;  %v5670_v54 = vld [vmem:[#allocation14 + $0x68] ss:$16 sps:$4 sm:$0xff]   ;;  %v5671_v22 = vld [vmem:[#allocation14 + $0x84] ss:$16 sps:$4 sm:$0xff]  }
 0x847   :  { %5437 = vpow2.f32 %v4614_v51  ;;  %v5672_v27 = vld [vmem:[#allocation14 + $0x8c] ss:$16 sps:$4 sm:$0xff]   ;;  %v5673_v2 = vld [vmem:[#allocation14 + $0x80] ss:$16 sps:$4 sm:$0xff]  }
 0x848   :  { %5439 = vpow2.f32 %v4615_v17  ;;  %v5676_v17 = vld [vmem:[#allocation14 + $0xac] ss:$16 sps:$4 sm:$0xff]  }
 0x849   :  { %5441 = vtanh.f32 %v3792_v46 }
 0x84a   :  { %5443 = vpow2.f32 %v4613_v33  ;;  %v5682_v33 = vld [vmem:[#allocation14 + $0xc8] ss:$16 sps:$4 sm:$0xff]  }
 0x84b   :  { %v5428_v30 = vpop.eup %5427  ;;  %5445 = vpow2.f32 %v4616_v5  ;;  %v5683_v5 = vld [vmem:[#allocation14 + $0xe4] ss:$16 sps:$4 sm:$0xff]  }
 0x84c   :  { %v3688_v21 = vmul.f32 %v5428_v30, %v5426_v53  ;;  %v5430_v45 = vpop.eup %5429  ;;  %v5677_v53 = vld [vmem:[#allocation14 + $0xa0] ss:$16 sps:$4 sm:$0xff]   ;;  %v5678_v30 = vld [vmem:[#allocation14 + $0xa8] ss:$16 sps:$4 sm:$0xff]  }
 0x84d   :  { %v5432_v3 = vpop.eup %5431 }
 0x84e   :  { %v7557_v63 = vmax.f32 %v3523_v1, %v3688_v21  ;;  %v3689_v24 = vmul.f32 %v5432_v3, %v5430_v45  ;;  %v5658_v1 = vld [vmem:[#allocation14 + $0x8] ss:$16 sps:$4 sm:$0xff]   ;;  %v5681_v45 = vld [vmem:[#allocation14 + $0xc0] ss:$16 sps:$4 sm:$0xff]  }
 0x84f   :  { %v5434_v55 = vpop.eup %5433 }
 0x850   :  { %v3815_v38 = vadd.f32 1.0, %v5434_v55  ;;  %v3857_v14 = vpack.c.bf16 %v3689_v24, %v3688_v21  ;;  %v7562_v32 = vmax.f32 %v3524_v62, %v3689_v24  ;;  %v5436_v47 = vpop.eup %5435  ;;  %v5661_v62 = vld [vmem:[#allocation14 + $0x20] ss:$16 sps:$4 sm:$0xff]   ;;  %v5680_v21 = vld [vmem:[#allocation14 + $0xcc] ss:$16 sps:$4 sm:$0xff]  }
 0x851   :  { %v5438_v57 = vpop.eup %5437  ;;  %v3816_v36 = vadd.f32 1.0, %v5436_v47  ;;  %v5684_v24 = vld [vmem:[#allocation14 + $0xec] ss:$16 sps:$4 sm:$0xff]   ;;  %v5685_v47 = vld [vmem:[#allocation14 + $0xe0] ss:$16 sps:$4 sm:$0xff]  }
 0x852   :  { %5447 = vrcp.f32 %v3815_v38  ;;  %3905 = vmatmul.mubr.bf16.vlgmr.msra.gmra.mrb[120].mxu0 %v3857_v14  ;;  %3948 = vmatmul.mubr.bf16.vlgmr.msra.gmra.mrb[120].mxu1 %v3857_v14  ;;  %v3818_v16 = vadd.f32 1.0, %v5438_v57  ;;  %v5440_v19 = vpop.eup %5439  ;;  %v5686_v57 = vld [vmem:[#allocation14 + $0xe8] ss:$16 sps:$4 sm:$0xff]  }
 0x853   :  { %5449 = vtanh.f32 %v3796_v29  ;;  %4027 = vmatpush1.bf16.msra.mxu0 %v5657_v48  ;;  %4070 = vmatpush1.bf16.msra.mxu1 %v5658_v1  ;;  %v3819_v44 = vadd.f32 1.0, %v5440_v19  ;;  %v5442_v10 = vpop.eup %5441  ;;  %v5675_v29 = vld [vmem:[#allocation14 + $0xa4] ss:$16 sps:$4 sm:$0xff]  }
 0x854   :  { %5451 = vrcp.f32 %v3816_v36  ;;  %4028 = vmatprep.subr.bf16.mxu0 %v5659_v49  ;;  %4071 = vmatprep.subr.bf16.mxu1 %v5660_v7  ;;  %v5444_v31 = vpop.eup %5443  ;;  %v4182_v49 = vld [vmem:[#allocation15] sm:$0xff]  ;;  %v4183_v7 = vld [vmem:[#allocation15 + $0x8] sm:$0xff] }
 0x855   :  { %5453 = vrcp.f32 %v3818_v16  ;;  %4058 = vmatprep.mubr.bf16.mxu0 %v7893_v56  ;;  %4101 = vmatprep.mubr.bf16.mxu1 %v7893_v56  ;;  %v5446_v6 = vpop.eup %5445  ;;  %v5668_v56 = vld [vmem:[#allocation14 + $0x6c] ss:$16 sps:$4 sm:$0xff]   ;;  %v3817_v28 = vadd.f32 1.0, %v5444_v31 }
 0x856   :  { %5455 = vrcp.f32 %v3819_v44  ;;  %v3820_v59 = vadd.f32 1.0, %v5446_v6  ;;  %v4768_v44 = vpack.c.bf16 %v4183_v7, %v4182_v49  ;;  %v4192_v6 = vld [vmem:[#allocation15 + $0x50] sm:$0xff]  ;;  %v8176_v49 = vld [vmem:[#allocation47_spill] sm:$0xff] }
 0x857   :  { %4029 = vmatpush1.bf16.msra.mxu0 %v5661_v62  ;;  %4072 = vmatpush1.bf16.msra.mxu1 %v5662_v11  ;;  %5457 = vrcp.f32 %v3817_v28  ;;  %v4184_v62 = vld [vmem:[#allocation15 + $0x10] sm:$0xff]  ;;  %v4185_v11 = vld [vmem:[#allocation15 + $0x18] sm:$0xff]  ;;  %v4200_v28 = vld [vmem:[#allocation17] sm:$0xff]  ;;  %v3867_v7 = vunpack.c.l.bf16 %v8176_v49 }
 0x858   :  { %4030 = vmatprep.subr.bf16.mxu0 %v5663_v50  ;;  %4073 = vmatprep.subr.bf16.mxu1 %v5664_v23  ;;  %v4772_v50 = vpack.c.bf16 %v4185_v11, %v4184_v62  ;;  %v4190_v23 = vld [vmem:[#allocation15 + $0x40] sm:$0xff] }
 0x85b   :  { %4031 = vmatpush1.bf16.msra.mxu0 %v5665_v34  ;;  %4074 = vmatpush1.bf16.msra.mxu1 %v5666_v18  ;;  %v4193_v34 = vld [vmem:[#allocation15 + $0x58] sm:$0xff] }
 0x85c   :  { %v5448_v0 = vpop.eup %5447  ;;  %4032 = vmatprep.subr.bf16.mxu0 %v5667_v52  ;;  %4075 = vmatprep.subr.bf16.mxu1 %v5668_v56  ;;  %v4788_v18 = vpack.c.bf16 %v4193_v34, %v4192_v6  ;;  %v4195_v52 = vld [vmem:[#allocation15 + $0x68] sm:$0xff] }
 0x85d   :  { %v5450_v15 = vpop.eup %5449  ;;  %v3837_v26 = vmul.f32 %v5448_v0, %v5442_v10  ;;  %v4191_v10 = vld [vmem:[#allocation15 + $0x48] sm:$0xff]  ;;  %v4194_v0 = vld [vmem:[#allocation15 + $0x60] sm:$0xff] }
 0x85e   :  { %v5452_v4 = vpop.eup %5451  ;;  %v4784_v31 = vpack.c.bf16 %v4191_v10, %v4190_v23  ;;  %v4792_v56 = vpack.c.bf16 %v4195_v52, %v4194_v0  ;;  %v3871_v10 = vunpack.c.h.bf16 %v8176_v49 }
 0x85f   :  { %v5454_v46 = vpop.eup %5453  ;;  %v3835_v13 = vmul.f32 %v5452_v4, %v7463_v37  ;;  %4033 = vmatpush1.bf16.msra.mxu0 %v5669_v25  ;;  %4076 = vmatpush1.bf16.msra.mxu1 %v5670_v54  ;;  %v5674_v37 = vld [vmem:[#allocation14 + $0x88] ss:$16 sps:$4 sm:$0xff]   ;;  %v4202_v25 = vld [vmem:[#allocation17 + $0x10] sm:$0xff] }
 0x860   :  { %v3838_v12 = vmul.f32 %v5454_v46, %v5450_v15  ;;  %4034 = vmatprep.subr.bf16.mxu0 %v5671_v22  ;;  %4077 = vmatprep.subr.bf16.mxu1 %v5672_v27  ;;  %v5456_v61 = vpop.eup %5455  ;;  %v4196_v15 = vld [vmem:[#allocation15 + $0x70] sm:$0xff]  ;;  %v4201_v46 = vld [vmem:[#allocation17 + $0x8] sm:$0xff]  ;;  %v4203_v54 = vld [vmem:[#allocation17 + $0x18] sm:$0xff] }
 0x861   :  { %v7567_v35 = vadd.f32 %v3837_v26, %v3835_v13  ;;  %v3836_v42 = vmul.f32 %v5456_v61, %v7469_v20  ;;  %v5679_v20 = vld [vmem:[#allocation14 + $0xc4] ss:$16 sps:$4 sm:$0xff]   ;;  %v5458_v3 = vpop.eup %5457  ;;  %v4197_v26 = vld [vmem:[#allocation15 + $0x78] sm:$0xff]  ;;  %v4736_v13 = vpack.c.bf16 %v4201_v46, %v4200_v28  ;;  %v4205_v27 = vld [vmem:[#allocation17 + $0x28] sm:$0xff] }
 0x862   :  { %v4796_v4 = vpack.c.bf16 %v4197_v26, %v4196_v15  ;;  %v4204_v22 = vld [vmem:[#allocation17 + $0x20] sm:$0xff] }
 0x863   :  { %5459 = vtanh.f32 %v7567_v35  ;;  %4035 = vmatpush1.bf16.msra.mxu0 %v5673_v2  ;;  %4078 = vmatpush1.bf16.msra.mxu1 %v5674_v37  ;;  %v7571_v51 = vadd.f32 %v3838_v12, %v3836_v42  ;;  %v4740_v12 = vpack.c.bf16 %v4203_v54, %v4202_v25  ;;  %v4744_v61 = vpack.c.bf16 %v4205_v27, %v4204_v22  ;;  %v4207_v42 = vld [vmem:[#allocation17 + $0x38] sm:$0xff]  ;;  %v4208_v37 = vld [vmem:[#allocation17 + $0x40] sm:$0xff] }
 0x864   :  { %4036 = vmatprep.subr.bf16.mxu0 %v5675_v29  ;;  %4079 = vmatprep.subr.bf16.mxu1 %v5676_v17  ;;  %5461 = vrcp.f32 %v3820_v59  ;;  %v4206_v59 = vld [vmem:[#allocation17 + $0x30] sm:$0xff]  ;;  %v4209_v29 = vld [vmem:[#allocation17 + $0x48] sm:$0xff] }
 0x865   :  { %5463 = vtanh.f32 %v7571_v51  ;;  %v4748_v2 = vpack.c.bf16 %v4207_v42, %v4206_v59  ;;  %v4752_v17 = vpack.c.bf16 %v4209_v29, %v4208_v37 }
 0x867   :  { %4037 = vmatpush1.bf16.msra.mxu0 %v5677_v53  ;;  %4080 = vmatpush1.bf16.msra.mxu1 %v5678_v30  ;;  %v4210_v53 = vld [vmem:[#allocation17 + $0x50] sm:$0xff]  ;;  %v4211_v30 = vld [vmem:[#allocation17 + $0x58] sm:$0xff] }
 0x868   :  { %4038 = vmatprep.subr.bf16.mxu0 %v5679_v20  ;;  %4081 = vmatprep.subr.bf16.mxu1 %v5680_v21  ;;  %v4756_v20 = vpack.c.bf16 %v4211_v30, %v4210_v53  ;;  %v4212_v21 = vld [vmem:[#allocation17 + $0x60] sm:$0xff] }
 0x86b   :  { %4039 = vmatpush1.bf16.msra.mxu0 %v5681_v45  ;;  %4082 = vmatpush1.bf16.msra.mxu1 %v5682_v33  ;;  %v4213_v45 = vld [vmem:[#allocation17 + $0x68] sm:$0xff] }
 0x86c   :  { %4040 = vmatprep.subr.bf16.mxu0 %v5683_v5  ;;  %4083 = vmatprep.subr.bf16.mxu1 %v5684_v24  ;;  %v4760_v33 = vpack.c.bf16 %v4213_v45, %v4212_v21  ;;  %v4215_v5 = vld [vmem:[#allocation17 + $0x78] sm:$0xff] }
 0x86d   :  { %v5460_v55 = vpop.eup %5459 }
 0x86e   :  { %v3843_v38 = vmul.f32 %v5460_v55, %v5458_v3  ;;  %v5462_v14 = vpop.eup %5461  ;;  %v4214_v3 = vld [vmem:[#allocation17 + $0x70] sm:$0xff] }
 0x86f   :  { %4041 = vmatpush1.bf16.msra.mxu0 %v5685_v47  ;;  %4084 = vmatpush1.bf16.msra.mxu1 %v5686_v57  ;;  %v5464_v36 = vpop.eup %5463  ;;  %v4764_v24 = vpack.c.bf16 %v4215_v5, %v4214_v3  ;;  %v8173_v55 = vld [vmem:[#allocation44_spill] sm:$0xff] }
 0x870   :  { %v7577_v16 = vmax.f32 %v3529_v58, %v3843_v38  ;;  %v3844_v48 = vmul.f32 %v5464_v36, %v5462_v14  ;;  %4769 = vmatprep.subr.bf16.mxu0 %v4768_v44  ;;  %v4776_v58 = vpack.c.bf16 %v4187_v9, %v4186_v60  ;;  %4737 = vmatprep.subr.bf16.mxu1 %v4736_v13  ;;  %v8174_v14 = vld [vmem:[#allocation45_spill] sm:$0xff]  ;;  %v3868_v60 = vunpack.c.h.bf16 %v8173_v55 }
 0x871   :  { %v3866_v47 = vunpack.c.l.bf16 %v8174_v14  ;;  %v3870_v9 = vunpack.c.h.bf16 %v8174_v14 }
 0x872   :  { %v3858_v1 = vpack.c.bf16 %v3844_v48, %v3843_v38  ;;  %v7582_v19 = vmax.f32 %v3530_v43, %v3844_v48  ;;  %v4780_v43 = vpack.c.bf16 %v4189_v40, %v4188_v8  ;;  %v3864_v38 = vunpack.c.l.bf16 %v8173_v55  ;;  %v8175_v48 = vld [vmem:[#allocation46_spill] sm:$0xff] }
 0x873   :  { %v3869_v23 = vunpack.c.h.bf16 %v8175_v48 }
 0x874   :  { %4059 = vmatmul.mubr.bf16.vlgmr.msra.gmra.mrb[124].mxu0 %v3858_v1  ;;  %4102 = vmatmul.mubr.bf16.vlgmr.msra.gmra.mrb[124].mxu1 %v3858_v1  ;;  %v3865_v1 = vunpack.c.l.bf16 %v8175_v48 }
 0x875   :  { %4771 = vmatpush3.bf16.msra.mxu0 %v4768_v44  ;;  %4739 = vmatpush3.bf16.msra.mxu1 %v4736_v13 }
 0x876   :  { %4773 = vmatprep.subr.bf16.mxu0 %v4772_v50  ;;  %4741 = vmatprep.subr.bf16.mxu1 %v4740_v12 }
 0x879   :  { %4775 = vmatpush3.bf16.msra.mxu0 %v4772_v50  ;;  %4743 = vmatpush3.bf16.msra.mxu1 %v4740_v12 }
 0x87a   :  { %4777 = vmatprep.subr.bf16.mxu0 %v4776_v58  ;;  %4745 = vmatprep.subr.bf16.mxu1 %v4744_v61 }
 0x87d   :  { %4779 = vmatpush3.bf16.msra.mxu0 %v4776_v58  ;;  %4747 = vmatpush3.bf16.msra.mxu1 %v4744_v61 }
 0x87e   :  { %4781 = vmatprep.subr.bf16.mxu0 %v4780_v43  ;;  %4749 = vmatprep.subr.bf16.mxu1 %v4748_v2 }
 0x881   :  { %4783 = vmatpush3.bf16.msra.mxu0 %v4780_v43  ;;  %4751 = vmatpush3.bf16.msra.mxu1 %v4748_v2 }
 0x882   :  { %4785 = vmatprep.subr.bf16.mxu0 %v4784_v31  ;;  %4753 = vmatprep.subr.bf16.mxu1 %v4752_v17 }
 0x885   :  { %4787 = vmatpush3.bf16.msra.mxu0 %v4784_v31  ;;  %4755 = vmatpush3.bf16.msra.mxu1 %v4752_v17 }
 0x886   :  { %4789 = vmatprep.subr.bf16.mxu0 %v4788_v18  ;;  %4757 = vmatprep.subr.bf16.mxu1 %v4756_v20 }
 0x889   :  { %4791 = vmatpush3.bf16.msra.mxu0 %v4788_v18  ;;  %4759 = vmatpush3.bf16.msra.mxu1 %v4756_v20 }
 0x88a   :  { %4793 = vmatprep.subr.bf16.mxu0 %v4792_v56  ;;  %4761 = vmatprep.subr.bf16.mxu1 %v4760_v33 }
 0x88d   :  { %4795 = vmatpush3.bf16.msra.mxu0 %v4792_v56  ;;  %4763 = vmatpush3.bf16.msra.mxu1 %v4760_v33 }
 0x88e   :  { %4797 = vmatprep.subr.bf16.mxu0 %v4796_v4  ;;  %4765 = vmatprep.subr.bf16.mxu1 %v4764_v24 }
 0x891   :  { %4799 = vmatpush3.bf16.msra.mxu0 %v4796_v4  ;;  %4767 = vmatpush3.bf16.msra.mxu1 %v4764_v24 }
 0x925   :  { %v3906_v57 = vpop.f32.mrb[120].mxu0  ;;  %v3949_v36 = vpop.f32.mrb[120].mxu1 }
 0x926   :  { %v3958_v44 = vadd.f32 %v3906_v57, %v3864_v38  ;;  %v3960_v62 = vadd.f32 %v3949_v36, %v3866_v47  ;;  %v3908_v11 = vpop.f32.mrb[121].mxu0  ;;  %v3951_v50 = vpop.f32.mrb[121].mxu1  ;;  %v8177_v38 = vld [vmem:[#allocation48_spill] sm:$0xff]  ;;  %v8178_v47 = vld [vmem:[#allocation49_spill] sm:$0xff] }
 0x927   :  { %v3959_v58 = vadd.f32 %v3908_v11, %v3865_v1  ;;  %v3961_v8 = vadd.f32 %v3951_v50, %v3867_v7  ;;  %v3910_v40 = vpop.f32.mrb[122].mxu0  ;;  %v3953_v43 = vpop.f32.mrb[122].mxu1  ;;  %v4018_v14 = vunpack.c.l.bf16 %v8177_v38  ;;  %v4020_v57 = vunpack.c.l.bf16 %v8178_v47  ;;  %v8179_v1 = vld [vmem:[#allocation50_spill] sm:$0xff]  ;;  %v8180_v7 = vld [vmem:[#allocation51_spill] sm:$0xff] }
 0x928   :  { %v4617_v31 = vmul.f32 -1.442695, %v3958_v44  ;;  %v3962_v6 = vadd.f32 %v3910_v40, %v3868_v60  ;;  %v3964_v34 = vadd.f32 %v3953_v43, %v3870_v9  ;;  %v3912_v18 = vpop.f32.mrb[123].mxu0  ;;  %v3955_v0 = vpop.f32.mrb[123].mxu1  ;;  %v4619_v28 = vmul.f32 -1.442695, %v3960_v62 }
 0x929   :  { %v4618_v52 = vmul.f32 -1.442695, %v3959_v58  ;;  %v3963_v56 = vadd.f32 %v3912_v18, %v3869_v23  ;;  %v3965_v15 = vadd.f32 %v3955_v0, %v3871_v10  ;;  %v4019_v49 = vunpack.c.l.bf16 %v8179_v1 }
 0x92a   :  { %5465 = vpow2.f32 %v4617_v31  ;;  %v4620_v26 = vmul.f32 -1.442695, %v3962_v6  ;;  %v4622_v46 = vmul.f32 -1.442695, %v3964_v34  ;;  %v4021_v44 = vunpack.c.l.bf16 %v8180_v7 }
 0x92b   :  { %v4621_v4 = vmul.f32 -1.442695, %v3963_v56  ;;  %5467 = vpow2.f32 %v4618_v52  ;;  %v4023_v23 = vunpack.c.h.bf16 %v8179_v1  ;;  %v4025_v34 = vunpack.c.h.bf16 %v8180_v7 }
 0x92c   :  { %5469 = vpow2.f32 %v4620_v26 }
 0x92d   :  { %5471 = vpow2.f32 %v4621_v4 }
 0x92e   :  { %5473 = vtanh.f32 %v3961_v8 }
 0x92f   :  { %5475 = vpow2.f32 %v4619_v28 }
 0x930   :  { %5477 = vpow2.f32 %v4622_v46 }
 0x934   :  { %v5466_v13 = vpop.eup %5465 }
 0x935   :  { %v3984_v25 = vadd.f32 1.0, %v5466_v13  ;;  %v5468_v54 = vpop.eup %5467 }
 0x936   :  { %v5470_v12 = vpop.eup %5469  ;;  %v3985_v22 = vadd.f32 1.0, %v5468_v54 }
 0x937   :  { %5479 = vrcp.f32 %v3984_v25  ;;  %v3987_v27 = vadd.f32 1.0, %v5470_v12  ;;  %v5472_v61 = vpop.eup %5471 }
 0x938   :  { %5481 = vtanh.f32 %v3965_v15  ;;  %v3988_v59 = vadd.f32 1.0, %v5472_v61  ;;  %v5474_v42 = vpop.eup %5473 }
 0x939   :  { %5483 = vrcp.f32 %v3985_v22  ;;  %v5476_v2 = vpop.eup %5475 }
 0x93a   :  { %5485 = vrcp.f32 %v3987_v27  ;;  %v5478_v37 = vpop.eup %5477  ;;  %v3986_v20 = vadd.f32 1.0, %v5476_v2 }
 0x93b   :  { %5487 = vrcp.f32 %v3988_v59  ;;  %v3989_v24 = vadd.f32 1.0, %v5478_v37 }
 0x93c   :  { %5489 = vrcp.f32 %v3986_v20 }
 0x941   :  { %v5480_v29 = vpop.eup %5479 }
 0x942   :  { %v5482_v17 = vpop.eup %5481  ;;  %v4006_v53 = vmul.f32 %v5480_v29, %v5474_v42 }
 0x943   :  { %v5484_v30 = vpop.eup %5483 }
 0x944   :  { %v5486_v21 = vpop.eup %5485  ;;  %v4004_v45 = vmul.f32 %v5484_v30, %v7539_v39  ;;  %v4022_v39 = vunpack.c.h.bf16 %v8177_v38 }
 0x945   :  { %v4007_v33 = vmul.f32 %v5486_v21, %v5482_v17  ;;  %v5488_v3 = vpop.eup %5487 }
 0x946   :  { %v4008_v5 = vadd.f32 %v4006_v53, %v4004_v45  ;;  %v4005_v55 = vmul.f32 %v5488_v3, %v7548_v41  ;;  %v4024_v41 = vunpack.c.h.bf16 %v8178_v47  ;;  %v5490_v28 = vpop.eup %5489 }
 0x947   :  { %v4060_v36 = vpop.f32.mrb[124].mxu0  ;;  %v4103_v48 = vpop.f32.mrb[124].mxu1 }
 0x948   :  { %5491 = vtanh.f32 %v4008_v5  ;;  %v4009_v62 = vadd.f32 %v4007_v33, %v4005_v55  ;;  %v4112_v11 = vadd.f32 %v4060_v36, %v4018_v14  ;;  %v4114_v50 = vadd.f32 %v4103_v48, %v4020_v57  ;;  %v4062_v60 = vpop.f32.mrb[125].mxu0  ;;  %v4105_v9 = vpop.f32.mrb[125].mxu1 }
 0x949   :  { %5493 = vrcp.f32 %v3989_v24  ;;  %v4113_v58 = vadd.f32 %v4062_v60, %v4019_v49  ;;  %v4115_v8 = vadd.f32 %v4105_v9, %v4021_v44  ;;  %v4064_v40 = vpop.f32.mrb[126].mxu0  ;;  %v4107_v43 = vpop.f32.mrb[126].mxu1 }
 0x94a   :  { %5495 = vtanh.f32 %v4009_v62  ;;  %v4623_v10 = vmul.f32 -1.442695, %v4112_v11  ;;  %v4116_v31 = vadd.f32 %v4064_v40, %v4022_v39  ;;  %v4066_v6 = vpop.f32.mrb[127].mxu0  ;;  %v4109_v18 = vpop.f32.mrb[127].mxu1  ;;  %v4118_v52 = vadd.f32 %v4107_v43, %v4024_v41 }
 0x94b   :  { %v4624_v0 = vmul.f32 -1.442695, %v4113_v58  ;;  %v4117_v56 = vadd.f32 %v4066_v6, %v4023_v23  ;;  %v4119_v26 = vadd.f32 %v4109_v18, %v4025_v34  ;;  %v4625_v54 = vmul.f32 -1.442695, %v4114_v50 }
 0x94c   :  { %5497 = vpow2.f32 %v4623_v10  ;;  %v4626_v15 = vmul.f32 -1.442695, %v4116_v31  ;;  %v4628_v22 = vmul.f32 -1.442695, %v4118_v52 }
 0x94d   :  { %v4627_v4 = vmul.f32 -1.442695, %v4117_v56  ;;  %5499 = vpow2.f32 %v4624_v0 }
 0x94e   :  { %5501 = vpow2.f32 %v4626_v15 }
 0x94f   :  { %5503 = vpow2.f32 %v4627_v4 }
 0x950   :  { %5505 = vtanh.f32 %v4115_v8 }
 0x951   :  { %5507 = vpow2.f32 %v4625_v54 }
 0x952   :  { %v5492_v46 = vpop.eup %5491  ;;  %5509 = vpow2.f32 %v4628_v22 }
 0x953   :  { %v4012_v13 = vmul.f32 %v5492_v46, %v5490_v28  ;;  %v5494_v25 = vpop.eup %5493 }
 0x954   :  { %v5496_v12 = vpop.eup %5495 }
 0x955   :  { %v4170_v27 = vmax.f32 %v7557_v63, %v4012_v13  ;;  %v4013_v61 = vmul.f32 %v5496_v12, %v5494_v25 }
 0x956   :  { %v5498_v59 = vpop.eup %5497 }
 0x957   :  { %4733 = vmatprep.mubr.f32.mxu0 %v4170_v27  ;;  %v4138_v42 = vadd.f32 1.0, %v5498_v59  ;;  %v4171_v2 = vmax.f32 %v7562_v32, %v4013_v61  ;;  %v5500_v37 = vpop.eup %5499 }
 0x958   :  { %v5502_v29 = vpop.eup %5501  ;;  %v4139_v17 = vadd.f32 1.0, %v5500_v37 }
 0x959   :  { %5511 = vrcp.f32 %v4138_v42  ;;  %4734 = vmatmul.mubr.f32.vlgmr.msra.gmra.mrb[128].mxu0 %v4171_v2  ;;  %v4141_v53 = vadd.f32 1.0, %v5502_v29  ;;  %v5504_v30 = vpop.eup %5503 }
 0x95a   :  { %5513 = vtanh.f32 %v4119_v26  ;;  %v4142_v63 = vadd.f32 1.0, %v5504_v30  ;;  %v5506_v20 = vpop.eup %5505 }
 0x95b   :  { %5515 = vrcp.f32 %v4139_v17  ;;  %v5508_v21 = vpop.eup %5507 }
 0x95c   :  { %5517 = vrcp.f32 %v4141_v53  ;;  %v5510_v45 = vpop.eup %5509  ;;  %v4140_v24 = vadd.f32 1.0, %v5508_v21 }
 0x95d   :  { %5519 = vrcp.f32 %v4142_v63  ;;  %v4143_v36 = vadd.f32 1.0, %v5510_v45 }
 0x95e   :  { %5521 = vrcp.f32 %v4140_v24 }
 0x963   :  { %v5512_v33 = vpop.eup %5511 }
 0x964   :  { %v5514_v3 = vpop.eup %5513  ;;  %v4160_v5 = vmul.f32 %v5512_v33, %v5506_v20 }
 0x965   :  { %v5516_v32 = vpop.eup %5515 }
 0x966   :  { %v5518_v55 = vpop.eup %5517  ;;  %v4158_v38 = vmul.f32 %v5516_v32, %v7567_v35 }
 0x967   :  { %v4161_v14 = vmul.f32 %v5518_v55, %v5514_v3  ;;  %v5520_v47 = vpop.eup %5519 }
 0x968   :  { %v4162_v57 = vadd.f32 %v4160_v5, %v4158_v38  ;;  %v4159_v48 = vmul.f32 %v5520_v47, %v7571_v51  ;;  %v5522_v49 = vpop.eup %5521  ;;  %v4629_v51 = vld [vmem:[%s7635_s9] ss:$0 sm:$0xff] }
 0x96a   :  { %5523 = vtanh.f32 %v4162_v57  ;;  %v4163_v1 = vadd.f32 %v4161_v14, %v4159_v48 }
 0x96b   :  { %5525 = vrcp.f32 %v4143_v36 }
 0x96c   :  { %5527 = vtanh.f32 %v4163_v1 }
 0x974   :  { %v5524_v7 = vpop.eup %5523 }
 0x975   :  { %v4166_v44 = vmul.f32 %v5524_v7, %v5522_v49  ;;  %v5526_v39 = vpop.eup %5525 }
 0x976   :  { %v5528_v62 = vpop.eup %5527 }
 0x977   :  { %v4176_v11 = vmax.f32 %v7577_v16, %v4166_v44  ;;  %v4167_v50 = vmul.f32 %v5528_v62, %v5526_v39 }
 0x979   :  { %4698 = vmatprep.mubr.f32.mxu1 %v4176_v11  ;;  %v4177_v35 = vmax.f32 %v7582_v19, %v4167_v50 }
 0x97b   :  { %4699 = vmatmul.mubr.f32.vlgmr.msra.gmra.mrb[128].mxu1 %v4177_v35 }
 0xa2c   :  { %v4735_v60 = vpop.f32.mrb[128].mxu0 }
 0xa2d   :  { %v4357_v9 = vpop.f32.mrb[129].mxu0 }
 0xa4e   :  { %v4700_v41 = vpop.f32.mrb[128].mxu1 }
 0xa4f   :  { %v4363_v58 = vadd.f32 %v4735_v60, %v4700_v41  ;;  %v4282_v8 = vpop.f32.mrb[129].mxu1 }
 0xa50   :  { %v4358_v40 = vadd.f32 %v4357_v9, %v4282_v8 }
 0xa51   :  { %v4374_v43 = vadd.f32 %v4629_v51, %v4363_v58 }
 0xa52   :  { %v4373_v23 = vadd.f32 %v4629_v51, %v4358_v40 }
 0xa53   :  { %4376 = vst [vmem:[#allocation18 + $0x8] sm:$0xff] %v4374_v43 }
 0xa54   :  { %4375 = vst [vmem:[#allocation18] sm:$0xff] %v4373_v23 }
 0xa55   :  { %5852 = shalt.err (!%p5849_p4)
}
 0xa56   :  { %s5853_s9 = scalar_lea.hbm %s7636_s10, 256 }
 0xa57   :  { %p5854_p5 = scmp.ne.s32.totalorder %s7636_s10, %s5853_s9  ;;  %p5857_p6 = scmp.lt.u32.totalorder %s5853_s9, %s7636_s10 }
 0xa59   :  { %p5859_p7 = pnand %p5857_p6, %p5854_p5 }
 0xa5b   :  { %5862 = shalt.err (!%p5859_p7)
}
 0xa5c   :  { %4388 = dma.vmem_to_hbm [thread:$0]  %s4383_s7, 256, %s7636_s10, [#allocation8], %s5878_s3, %s5878_s3, %s5879_s28  }
 0xa5d   :  { %5871 = dma.done.wait [#allocation8], 256  }
 0xa5e   :  { %5872 = vsyncadd [#allocation8], 4294967040 }
 0xa5f   :  { %4392 = vsyncpa [#allocation7], 1 }
 0xa60   :  { %4393 = vsyncpa [#allocation10], 1 }
 0xa61   :  { %4394 = vsyncpa [#allocation13], 1 }
 0xa62   :  { %4395 = vsyncpa [#allocation16], 1 }
 0xa63   :  { %4396 = vsyncpa [#allocation8], 1 }

</bundles_post_ra>
